<compile_context>
chip_gen: v7x
topology: tpu7x:2x2x1
jax: 0.10.0
libtpu: 0.0.40
codegen_flags: <defaults>
</compile_context>

<pallas_src>
import functools

import jax
import jax.numpy as jnp
from jax.experimental import pallas as pl
from jax.experimental.pallas import tpu as pltpu


# ----------------------------------------------------------------------------
# Pallas kernel: one block of `bw` windows, full N, full C.
# ----------------------------------------------------------------------------
def _window_attn_kernel(x_ref, wqkv_ref, bqkv_ref, bias_ref, wproj_ref,
                        bproj_ref, o_ref, *, num_heads, head_dim, scale):
    bw, N, C = x_ref.shape
    xv = x_ref[...]                                  # (bw, N, C)
    mm_dtype = xv.dtype

    # --- fused qkv projection: one big (bw*N, C) x (C, 3C) matmul -----------
    xm = xv.reshape(bw * N, C)
    qkv = jnp.dot(xm, wqkv_ref[...], preferred_element_type=jnp.float32)
    qkv = qkv + bqkv_ref[...]                        # f32, (bw*N, 3C)
    qkv = qkv.reshape(bw, N, 3 * C)

    bias = bias_ref[...].astype(jnp.float32)         # (bw or 1, H, N, N)

    head_outs = []
    for h in range(num_heads):
        lo = h * head_dim
        hi = lo + head_dim
        qh = (qkv[:, :, lo:hi] * scale).astype(mm_dtype)          # (bw, N, hd)
        kh = qkv[:, :, C + lo:C + hi].astype(mm_dtype)            # (bw, N, hd)
        vh = qkv[:, :, 2 * C + lo:2 * C + hi].astype(mm_dtype)    # (bw, N, hd)

        attn = jnp.einsum("bqd,bkd->bqk", qh, kh,
                          preferred_element_type=jnp.float32)     # (bw, N, N)
        attn = attn + bias[:, h]                      # rel-pos bias (+ mask)

        # numerically-stable softmax over keys (f32 epilogue)
        attn = attn - jnp.max(attn, axis=-1, keepdims=True)
        p = jnp.exp(attn)
        p = p / jnp.sum(p, axis=-1, keepdims=True)

        oh = jnp.einsum("bqk,bkd->bqd", p.astype(mm_dtype), vh,
                        preferred_element_type=jnp.float32)       # (bw, N, hd)
        head_outs.append(oh)

    out = jnp.concatenate(head_outs, axis=-1)        # (bw, N, C), head-major
    out = out.reshape(bw * N, C).astype(mm_dtype)

    # --- output projection ---------------------------------------------------
    out = jnp.dot(out, wproj_ref[...], preferred_element_type=jnp.float32)
    out = out + bproj_ref[...]
    o_ref[...] = out.reshape(bw, N, C).astype(o_ref.dtype)


# ----------------------------------------------------------------------------
# Helpers
# ----------------------------------------------------------------------------
def _build_relative_position_index(window_size):
    """Same construction as WindowAttention.__init__ (torch meshgrid 'ij')."""
    Wh, Ww = window_size
    coords_h = jnp.arange(Wh)
    coords_w = jnp.arange(Ww)
    coords = jnp.stack(jnp.meshgrid(coords_h, coords_w, indexing="ij"))  # (2,Wh,Ww)
    coords_flat = coords.reshape(2, -1)                                  # (2,N)
    rel = coords_flat[:, :, None] - coords_flat[:, None, :]              # (2,N,N)
    rel = jnp.transpose(rel, (1, 2, 0))                                  # (N,N,2)
    rc0 = rel[..., 0] + (Wh - 1)
    rc1 = rel[..., 1] + (Ww - 1)
    return rc0 * (2 * Ww - 1) + rc1                                      # (N,N)


def _largest_divisor_leq(n, cap):
    cap = max(1, min(n, cap))
    for d in range(cap, 0, -1):
        if n % d == 0:
            return d
    return 1


# ----------------------------------------------------------------------------
# Wrapper
# ----------------------------------------------------------------------------
def window_attention_forward(x, params, *, window_size, num_heads, mask=None,
                             qk_scale=None, compute_dtype=None,
                             target_rows=512):
    """WindowAttention.forward.

    Args:
      x:      (B_, N, C) with B_ = num_windows * B, N = Wh*Ww, C = dim.
      params: dict with PyTorch-layout parameters:
        qkv_weight (3C, C), qkv_bias (3C,), proj_weight (C, C), proj_bias (C,),
        rel_pos_bias_table ((2Wh-1)*(2Ww-1), H).
      window_size: (Wh, Ww).
      num_heads:   H.
      mask: optional (nW, N, N) additive 0/-inf (or 0/-100) shift mask.
      compute_dtype: optional (e.g. jnp.bfloat16) cast for matmul operands;
        accumulation and softmax stay float32.
    Returns:
      (B_, N, C) in x's original dtype.
    """
    B_, N, C = x.shape
    H = num_heads
    assert C % H == 0, "dim must be divisible by num_heads"
    hd = C // H
    scale = float(qk_scale) if qk_scale is not None else float(hd) ** (-0.5)
    assert N == window_size[0] * window_size[1], "N must equal Wh*Ww"

    # Relative position bias: (H, N, N), host-side gather (tiny).
    rel_index = _build_relative_position_index(window_size)
    rel_bias = params["rel_pos_bias_table"][rel_index.reshape(-1)]
    rel_bias = rel_bias.reshape(N, N, H)
    rel_bias = jnp.transpose(rel_bias, (2, 0, 1)).astype(jnp.float32)

    # Fold the shift mask (if any) into a per-window additive bias tensor.
    if mask is None:
        bias_all = rel_bias[None]                       # (1, H, N, N)
        nW = 1
        per_window_bias = False
        window_group = B_
    else:
        nW = mask.shape[0]
        assert B_ % nW == 0, "B_ must be a multiple of num_windows"
        bias_all = rel_bias[None] + mask[:, None].astype(jnp.float32)  # (nW,H,N,N)
        per_window_bias = True
        window_group = nW

    # Pick the windows-per-step block: big (≈ target_rows rows) but a divisor
    # of the window group so mask indexing stays a simple modular block index.
    cap_rows = max(1, target_rows // N)
    cap_bias = max(1, (4 * 1024 * 1024) // max(1, H * N * N * 4))
    bw = _largest_divisor_leq(window_group, min(cap_rows, cap_bias))
    grid = (B_ // bw,)

    if per_window_bias:
        bw_b = bw
        n_bias_blocks = nW // bw
        bias_index = lambda i: (i % n_bias_blocks, 0, 0, 0)
    else:
        bw_b = 1
        bias_index = lambda i: (0, 0, 0, 0)

    # Parameters in matmul-friendly layout; biases stay f32.
    wqkv = params["qkv_weight"].T                       # (C, 3C)
    wproj = params["proj_weight"].T                     # (C, C)
    bqkv = params["qkv_bias"].reshape(1, 3 * C).astype(jnp.float32)
    bproj = params["proj_bias"].reshape(1, C).astype(jnp.float32)

    out_dtype = x.dtype
    if compute_dtype is not None:
        x = x.astype(compute_dtype)
        wqkv = wqkv.astype(compute_dtype)
        wproj = wproj.astype(compute_dtype)

    kernel = functools.partial(_window_attn_kernel, num_heads=H, head_dim=hd,
                               scale=scale)

    flops = int(2 * B_ * N * C * (3 * C)      # qkv projection
                + 4 * B_ * H * N * N * hd     # q@k^T and attn@v
                + 2 * B_ * N * C * C)         # output projection
    transcendentals = int(B_ * H * N * N)     # exp in softmax
    bytes_accessed = int(
        x.size * x.dtype.itemsize
        + wqkv.size * wqkv.dtype.itemsize
        + wproj.size * wproj.dtype.itemsize
        + bias_all.size * 4 + bqkv.size * 4 + bproj.size * 4
        + B_ * N * C * jnp.dtype(out_dtype).itemsize)

    out = pl.pallas_call(
        kernel,
        out_shape=jax.ShapeDtypeStruct((B_, N, C), out_dtype),
        grid_spec=pltpu.PrefetchScalarGridSpec(
            num_scalar_prefetch=0,
            grid=grid,
            in_specs=[
                pl.BlockSpec((bw, N, C), lambda i: (i, 0, 0)),       # x block
                pl.BlockSpec((C, 3 * C), lambda i: (0, 0)),          # qkv W
                pl.BlockSpec((1, 3 * C), lambda i: (0, 0)),          # qkv b
                pl.BlockSpec((bw_b, H, N, N), bias_index),           # bias(+mask)
                pl.BlockSpec((C, C), lambda i: (0, 0)),              # proj W
                pl.BlockSpec((1, C), lambda i: (0, 0)),              # proj b
            ],
            out_specs=pl.BlockSpec((bw, N, C), lambda i: (i, 0, 0)),
        ),
        compiler_params=pltpu.CompilerParams(
            dimension_semantics=("parallel",),
            vmem_limit_bytes=32 * 1024 * 1024,
        ),
        cost_estimate=pl.CostEstimate(
            flops=flops,
            transcendentals=transcendentals,
            bytes_accessed=bytes_accessed),
    )(x, wqkv, bqkv, bias_all, wproj, bproj)
    return out


# ----------------------------------------------------------------------------
# Pure-JAX reference (mirrors the PyTorch forward exactly)
# ----------------------------------------------------------------------------
def window_attention_ref(x, params, *, window_size, num_heads, mask=None,
                         qk_scale=None):
    B_, N, C = x.shape
    H = num_heads
    hd = C // H
    scale = qk_scale if qk_scale is not None else hd ** (-0.5)
    qkv = x @ params["qkv_weight"].T + params["qkv_bias"]         # (B_,N,3C)
    qkv = qkv.reshape(B_, N, 3, H, hd).transpose(2, 0, 3, 1, 4)
    q, k, v = qkv[0], qkv[1], qkv[2]
    q = q * scale
    attn = jnp.einsum("bhqd,bhkd->bhqk", q, k)
    rel_index = _build_relative_position_index(window_size)
    rel_bias = params["rel_pos_bias_table"][rel_index.reshape(-1)]
    rel_bias = rel_bias.reshape(N, N, H).transpose(2, 0, 1)
    attn = attn + rel_bias[None]
    if mask is not None:
        nW = mask.shape[0]
        attn = attn.reshape(B_ // nW, nW, H, N, N) + mask[None, :, None]
        attn = attn.reshape(B_, H, N, N)
    attn = jax.nn.softmax(attn, axis=-1)
    out = jnp.einsum("bhqk,bhkd->bhqd", attn, v)
    out = out.transpose(0, 2, 1, 3).reshape(B_, N, C)
    return out @ params["proj_weight"].T + params["proj_bias"]


if __name__ == "__main__":
    # Small shapes consistent with the module: dim=32, window 4x4 (N=16),
    # 4 heads, B=2 images x nW=4 windows -> B_=8.
    window_size = (4, 4)
    N = window_size[0] * window_size[1]
    dim = 32
    num_heads = 4
    B, nW = 2, 4
    B_ = B * nW

    key = jax.random.PRNGKey(0)
    keys = jax.random.split(key, 7)
    x = jax.random.normal(keys[0], (B_, N, dim), dtype=jnp.float32)
    params = {
        "qkv_weight": jax.random.normal(keys[1], (3 * dim, dim),
                                        dtype=jnp.float32) * 0.05,
        "qkv_bias": jax.random.normal(keys[2], (3 * dim,),
                                      dtype=jnp.float32) * 0.02,
        "proj_weight": jax.random.normal(keys[3], (dim, dim),
                                         dtype=jnp.float32) * 0.05,
        "proj_bias": jax.random.normal(keys[4], (dim,),
                                       dtype=jnp.float32) * 0.02,
        "rel_pos_bias_table": jax.random.normal(
            keys[5],
            ((2 * window_size[0] - 1) * (2 * window_size[1] - 1), num_heads),
            dtype=jnp.float32) * 0.02,
    }
    # Shifted-window style additive mask (0 / -100), deterministic.
    mask = jnp.where(jax.random.uniform(keys[6], (nW, N, N)) < 0.5,
                     0.0, -100.0).astype(jnp.float32)

    fwd = jax.jit(functools.partial(window_attention_forward,
                                    window_size=window_size,
                                    num_heads=num_heads))

    out_nomask = jax.block_until_ready(fwd(x, params))
    out_mask = jax.block_until_ready(fwd(x, params, mask=mask))

    ref_nomask = window_attention_ref(x, params, window_size=window_size,
                                      num_heads=num_heads)
    ref_mask = window_attention_ref(x, params, window_size=window_size,
                                    num_heads=num_heads, mask=mask)

    assert out_nomask.shape == (B_, N, dim), out_nomask.shape
    assert out_mask.shape == (B_, N, dim), out_mask.shape
    err0 = float(jnp.max(jnp.abs(out_nomask - ref_nomask)))
    err1 = float(jnp.max(jnp.abs(out_mask - ref_mask)))
    assert jnp.allclose(out_nomask, ref_nomask, atol=2e-4, rtol=2e-4), err0
    assert jnp.allclose(out_mask, ref_mask, atol=2e-4, rtol=2e-4), err1

    print("KERNEL_OK")
</pallas_src>

<mosaic_0001>
module attributes {stable_mosaic.version = 11 : i64} {
  func.func @_window_attn_kernel(%arg0: i32, %arg1: memref<8x16x32xf32, #tpu.memory_space<vmem>>, %arg2: memref<32x96xf32, #tpu.memory_space<vmem>>, %arg3: memref<1x96xf32, #tpu.memory_space<vmem>>, %arg4: memref<1x4x16x16xf32, #tpu.memory_space<vmem>>, %arg5: memref<32x32xf32, #tpu.memory_space<vmem>>, %arg6: memref<1x32xf32, #tpu.memory_space<vmem>>, %arg7: memref<8x16x32xf32, #tpu.memory_space<vmem>>) attributes {dimension_semantics = [#tpu.dimension_semantics<parallel>], iteration_bounds = array<i64: 1>, scalar_prefetch = 0 : i64, scratch_operands = 0 : i64, tpu.core_type = #tpu.core_type<tc>, window_params = [{transform_indices = @transform_0, window_bounds = array<i64: 8, 16, 32>}, {pipeline_mode = #tpu.pipeline_mode<synchronous>, transform_indices = @transform_1, window_bounds = array<i64: 32, 96>}, {pipeline_mode = #tpu.pipeline_mode<synchronous>, transform_indices = @transform_2, window_bounds = array<i64: 1, 96>}, {pipeline_mode = #tpu.pipeline_mode<synchronous>, transform_indices = @transform_3, window_bounds = array<i64: 1, 4, 16, 16>}, {pipeline_mode = #tpu.pipeline_mode<synchronous>, transform_indices = @transform_4, window_bounds = array<i64: 32, 32>}, {pipeline_mode = #tpu.pipeline_mode<synchronous>, transform_indices = @transform_5, window_bounds = array<i64: 1, 32>}, {transform_indices = @transform_6, window_bounds = array<i64: 8, 16, 32>}]} {
    %c0 = arith.constant 0 : index
    %c0_0 = arith.constant 0 : index
    %c0_1 = arith.constant 0 : index
    %0 = vector.load %arg1[%c0, %c0_0, %c0_1] : memref<8x16x32xf32, #tpu.memory_space<vmem>>, vector<8x16x32xf32>
    %1 = vector.shape_cast %0 : vector<8x16x32xf32> to vector<128x32xf32>
    %c0_2 = arith.constant 0 : index
    %c0_3 = arith.constant 0 : index
    %2 = vector.load %arg2[%c0_2, %c0_3] : memref<32x96xf32, #tpu.memory_space<vmem>>, vector<32x96xf32>
    %cst = arith.constant dense<0.000000e+00> : vector<128x96xf32>
    %3 = tpu.matmul %1, %2, %cst {dimension_numbers = #tpu.dot_dimension_numbers<[1], [0], [0], [1], [0, 0, 1, 1], [], []>} : vector<128x32xf32>, vector<32x96xf32>, vector<128x96xf32> -> vector<128x96xf32>
    %c0_4 = arith.constant 0 : index
    %c0_5 = arith.constant 0 : index
    %4 = vector.load %arg3[%c0_4, %c0_5] : memref<1x96xf32, #tpu.memory_space<vmem>>, vector<1x96xf32>
    %5 = vector.broadcast %4 : vector<1x96xf32> to vector<128x96xf32>
    %6 = arith.addf %3, %5 : vector<128x96xf32>
    %7 = vector.shape_cast %6 : vector<128x96xf32> to vector<8x16x96xf32>
    %c0_6 = arith.constant 0 : index
    %c0_7 = arith.constant 0 : index
    %c0_8 = arith.constant 0 : index
    %c0_9 = arith.constant 0 : index
    %8 = vector.load %arg4[%c0_6, %c0_7, %c0_8, %c0_9] : memref<1x4x16x16xf32, #tpu.memory_space<vmem>>, vector<1x4x16x16xf32>
    %9 = vector.extract_strided_slice %7 {offsets = [0, 0, 0], sizes = [8, 16, 8], strides = [1, 1, 1]} : vector<8x16x96xf32> to vector<8x16x8xf32>
    %cst_10 = arith.constant 0.353553385 : f32
    %10 = vector.broadcast %cst_10 : f32 to vector<8x16x8xf32>
    %11 = arith.mulf %9, %10 : vector<8x16x8xf32>
    %12 = vector.extract_strided_slice %7 {offsets = [0, 0, 32], sizes = [8, 16, 8], strides = [1, 1, 1]} : vector<8x16x96xf32> to vector<8x16x8xf32>
    %13 = vector.extract_strided_slice %7 {offsets = [0, 0, 64], sizes = [8, 16, 8], strides = [1, 1, 1]} : vector<8x16x96xf32> to vector<8x16x8xf32>
    "tpu.trace_start"() <{level = 10 : i32, message = "bqd,bkd->bqk"}> : () -> ()
    %cst_11 = arith.constant dense<0.000000e+00> : vector<8x16x16xf32>
    %14 = tpu.matmul %11, %12, %cst_11 {dimension_numbers = #tpu.dot_dimension_numbers<[2], [2], [1], [1], [0, 0, 0, 1, 1, 1], [0], [0]>} : vector<8x16x8xf32>, vector<8x16x8xf32>, vector<8x16x16xf32> -> vector<8x16x16xf32>
    "tpu.trace_stop"() : () -> ()
    %15 = vector.extract_strided_slice %8 {offsets = [0, 0, 0, 0], sizes = [1, 1, 16, 16], strides = [1, 1, 1, 1]} : vector<1x4x16x16xf32> to vector<1x1x16x16xf32>
    %16 = vector.shape_cast %15 : vector<1x1x16x16xf32> to vector<1x16x16xf32>
    %17 = vector.broadcast %16 : vector<1x16x16xf32> to vector<8x16x16xf32>
    %18 = arith.addf %14, %17 : vector<8x16x16xf32>
    %cst_12 = arith.constant dense<0xFF800000> : vector<8x16xf32>
    %19 = vector.multi_reduction <maximumf>, %18, %cst_12 [2] : vector<8x16x16xf32> to vector<8x16xf32>
    %20 = vector.shape_cast %19 : vector<8x16xf32> to vector<8x16x1xf32>
    %21 = vector.broadcast %20 : vector<8x16x1xf32> to vector<8x16x16xf32>
    %22 = arith.subf %18, %21 : vector<8x16x16xf32>
    %23 = math.exp %22 : vector<8x16x16xf32>
    %cst_13 = arith.constant dense<0.000000e+00> : vector<8x16xf32>
    %24 = vector.multi_reduction <add>, %23, %cst_13 [2] : vector<8x16x16xf32> to vector<8x16xf32>
    %25 = vector.shape_cast %24 : vector<8x16xf32> to vector<8x16x1xf32>
    %26 = vector.broadcast %25 : vector<8x16x1xf32> to vector<8x16x16xf32>
    %27 = arith.divf %23, %26 : vector<8x16x16xf32>
    "tpu.trace_start"() <{level = 10 : i32, message = "bqk,bkd->bqd"}> : () -> ()
    %cst_14 = arith.constant dense<0.000000e+00> : vector<8x16x8xf32>
    %28 = tpu.matmul %27, %13, %cst_14 {dimension_numbers = #tpu.dot_dimension_numbers<[2], [1], [1], [2], [0, 0, 0, 1, 1, 2], [0], [0]>} : vector<8x16x16xf32>, vector<8x16x8xf32>, vector<8x16x8xf32> -> vector<8x16x8xf32>
    "tpu.trace_stop"() : () -> ()
    %29 = vector.extract_strided_slice %7 {offsets = [0, 0, 8], sizes = [8, 16, 8], strides = [1, 1, 1]} : vector<8x16x96xf32> to vector<8x16x8xf32>
    %cst_15 = arith.constant 0.353553385 : f32
    %30 = vector.broadcast %cst_15 : f32 to vector<8x16x8xf32>
    %31 = arith.mulf %29, %30 : vector<8x16x8xf32>
    %32 = vector.extract_strided_slice %7 {offsets = [0, 0, 40], sizes = [8, 16, 8], strides = [1, 1, 1]} : vector<8x16x96xf32> to vector<8x16x8xf32>
    %33 = vector.extract_strided_slice %7 {offsets = [0, 0, 72], sizes = [8, 16, 8], strides = [1, 1, 1]} : vector<8x16x96xf32> to vector<8x16x8xf32>
    "tpu.trace_start"() <{level = 10 : i32, message = "bqd,bkd->bqk"}> : () -> ()
    %cst_16 = arith.constant dense<0.000000e+00> : vector<8x16x16xf32>
    %34 = tpu.matmul %31, %32, %cst_16 {dimension_numbers = #tpu.dot_dimension_numbers<[2], [2], [1], [1], [0, 0, 0, 1, 1, 1], [0], [0]>} : vector<8x16x8xf32>, vector<8x16x8xf32>, vector<8x16x16xf32> -> vector<8x16x16xf32>
    "tpu.trace_stop"() : () -> ()
    %35 = vector.extract_strided_slice %8 {offsets = [0, 1, 0, 0], sizes = [1, 1, 16, 16], strides = [1, 1, 1, 1]} : vector<1x4x16x16xf32> to vector<1x1x16x16xf32>
    %36 = vector.shape_cast %35 : vector<1x1x16x16xf32> to vector<1x16x16xf32>
    %37 = vector.broadcast %36 : vector<1x16x16xf32> to vector<8x16x16xf32>
    %38 = arith.addf %34, %37 : vector<8x16x16xf32>
    %cst_17 = arith.constant dense<0xFF800000> : vector<8x16xf32>
    %39 = vector.multi_reduction <maximumf>, %38, %cst_17 [2] : vector<8x16x16xf32> to vector<8x16xf32>
    %40 = vector.shape_cast %39 : vector<8x16xf32> to vector<8x16x1xf32>
    %41 = vector.broadcast %40 : vector<8x16x1xf32> to vector<8x16x16xf32>
    %42 = arith.subf %38, %41 : vector<8x16x16xf32>
    %43 = math.exp %42 : vector<8x16x16xf32>
    %cst_18 = arith.constant dense<0.000000e+00> : vector<8x16xf32>
    %44 = vector.multi_reduction <add>, %43, %cst_18 [2] : vector<8x16x16xf32> to vector<8x16xf32>
    %45 = vector.shape_cast %44 : vector<8x16xf32> to vector<8x16x1xf32>
    %46 = vector.broadcast %45 : vector<8x16x1xf32> to vector<8x16x16xf32>
    %47 = arith.divf %43, %46 : vector<8x16x16xf32>
    "tpu.trace_start"() <{level = 10 : i32, message = "bqk,bkd->bqd"}> : () -> ()
    %cst_19 = arith.constant dense<0.000000e+00> : vector<8x16x8xf32>
    %48 = tpu.matmul %47, %33, %cst_19 {dimension_numbers = #tpu.dot_dimension_numbers<[2], [1], [1], [2], [0, 0, 0, 1, 1, 2], [0], [0]>} : vector<8x16x16xf32>, vector<8x16x8xf32>, vector<8x16x8xf32> -> vector<8x16x8xf32>
    "tpu.trace_stop"() : () -> ()
    %49 = vector.extract_strided_slice %7 {offsets = [0, 0, 16], sizes = [8, 16, 8], strides = [1, 1, 1]} : vector<8x16x96xf32> to vector<8x16x8xf32>
    %cst_20 = arith.constant 0.353553385 : f32
    %50 = vector.broadcast %cst_20 : f32 to vector<8x16x8xf32>
    %51 = arith.mulf %49, %50 : vector<8x16x8xf32>
    %52 = vector.extract_strided_slice %7 {offsets = [0, 0, 48], sizes = [8, 16, 8], strides = [1, 1, 1]} : vector<8x16x96xf32> to vector<8x16x8xf32>
    %53 = vector.extract_strided_slice %7 {offsets = [0, 0, 80], sizes = [8, 16, 8], strides = [1, 1, 1]} : vector<8x16x96xf32> to vector<8x16x8xf32>
    "tpu.trace_start"() <{level = 10 : i32, message = "bqd,bkd->bqk"}> : () -> ()
    %cst_21 = arith.constant dense<0.000000e+00> : vector<8x16x16xf32>
    %54 = tpu.matmul %51, %52, %cst_21 {dimension_numbers = #tpu.dot_dimension_numbers<[2], [2], [1], [1], [0, 0, 0, 1, 1, 1], [0], [0]>} : vector<8x16x8xf32>, vector<8x16x8xf32>, vector<8x16x16xf32> -> vector<8x16x16xf32>
    "tpu.trace_stop"() : () -> ()
    %55 = vector.extract_strided_slice %8 {offsets = [0, 2, 0, 0], sizes = [1, 1, 16, 16], strides = [1, 1, 1, 1]} : vector<1x4x16x16xf32> to vector<1x1x16x16xf32>
    %56 = vector.shape_cast %55 : vector<1x1x16x16xf32> to vector<1x16x16xf32>
    %57 = vector.broadcast %56 : vector<1x16x16xf32> to vector<8x16x16xf32>
    %58 = arith.addf %54, %57 : vector<8x16x16xf32>
    %cst_22 = arith.constant dense<0xFF800000> : vector<8x16xf32>
    %59 = vector.multi_reduction <maximumf>, %58, %cst_22 [2] : vector<8x16x16xf32> to vector<8x16xf32>
    %60 = vector.shape_cast %59 : vector<8x16xf32> to vector<8x16x1xf32>
    %61 = vector.broadcast %60 : vector<8x16x1xf32> to vector<8x16x16xf32>
    %62 = arith.subf %58, %61 : vector<8x16x16xf32>
    %63 = math.exp %62 : vector<8x16x16xf32>
    %cst_23 = arith.constant dense<0.000000e+00> : vector<8x16xf32>
    %64 = vector.multi_reduction <add>, %63, %cst_23 [2] : vector<8x16x16xf32> to vector<8x16xf32>
    %65 = vector.shape_cast %64 : vector<8x16xf32> to vector<8x16x1xf32>
    %66 = vector.broadcast %65 : vector<8x16x1xf32> to vector<8x16x16xf32>
    %67 = arith.divf %63, %66 : vector<8x16x16xf32>
    "tpu.trace_start"() <{level = 10 : i32, message = "bqk,bkd->bqd"}> : () -> ()
    %cst_24 = arith.constant dense<0.000000e+00> : vector<8x16x8xf32>
    %68 = tpu.matmul %67, %53, %cst_24 {dimension_numbers = #tpu.dot_dimension_numbers<[2], [1], [1], [2], [0, 0, 0, 1, 1, 2], [0], [0]>} : vector<8x16x16xf32>, vector<8x16x8xf32>, vector<8x16x8xf32> -> vector<8x16x8xf32>
    "tpu.trace_stop"() : () -> ()
    %69 = vector.extract_strided_slice %7 {offsets = [0, 0, 24], sizes = [8, 16, 8], strides = [1, 1, 1]} : vector<8x16x96xf32> to vector<8x16x8xf32>
    %cst_25 = arith.constant 0.353553385 : f32
    %70 = vector.broadcast %cst_25 : f32 to vector<8x16x8xf32>
    %71 = arith.mulf %69, %70 : vector<8x16x8xf32>
    %72 = vector.extract_strided_slice %7 {offsets = [0, 0, 56], sizes = [8, 16, 8], strides = [1, 1, 1]} : vector<8x16x96xf32> to vector<8x16x8xf32>
    %73 = vector.extract_strided_slice %7 {offsets = [0, 0, 88], sizes = [8, 16, 8], strides = [1, 1, 1]} : vector<8x16x96xf32> to vector<8x16x8xf32>
    "tpu.trace_start"() <{level = 10 : i32, message = "bqd,bkd->bqk"}> : () -> ()
    %cst_26 = arith.constant dense<0.000000e+00> : vector<8x16x16xf32>
    %74 = tpu.matmul %71, %72, %cst_26 {dimension_numbers = #tpu.dot_dimension_numbers<[2], [2], [1], [1], [0, 0, 0, 1, 1, 1], [0], [0]>} : vector<8x16x8xf32>, vector<8x16x8xf32>, vector<8x16x16xf32> -> vector<8x16x16xf32>
    "tpu.trace_stop"() : () -> ()
    %75 = vector.extract_strided_slice %8 {offsets = [0, 3, 0, 0], sizes = [1, 1, 16, 16], strides = [1, 1, 1, 1]} : vector<1x4x16x16xf32> to vector<1x1x16x16xf32>
    %76 = vector.shape_cast %75 : vector<1x1x16x16xf32> to vector<1x16x16xf32>
    %77 = vector.broadcast %76 : vector<1x16x16xf32> to vector<8x16x16xf32>
    %78 = arith.addf %74, %77 : vector<8x16x16xf32>
    %cst_27 = arith.constant dense<0xFF800000> : vector<8x16xf32>
    %79 = vector.multi_reduction <maximumf>, %78, %cst_27 [2] : vector<8x16x16xf32> to vector<8x16xf32>
    %80 = vector.shape_cast %79 : vector<8x16xf32> to vector<8x16x1xf32>
    %81 = vector.broadcast %80 : vector<8x16x1xf32> to vector<8x16x16xf32>
    %82 = arith.subf %78, %81 : vector<8x16x16xf32>
    %83 = math.exp %82 : vector<8x16x16xf32>
    %cst_28 = arith.constant dense<0.000000e+00> : vector<8x16xf32>
    %84 = vector.multi_reduction <add>, %83, %cst_28 [2] : vector<8x16x16xf32> to vector<8x16xf32>
    %85 = vector.shape_cast %84 : vector<8x16xf32> to vector<8x16x1xf32>
    %86 = vector.broadcast %85 : vector<8x16x1xf32> to vector<8x16x16xf32>
    %87 = arith.divf %83, %86 : vector<8x16x16xf32>
    "tpu.trace_start"() <{level = 10 : i32, message = "bqk,bkd->bqd"}> : () -> ()
    %cst_29 = arith.constant dense<0.000000e+00> : vector<8x16x8xf32>
    %88 = tpu.matmul %87, %73, %cst_29 {dimension_numbers = #tpu.dot_dimension_numbers<[2], [1], [1], [2], [0, 0, 0, 1, 1, 2], [0], [0]>} : vector<8x16x16xf32>, vector<8x16x8xf32>, vector<8x16x8xf32> -> vector<8x16x8xf32>
    "tpu.trace_stop"() : () -> ()
    %89 = tpu.concatenate %28, %48, %68, %88 in 2 : vector<8x16x8xf32>, vector<8x16x8xf32>, vector<8x16x8xf32>, vector<8x16x8xf32> -> vector<8x16x32xf32>
    %90 = vector.shape_cast %89 : vector<8x16x32xf32> to vector<128x32xf32>
    %c0_30 = arith.constant 0 : index
    %c0_31 = arith.constant 0 : index
    %91 = vector.load %arg5[%c0_30, %c0_31] : memref<32x32xf32, #tpu.memory_space<vmem>>, vector<32x32xf32>
    %cst_32 = arith.constant dense<0.000000e+00> : vector<128x32xf32>
    %92 = tpu.matmul %90, %91, %cst_32 {dimension_numbers = #tpu.dot_dimension_numbers<[1], [0], [0], [1], [0, 0, 1, 1], [], []>} : vector<128x32xf32>, vector<32x32xf32>, vector<128x32xf32> -> vector<128x32xf32>
    %c0_33 = arith.constant 0 : index
    %c0_34 = arith.constant 0 : index
    %93 = vector.load %arg6[%c0_33, %c0_34] : memref<1x32xf32, #tpu.memory_space<vmem>>, vector<1x32xf32>
    %94 = vector.broadcast %93 : vector<1x32xf32> to vector<128x32xf32>
    %95 = arith.addf %92, %94 : vector<128x32xf32>
    %96 = vector.shape_cast %95 : vector<128x32xf32> to vector<8x16x32xf32>
    %c0_35 = arith.constant 0 : index
    %c0_36 = arith.constant 0 : index
    %c0_37 = arith.constant 0 : index
    %97 = vector.load %arg7[%c0_35, %c0_36, %c0_37] : memref<8x16x32xf32, #tpu.memory_space<vmem>>, vector<8x16x32xf32>
    tpu.vector_store %arg7[%c0_35, %c0_36, %c0_37], %96 {strides = array<i32>} : memref<8x16x32xf32, #tpu.memory_space<vmem>>, vector<8x16x32xf32>,
    return
  }
  func.func @transform_0(%arg0: i32) -> (i32, i32, i32) {
    %c0_i32 = arith.constant 0 : i32
    %c0_i32_0 = arith.constant 0 : i32
    %c0_i32_1 = arith.constant 0 : i32
    return %arg0, %c0_i32, %c0_i32_0 : i32, i32, i32
  }
  func.func @transform_1(%arg0: i32) -> (i32, i32) {
    %c0_i32 = arith.constant 0 : i32
    %c0_i32_0 = arith.constant 0 : i32
    %c0_i32_1 = arith.constant 0 : i32
    return %c0_i32, %c0_i32_0 : i32, i32
  }
  func.func @transform_2(%arg0: i32) -> (i32, i32) {
    %c0_i32 = arith.constant 0 : i32
    %c0_i32_0 = arith.constant 0 : i32
    %c0_i32_1 = arith.constant 0 : i32
    return %c0_i32, %c0_i32_0 : i32, i32
  }
  func.func @transform_3(%arg0: i32) -> (i32, i32, i32, i32) {
    %c0_i32 = arith.constant 0 : i32
    %c0_i32_0 = arith.constant 0 : i32
    %c0_i32_1 = arith.constant 0 : i32
    %c0_i32_2 = arith.constant 0 : i32
    %c0_i32_3 = arith.constant 0 : i32
    return %c0_i32, %c0_i32_0, %c0_i32_1, %c0_i32_2 : i32, i32, i32, i32
  }
  func.func @transform_4(%arg0: i32) -> (i32, i32) {
    %c0_i32 = arith.constant 0 : i32
    %c0_i32_0 = arith.constant 0 : i32
    %c0_i32_1 = arith.constant 0 : i32
    return %c0_i32, %c0_i32_0 : i32, i32
  }
  func.func @transform_5(%arg0: i32) -> (i32, i32) {
    %c0_i32 = arith.constant 0 : i32
    %c0_i32_0 = arith.constant 0 : i32
    %c0_i32_1 = arith.constant 0 : i32
    return %c0_i32, %c0_i32_0 : i32, i32
  }
  func.func @transform_6(%arg0: i32) -> (i32, i32, i32) {
    %c0_i32 = arith.constant 0 : i32
    %c0_i32_0 = arith.constant 0 : i32
    %c0_i32_1 = arith.constant 0 : i32
    return %arg0, %c0_i32, %c0_i32_0 : i32, i32, i32
  }
}

</mosaic_0001>

<bundles_post_ra>
// kernel: sub.8
= control target key start
LH: loop header
LB: loop body
LE: loop exit
PB: predicated region body
PF: predicated region fallthrough
CT: control target
= control target key end

     0   :  { %s29_s10 = smov 3  ;;  %s10_s11 = smov 3  ;;  %vm12_vm0 = vcmask 31744   ;;  %vm19_vm1 = vcmask 130144   ;;  %vm26_vm2 = vcmask 97344   ;;  %vm33_vm3 = vcmask 64544   ;;  %s67_s0 = inlined_call_operand.vmem [shape: s32[2,4,4], index: 0, kind: input, shape index: {}]   ;;  %s68_s1 = inlined_call_operand.vmem [shape: s32[2,16], index: 1, kind: output, shape index: {}]  }
   0x1   :  { %v41_v0 = vld [vmem:[%s67_s0 + $0x4] sm:$0xf]  ;;  %v8_v1 = vld [vmem:[%s67_s0] sm:$0xf]  ;;  %s15_s0 = smov 3  ;;  %s22_s12 = smov 3 }
   0x2   :  { %7 = vst [vmem:[#allocation1 + $0x8] sm:$0xf] %v41_v0  ;;  %9 = vst [vmem:[#allocation1] sm:$0xf] %v8_v1  ;;  %s45_s13 = smov 12   ;;  %s46_s14 = smov 4  }
   0x3   :  { %s47_s15 = smov 8  }
   0x9   :  { %v16_v2 = vld [vmem:[#allocation1 + $0x3] ss:$8 sm:%s15_s0]   ;;  %v30_v3 = vld [vmem:[#allocation1 + $0x1] ss:$8 sm:%s29_s10]   ;;  %v11_v4 = vld [vmem:[#allocation1] ss:$8 sm:%s10_s11]  }
   0xa   :  { %17 = vrot.lane.b32.xlu0 %v16_v2, %s45_s13  ;;  %31 = vrot.lane.b32.xlu1 %v30_v3, %s46_s14  ;;  %v23_v5 = vld [vmem:[#allocation1 + $0x2] ss:$8 sm:%s22_s12]   ;;  %13 = vst.msk [vmem:[#allocation0] sm:$0x3] %vm12_vm0, %v11_v4  }
   0xe   :  { %24 = vrot.lane.b32.xlu0 %v23_v5, %s47_s15 }
  0x7c   :  { %v18_v6 = vpop.permute.xlu0 %17   ;;  %v32_v7 = vpop.permute.xlu1 %31  }
  0x7d   :  { %20 = vst.msk [vmem:[#allocation0] sm:$0x3] %vm19_vm1, %v18_v6  }
  0x80   :  { %v25_v8 = vpop.permute.xlu0 %24  }
  0x81   :  { %27 = vst.msk [vmem:[#allocation0] sm:$0x3] %vm26_vm2, %v25_v8  }
  0x82   :  { %34 = vst.msk [vmem:[#allocation0] sm:$0x3] %vm33_vm3, %v32_v7  }
  0x89   :  { %v38_v9 = vld [vmem:[#allocation0] sm:$0x3] }
  0x8a   :  { %40 = vst [vmem:[%s68_s1] sm:$0x3] %v38_v9 }

// kernel: window_attention_forward.1
= control target key start
LH: loop header
LB: loop body
LE: loop exit
PB: predicated region body
PF: predicated region fallthrough
CT: control target
= control target key end

     0   :  { %vm51_vm0 = vcmask 261120   ;;  %s11111_s0 = inlined_call_operand.vmem [shape: f32[8,16,32], index: 0, kind: input, shape index: {}]   ;;  %s11112_s1 = inlined_call_operand.vmem [shape: f32[32,96], index: 1, kind: input, shape index: {}]   ;;  %s11113_s2 = inlined_call_operand.vmem [shape: f32[1,96], index: 2, kind: input, shape index: {}]   ;;  %s11114_s3 = inlined_call_operand.vmem [shape: f32[1,4,16,16], index: 3, kind: input, shape index: {}]   ;;  %s11115_s4 = inlined_call_operand.vmem [shape: f32[32,32], index: 4, kind: input, shape index: {}]   ;;  %s11116_s5 = inlined_call_operand.vmem [shape: f32[1,32], index: 5, kind: input, shape index: {}]   ;;  %s11117_s6 = inlined_call_operand.hbm [shape: f32[8,16,32], index: 6, kind: output, shape index: {}]  }
   0x1   :  { %v40_v0 = vld [vmem:[%s11112_s1] sm:$0xff]  ;;  %v41_v1 = vld [vmem:[%s11112_s1 + $0x8] sm:$0xff]  ;;  %v42_v2 = vld [vmem:[%s11112_s1 + $0x10] sm:$0xff] }
   0x2   :  { %v8182_v3 = vpack.c.bf16 %v41_v1, %v40_v0  ;;  %v43_v4 = vld [vmem:[%s11112_s1 + $0x18] sm:$0xff]  ;;  %v24_v5 = vld [vmem:[%s11111_s0] sm:$0xff] }
   0x3   :  { %v8186_v6 = vpack.c.bf16 %v43_v4, %v42_v2  ;;  %7678 = vmatprep.mubr.msk.f32.mxu0 %vm51_vm0, %v24_v5  ;;  %v32_v7 = vld [vmem:[%s11111_s0 + $0x40] sm:$0xff] }
   0x4   :  { %8183 = vmatprep.subr.bf16.mxu0 %v8182_v3  ;;  %8518 = vmatprep.subr.bf16.mxu1 %v8182_v3 }
   0x5   :  { %8185 = vmatpush3.bf16.msra.mxu0 %v8182_v3  ;;  %8520 = vmatpush3.bf16.msra.mxu1 %v8182_v3 }
   0x6   :  { %8187 = vmatprep.subr.bf16.mxu0 %v8186_v6  ;;  %8519 = vmatprep.subr.bf16.mxu1 %v8186_v6 }
   0x7   :  { %7690 = vmatprep.mubr.msk.f32.mxu1 %vm51_vm0, %v32_v7 }
   0x8   :  { %11 = vsyncpa [#allocation3], 0  ;;  %v25_v8 = vld [vmem:[%s11111_s0 + $0x8] sm:$0xff]  ;;  %v26_v10 = vld [vmem:[%s11111_s0 + $0x10] sm:$0xff]  ;;  %vm275_vm1 = vcmask 64512   ;;  %vm998_vm3 = vcmask 130048  }
   0x9   :  { %8189 = vmatpush3.bf16.msra.mxu0 %v8186_v6  ;;  %8521 = vmatpush3.bf16.msra.mxu1 %v8186_v6  ;;  %v33_v9 = vld [vmem:[%s11111_s0 + $0x48] sm:$0xff]  ;;  %v34_v11 = vld [vmem:[%s11111_s0 + $0x50] sm:$0xff]  ;;  %v27_v12 = vld [vmem:[%s11111_s0 + $0x18] sm:$0xff]  ;;  %s9140_s17 = smov 88   ;;  %s9141_s18 = smov 120   ;;  %vm6895_vm4 = vcmask 195584  }
   0xa   :  { %v35_v13 = vld [vmem:[%s11111_s0 + $0x58] sm:$0xff]  ;;  %v28_v14 = vld [vmem:[%s11111_s0 + $0x20] sm:$0xff]  ;;  %v29_v16 = vld [vmem:[%s11111_s0 + $0x28] sm:$0xff]  ;;  %s9142_s19 = smov 56   ;;  %s9143_s24 = smov 80  }
   0xb   :  { %v36_v15 = vld [vmem:[%s11111_s0 + $0x60] sm:$0xff]  ;;  %v37_v17 = vld [vmem:[%s11111_s0 + $0x68] sm:$0xff]  ;;  %v30_v18 = vld [vmem:[%s11111_s0 + $0x30] sm:$0xff]  ;;  %s9144_s25 = smov 112   ;;  %s9145_s26 = smov 48  }
   0xc   :  { %7679 = vmatmul.mubr.msk.f32.vlgmr.msra.gmra.mrb[0].mxu0 %vm51_vm0, %v25_v8  ;;  %7691 = vmatmul.mubr.msk.f32.vlgmr.msra.gmra.mrb[0].mxu1 %vm51_vm0, %v33_v9  ;;  %v38_v19 = vld [vmem:[%s11111_s0 + $0x70] sm:$0xff]  ;;  %v31_v20 = vld [vmem:[%s11111_s0 + $0x38] sm:$0xff]  ;;  %v7148_v22 = vld [vmem:[%s11113_s2] ss:$0 sm:$0xff]  ;;  %s9139_s2 = smov 64   ;;  %s9146_s7 = smov 72  }
   0xd   :  { %7681 = vmatprep.mubr.msk.f32.mxu0 %vm51_vm0, %v26_v10  ;;  %7693 = vmatprep.mubr.msk.f32.mxu1 %vm51_vm0, %v34_v11  ;;  %v39_v21 = vld [vmem:[%s11111_s0 + $0x78] sm:$0xff]  ;;  %s9138_s0 = smov 96   ;;  %vm9360_vm2 = vmpackc.low %vm275_vm1, %vm275_vm1  ;;  %s9147_s8 = smov 104  }
   0xe   :  { %s9148_s1 = smov 40   ;;  %s9151_s20 = smov 24  }
  0x10   :  { %7682 = vmatmul.mubr.msk.f32.gmra.mrb[2].mxu0 %vm51_vm0, %v27_v12  ;;  %7694 = vmatmul.mubr.msk.f32.gmra.mrb[2].mxu1 %vm51_vm0, %v35_v13 }
  0x11   :  { %7684 = vmatprep.mubr.msk.f32.mxu0 %vm51_vm0, %v28_v14  ;;  %7696 = vmatprep.mubr.msk.f32.mxu1 %vm51_vm0, %v36_v15 }
  0x14   :  { %7685 = vmatmul.mubr.msk.f32.gmra.mrb[4].mxu0 %vm51_vm0, %v29_v16  ;;  %7697 = vmatmul.mubr.msk.f32.gmra.mrb[4].mxu1 %vm51_vm0, %v37_v17 }
  0x15   :  { %7687 = vmatprep.mubr.msk.f32.mxu0 %vm51_vm0, %v30_v18  ;;  %7699 = vmatprep.mubr.msk.f32.mxu1 %vm51_vm0, %v38_v19 }
  0x18   :  { %7688 = vmatmul.mubr.msk.f32.gmra.mrb[6].mxu0 %vm51_vm0, %v31_v20  ;;  %7700 = vmatmul.mubr.msk.f32.gmra.mrb[6].mxu1 %vm51_vm0, %v39_v21 }
  0xdf   :  { %v7680_v23 = vpop.f32.mrb[0].mxu0  ;;  %v7692_v24 = vpop.f32.mrb[0].mxu1 }
  0xe0   :  { %v9268_v25 = vadd.f32 %v7680_v23, %v7148_v22  ;;  %v166_v26 = vpop.f32.mrb[1].mxu0  ;;  %v9270_v27 = vadd.f32 %v7692_v24, %v7148_v22  ;;  %v206_v28 = vpop.f32.mrb[1].mxu1 }
  0xe1   :  { %v167_v29 = vadd.f32 %v7148_v22, %v166_v26  ;;  %v207_v30 = vadd.f32 %v7148_v22, %v206_v28 }
  0xe2   :  { %v9371_v18 = vmul.f32 0.35355338, %v9268_v25 }
  0xe3   :  { %v7683_v31 = vpop.f32.mrb[2].mxu0  ;;  %v9273_v32 = vpack.i.bf16 %v9268_v25, %v167_v29  ;;  %v9275_v33 = vmul.f32 0.35355338, %v167_v29  ;;  %v7695_v34 = vpop.f32.mrb[2].mxu1  ;;  %v9277_v35 = vmul.f32 0.35355338, %v207_v30  ;;  %v9280_v36 = vpack.i.bf16 %v9270_v27, %v207_v30 }
  0xe4   :  { %v9282_v37 = vadd.f32 %v7683_v31, %v7148_v22  ;;  %v176_v38 = vpop.f32.mrb[3].mxu0  ;;  %v9284_v39 = vadd.f32 %v7695_v34, %v7148_v22  ;;  %v216_v40 = vpop.f32.mrb[3].mxu1  ;;  %v9394_v34 = vmul.f32 0.35355338, %v9270_v27 }
  0xe5   :  { %v9286_v41 = vadd.f32 %v7148_v22, %v176_v38  ;;  %8539 = vrot.lane.b32.xlu0 %v9273_v32, %s9138_s0  ;;  %7706 = vmatprep.mubr.msk.f32.mxu1 %vm275_vm1, %v9275_v33  ;;  %v9292_v42 = vadd.f32 %v7148_v22, %v216_v40 }
  0xe6   :  { %7734 = vmatprep.mubr.msk.f32.mxu0 %vm275_vm1, %v9277_v35  ;;  %v9391_v31 = vmul.f32 0.35355338, %v9282_v37 }
  0xe7   :  { %v7686_v43 = vpop.f32.mrb[4].mxu0  ;;  %v9298_v44 = vpack.i.bf16 %v9282_v37, %v9286_v41  ;;  %v7698_v45 = vpop.f32.mrb[4].mxu1  ;;  %v9302_v46 = vpack.i.bf16 %v9284_v39, %v9292_v42  ;;  %v9374_v20 = vmul.f32 0.35355338, %v9286_v41 }
  0xe8   :  { %v9304_v47 = vadd.f32 %v7686_v43, %v7148_v22  ;;  %v186_v48 = vpop.f32.mrb[5].mxu0  ;;  %v9306_v49 = vadd.f32 %v7698_v45, %v7148_v22  ;;  %v226_v50 = vpop.f32.mrb[5].mxu1 }
  0xe9   :  { %v9308_v51 = vadd.f32 %v7148_v22, %v186_v48  ;;  %8544 = vrot.lane.b32.xlu0 %v9298_v44, %s9138_s0  ;;  %v9312_v52 = vadd.f32 %v7148_v22, %v226_v50 }
  0xeb   :  { %v7689_v53 = vpop.f32.mrb[6].mxu0  ;;  %v9316_v54 = vpack.i.bf16 %v9304_v47, %v9308_v51  ;;  %v9320_v55 = vpack.i.bf16 %v9306_v49, %v9312_v52  ;;  %v7701_v56 = vpop.f32.mrb[6].mxu1  ;;  %v9399_v40 = vmul.f32 0.35355338, %v9308_v51  ;;  %v9406_v37 = vmul.f32 0.35355338, %v9312_v52 }
  0xec   :  { %v9322_v57 = vadd.f32 %v7689_v53, %v7148_v22  ;;  %v196_v58 = vpop.f32.mrb[7].mxu0  ;;  %v9324_v59 = vadd.f32 %v7701_v56, %v7148_v22  ;;  %v236_v60 = vpop.f32.mrb[7].mxu1  ;;  %v9417_v52 = vmul.f32 0.35355338, %v9304_v47  ;;  %v9420_v56 = vmul.f32 0.35355338, %v9306_v49 }
  0xed   :  { %v9326_v61 = vadd.f32 %v7148_v22, %v196_v58  ;;  %8549 = vrot.lane.b32.xlu1 %v9316_v54, %s9138_s0  ;;  %8559 = vrot.lane.b32.xlu0 %v9280_v36, %s9138_s0  ;;  %v9332_v62 = vadd.f32 %v7148_v22, %v236_v60 }
  0xef   :  { %v9336_v63 = vpack.i.bf16 %v9322_v57, %v9326_v61  ;;  %v9340_v0 = vpack.i.bf16 %v9324_v59, %v9332_v62  ;;  %v9427_v60 = vmul.f32 0.35355338, %v9326_v61 }
  0xf1   :  { %8554 = vrot.lane.b32.xlu1 %v9336_v63, %s9138_s0  ;;  %8569 = vrot.lane.b32.xlu0 %v9320_v55, %s9138_s0 }
  0xf5   :  { %8564 = vrot.lane.b32.xlu1 %v9302_v46, %s9138_s0  ;;  %8579 = vrot.lane.b32.xlu0 %v9273_v32, %s9139_s2 }
  0xf9   :  { %8574 = vrot.lane.b32.xlu1 %v9340_v0, %s9138_s0  ;;  %8589 = vrot.lane.b32.xlu0 %v9316_v54, %s9139_s2  ;;  %s9150_s0 = smov 16  }
  0xfd   :  { %8584 = vrot.lane.b32.xlu1 %v9298_v44, %s9139_s2  ;;  %8594 = vrot.lane.b32.xlu0 %v9280_v36, %s9139_s2 }
 0x101   :  { %8599 = vrot.lane.b32.xlu1 %v9302_v46, %s9139_s2  ;;  %8604 = vrot.lane.b32.xlu0 %v9320_v55, %s9139_s2 }
 0x105   :  { %8609 = vrot.lane.b32.xlu1 %v9336_v63, %s9139_s2 }
 0x109   :  { %8614 = vrot.lane.b32.xlu1 %v9340_v0, %s9139_s2 }
 0x157   :  { %v8540_v1 = vpop.permute.xlu0 %8539 }
 0x158   :  { %v8542_v2 = vunpack.i.h.bf16 %v8540_v1  ;;  %v8541_v3 = vunpack.i.l.bf16 %v8540_v1 }
 0x15a   :  { %v8190_v5 = vpack.c.bf16 %v8542_v2, %v8541_v3  ;;  %v9439_v3 = vmul.f32 0.35355338, %v9322_v57 }
 0x15b   :  { %v8545_v6 = vpop.permute.xlu0 %8544 }
 0x15c   :  { %v8547_v7 = vunpack.i.h.bf16 %v8545_v6  ;;  %v8546_v8 = vunpack.i.l.bf16 %v8545_v6  ;;  %8192 = vmatprep.subr.msk.bf16.mxu1 %vm9360_vm2, %v8190_v5 }
 0x15d   :  { %8195 = vmatpush3.bf16.xpose.msk.msra.mxu1 %vm9360_vm2, %v8190_v5  ;;  %v9442_v5 = vmul.f32 0.35355338, %v9292_v42  ;;  %v9458_v42 = vmul.f32 0.35355338, %v9332_v62  ;;  %v246_v62 = vld [vmem:[%s11114_s3 + $0x8] sm:$0xff] }
 0x15e   :  { %v8196_v9 = vpack.c.bf16 %v8547_v7, %v8546_v8  ;;  %v9455_v8 = vmul.f32 0.35355338, %v9284_v39  ;;  %v9467_v39 = vmul.f32 0.35355338, %v9324_v59 }
 0x15f   :  { %v8550_v10 = vpop.permute.xlu1 %8549  ;;  %v8560_v11 = vpop.permute.xlu0 %8559 }
 0x160   :  { %v8552_v12 = vunpack.i.h.bf16 %v8550_v10  ;;  %v8551_v13 = vunpack.i.l.bf16 %v8550_v10  ;;  %v8562_v14 = vunpack.i.h.bf16 %v8560_v11  ;;  %v8561_v15 = vunpack.i.l.bf16 %v8560_v11  ;;  %8198 = vmatprep.subr.msk.bf16.mxu1 %vm9360_vm2, %v8196_v9 }
 0x162   :  { %v8202_v16 = vpack.c.bf16 %v8552_v12, %v8551_v13  ;;  %v8214_v17 = vpack.c.bf16 %v8562_v14, %v8561_v15 }
 0x163   :  { %v8570_v19 = vpop.permute.xlu0 %8569  ;;  %v8555_v24 = vpop.permute.xlu1 %8554 }
 0x164   :  { %v8572_v21 = vunpack.i.h.bf16 %v8570_v19  ;;  %v8571_v22 = vunpack.i.l.bf16 %v8570_v19  ;;  %7707 = vmatmul.mubr.msk.f32.vlgmr.msra.gmra.mrb[8].mxu1 %vm275_vm1, %v9371_v18  ;;  %8216 = vmatprep.subr.msk.bf16.mxu0 %vm9360_vm2, %v8214_v17  ;;  %v8557_v26 = vunpack.i.h.bf16 %v8555_v24  ;;  %v8556_v28 = vunpack.i.l.bf16 %v8555_v24  ;;  %v245_v19 = vld [vmem:[%s11114_s3] sm:$0xff] }
 0x165   :  { %8201 = vmatpush3.bf16.xpose.msk.msra.mxu1 %vm9360_vm2, %v8196_v9  ;;  %7713 = vmatprep.mubr.msk.f32.mxu1 %vm275_vm1, %v9374_v20 }
 0x166   :  { %v8226_v23 = vpack.c.bf16 %v8572_v21, %v8571_v22  ;;  %8219 = vmatpush3.bf16.xpose.msk.msra.mxu0 %vm9360_vm2, %v8214_v17  ;;  %8204 = vmatprep.subr.msk.bf16.mxu1 %vm9360_vm2, %v8202_v16  ;;  %v8208_v38 = vpack.c.bf16 %v8557_v26, %v8556_v28 }
 0x167   :  { %v8580_v25 = vpop.permute.xlu0 %8579  ;;  %v8565_v41 = vpop.permute.xlu1 %8564 }
 0x168   :  { %8228 = vmatprep.subr.msk.bf16.mxu0 %vm9360_vm2, %v8226_v23  ;;  %v8582_v29 = vunpack.i.h.bf16 %v8580_v25  ;;  %v8581_v30 = vunpack.i.l.bf16 %v8580_v25  ;;  %v8567_v50 = vunpack.i.h.bf16 %v8565_v41  ;;  %v8566_v51 = vunpack.i.l.bf16 %v8565_v41 }
 0x16a   :  { %v8238_v43 = vpack.c.bf16 %v8582_v29, %v8581_v30  ;;  %v8220_v1 = vpack.c.bf16 %v8567_v50, %v8566_v51 }
 0x16b   :  { %v8590_v27 = vpop.permute.xlu0 %8589  ;;  %v8575_v53 = vpop.permute.xlu1 %8574 }
 0x16c   :  { %7714 = vmatmul.mubr.msk.f32.vlgmr.msra.gmra.mrb[10].mxu1 %vm275_vm1, %v9391_v31  ;;  %v8592_v45 = vunpack.i.h.bf16 %v8590_v27  ;;  %v8591_v48 = vunpack.i.l.bf16 %v8590_v27  ;;  %v8577_v47 = vunpack.i.h.bf16 %v8575_v53  ;;  %v8576_v2 = vunpack.i.l.bf16 %v8575_v53 }
 0x16d   :  { %7735 = vmatmul.mubr.msk.f32.vlgmr.msra.gmra.mrb[8].mxu0 %vm275_vm1, %v9394_v34  ;;  %8207 = vmatpush3.bf16.xpose.msk.msra.mxu1 %vm9360_vm2, %v8202_v16 }
 0x16e   :  { %7720 = vmatprep.mubr.msk.f32.mxu1 %vm275_vm1, %v9399_v40  ;;  %8231 = vmatpush3.bf16.xpose.msk.msra.mxu0 %vm9360_vm2, %v8226_v23  ;;  %v9422_v58 = vpack.c.bf16 %v8592_v45, %v8591_v48  ;;  %v8232_v61 = vpack.c.bf16 %v8577_v47, %v8576_v2 }
 0x16f   :  { %7748 = vmatprep.mubr.msk.f32.mxu0 %vm275_vm1, %v9406_v37  ;;  %8239 = vmatprep.subr.bf16.mxu0 %v8238_v43  ;;  %v8585_v49 = vpop.permute.xlu1 %8584 }
 0x170   :  { %8210 = vmatprep.subr.msk.bf16.mxu1 %vm9360_vm2, %v8208_v38  ;;  %v8587_v7 = vunpack.i.h.bf16 %v8585_v49  ;;  %v8586_v57 = vunpack.i.l.bf16 %v8585_v49 }
 0x172   :  { %v8242_v10 = vpack.c.bf16 %v8587_v7, %v8586_v57 }
 0x173   :  { %v9452_v6 = vpop.permute.xlu1 %8599 }
 0x174   :  { %7721 = vmatmul.mubr.msk.f32.vlgmr.msra.gmra.mrb[12].mxu1 %vm275_vm1, %v9417_v52 }
 0x175   :  { %7749 = vmatmul.mubr.msk.f32.vlgmr.msra.gmra.mrb[10].mxu0 %vm275_vm1, %v9420_v56  ;;  %8213 = vmatpush3.bf16.xpose.msk.msra.mxu1 %vm9360_vm2, %v8208_v38 }
 0x176   :  { %7727 = vmatprep.mubr.msk.f32.mxu1 %vm275_vm1, %v9427_v60  ;;  %8241 = vmatpush3.bf16.msra.mxu0 %v8238_v43 }
 0x177   :  { %8222 = vmatprep.subr.msk.bf16.mxu1 %vm9360_vm2, %v8220_v1  ;;  %8247 = vmatprep.subr.bf16.mxu0 %v9422_v58  ;;  %v8610_v9 = vpop.permute.xlu1 %8609 }
 0x178   :  { %v8612_v11 = vunpack.i.h.bf16 %v8610_v9  ;;  %v8611_v12 = vunpack.i.l.bf16 %v8610_v9 }
 0x17a   :  { %v9469_v13 = vpack.c.bf16 %v8612_v11, %v8611_v12 }
 0x17c   :  { %7728 = vmatmul.mubr.msk.f32.vlgmr.msra.gmra.mrb[14].mxu1 %vm275_vm1, %v9439_v3 }
 0x17d   :  { %8225 = vmatpush3.bf16.xpose.msk.msra.mxu1 %vm9360_vm2, %v8220_v1  ;;  %7741 = vmatprep.mubr.msk.f32.mxu1 %vm275_vm1, %v9442_v5 }
 0x17e   :  { %8234 = vmatprep.subr.msk.bf16.mxu1 %vm9360_vm2, %v8232_v61 }
 0x184   :  { %7742 = vmatmul.mubr.msk.f32.vlgmr.msra.gmra.mrb[16].mxu1 %vm275_vm1, %v9455_v8 }
 0x185   :  { %8237 = vmatpush3.bf16.xpose.msk.msra.mxu1 %vm9360_vm2, %v8232_v61  ;;  %7755 = vmatprep.mubr.msk.f32.mxu1 %vm275_vm1, %v9458_v42 }
 0x186   :  { %8243 = vmatprep.subr.bf16.mxu1 %v8242_v10 }
 0x18c   :  { %7756 = vmatmul.mubr.msk.f32.vlgmr.msra.gmra.mrb[18].mxu1 %vm275_vm1, %v9467_v39 }
 0x18d   :  { %8245 = vmatpush3.bf16.msra.mxu1 %v8242_v10 }
 0x18e   :  { %8251 = vmatprep.subr.bf16.mxu1 %v9469_v13 }
 0x237   :  { %v7708_v14 = vpop.f32.mrb[8].mxu1 }
 0x238   :  { %v9477_v15 = vadd.f32 %v7708_v14, %v246_v62  ;;  %v352_v16 = vpop.f32.mrb[9].mxu1 }
 0x239   :  { %v9490_v28 = vadd.f32 %v352_v16, %v245_v19 }
 0x23a   :  { %v1002_v59 = vsel %vm998_vm3, %v9477_v15, -inf }
 0x23b   :  { %1003 = vmax.xlane.f32.xlu1 %v1002_v59  ;;  %v999_v41 = vsel %vm998_vm3, %v9490_v28, -inf }
 0x23f   :  { %v7715_v17 = vpop.f32.mrb[10].mxu1 }
 0x240   :  { %v9484_v21 = vadd.f32 %v7715_v17, %v246_v62  ;;  %v7736_v22 = vpop.f32.mrb[8].mxu0  ;;  %v443_v23 = vpop.f32.mrb[11].mxu1 }
 0x241   :  { %v9486_v24 = vadd.f32 %v7736_v22, %v246_v62  ;;  %v716_v25 = vpop.f32.mrb[9].mxu0  ;;  %v9506_v1 = vadd.f32 %v443_v23, %v245_v19 }
 0x242   :  { %v1008_v26 = vsel %vm998_vm3, %v9484_v21, -inf  ;;  %v9494_v30 = vadd.f32 %v716_v25, %v245_v19 }
 0x243   :  { %v1026_v29 = vsel %vm998_vm3, %v9486_v24, -inf  ;;  %1009 = vmax.xlane.f32.xlu1 %v1008_v26  ;;  %v1005_v10 = vsel %vm998_vm3, %v9506_v1, -inf }
 0x244   :  { %1027 = vmax.xlane.f32.xlu0 %v1026_v29  ;;  %v1023_v51 = vsel %vm998_vm3, %v9494_v30, -inf }
 0x247   :  { %v7722_v38 = vpop.f32.mrb[12].mxu1 }
 0x248   :  { %v7750_v43 = vpop.f32.mrb[10].mxu0  ;;  %1000 = vmax.xlane.f32.xlu0 %v999_v41  ;;  %v534_v27 = vpop.f32.mrb[13].mxu1  ;;  %v9516_v9 = vadd.f32 %v7722_v38, %v246_v62 }
 0x249   :  { %v898_v45 = vpop.f32.mrb[11].mxu0  ;;  %v9500_v50 = vadd.f32 %v7750_v43, %v246_v62  ;;  %v9522_v12 = vadd.f32 %v534_v27, %v245_v19 }
 0x24a   :  { %v9498_v48 = vadd.f32 %v898_v45, %v245_v19  ;;  %v1014_v16 = vsel %vm998_vm3, %v9516_v9, -inf }
 0x24b   :  { %v1038_v2 = vsel %vm998_vm3, %v9500_v50, -inf  ;;  %v1011_v23 = vsel %vm998_vm3, %v9522_v12, -inf }
 0x24c   :  { %1024 = vmax.xlane.f32.xlu0 %v1023_v51  ;;  %v1035_v53 = vsel %vm998_vm3, %v9498_v48, -inf  ;;  %v9550_v51 = vpop.permute.xlu0 %8594 }
 0x24d   :  { %1036 = vmax.xlane.f32.xlu1 %v1035_v53 }
 0x24f   :  { %v7729_v47 = vpop.f32.mrb[14].mxu1 }
 0x250   :  { %v9510_v49 = vadd.f32 %v7729_v47, %v246_v62  ;;  %1039 = vmax.xlane.f32.xlu0 %v1038_v2  ;;  %v625_v61 = vpop.f32.mrb[15].mxu1  ;;  %v9553_v2 = vpop.permute.xlu0 %8604 }
 0x251   :  { %v9512_v7 = vadd.f32 %v625_v61, %v245_v19 }
 0x252   :  { %v1020_v57 = vsel %vm998_vm3, %v9510_v49, -inf }
 0x253   :  { %1021 = vmax.xlane.f32.xlu1 %v1020_v57  ;;  %v1017_v11 = vsel %vm998_vm3, %v9512_v7, -inf }
 0x254   :  { %1006 = vmax.xlane.f32.xlu0 %v1005_v10 }
 0x257   :  { %v7743_v14 = vpop.f32.mrb[16].mxu1  ;;  %1018 = vmax.xlane.f32.xlu1 %v1017_v11 }
 0x258   :  { %1015 = vmax.xlane.f32.xlu0 %v1014_v16  ;;  %v807_v59 = vpop.f32.mrb[17].mxu1  ;;  %v9528_v22 = vadd.f32 %v7743_v14, %v246_v62 }
 0x259   :  { %v9526_v17 = vadd.f32 %v807_v59, %v245_v19 }
 0x25a   :  { %v1032_v29 = vsel %vm998_vm3, %v9528_v22, -inf }
 0x25b   :  { %v1029_v25 = vsel %vm998_vm3, %v9526_v17, -inf }
 0x25c   :  { %1012 = vmax.xlane.f32.xlu0 %v1011_v23  ;;  %1030 = vmax.xlane.f32.xlu1 %v1029_v25 }
 0x25f   :  { %v7757_v26 = vpop.f32.mrb[18].mxu1 }
 0x260   :  { %v9536_v38 = vadd.f32 %v7757_v26, %v246_v62  ;;  %1033 = vmax.xlane.f32.xlu0 %v1032_v29  ;;  %v989_v41 = vpop.f32.mrb[19].mxu1  ;;  %v9548_v62 = vpop.permute.xlu1 %8614 }
 0x261   :  { %v9538_v43 = vadd.f32 %v989_v41, %v245_v19 }
 0x262   :  { %v1044_v27 = vsel %vm998_vm3, %v9536_v38, -inf }
 0x263   :  { %v1041_v45 = vsel %vm998_vm3, %v9538_v43, -inf }
 0x264   :  { %1045 = vmax.xlane.f32.xlu0 %v1044_v27 }
 0x26d   :  { %8624 = vrot.lane.b32.xlu1 %v9298_v44, %s9140_s17 }
 0x27a   :  { %8619 = vrot.lane.b32.xlu0 %v9273_v32, %s9140_s17 }
 0x291   :  { %1042 = vmax.xlane.f32.xlu1 %v1041_v45 }
 0x2c8   :  { %v1004_v19 = vpop.xlane.xlu1 %1003 }
 0x2c9   :  { %v1048_v53 = vsub.f32 %v9477_v15, %v1004_v19 }
 0x2cb   :  { %v1065_v47 = vmul.f32 1.442695, %v1048_v53 }
 0x2cd   :  { %8858 = vpow2.f32 %v1065_v47 }
 0x2d0   :  { %v1010_v57 = vpop.xlane.xlu1 %1009 }
 0x2d1   :  { %v1028_v61 = vpop.xlane.xlu0 %1027  ;;  %v1050_v14 = vsub.f32 %v9484_v21, %v1010_v57 }
 0x2d2   :  { %v1056_v10 = vsub.f32 %v9486_v24, %v1028_v61 }
 0x2d3   :  { %v1069_v25 = vmul.f32 1.442695, %v1050_v14 }
 0x2d4   :  { %v1081_v11 = vmul.f32 1.442695, %v1056_v10 }
 0x2d5   :  { %v1001_v16 = vpop.xlane.xlu0 %1000 }
 0x2d6   :  { %8860 = vpow2.f32 %v1081_v11  ;;  %v1047_v59 = vsub.f32 %v9490_v28, %v1001_v16 }
 0x2d7   :  { %v9558_v23 = vpop.eup %8858 }
 0x2d8   :  { %v1063_v26 = vmul.f32 1.442695, %v1047_v59  ;;  %v1098_v15 = vsel %vm998_vm3, %v9558_v23, 0.0 }
 0x2d9   :  { %v1025_v29 = vpop.xlane.xlu0 %1024  ;;  %1099 = vadd.xlane.f32.xlu0 %v1098_v15 }
 0x2da   :  { %8862 = vpow2.f32 %v1063_v26  ;;  %v1055_v41 = vsub.f32 %v9494_v30, %v1025_v29  ;;  %v1037_v27 = vpop.xlane.xlu1 %1036 }
 0x2db   :  { %8864 = vpow2.f32 %v1069_v25  ;;  %v1059_v19 = vsub.f32 %v9498_v48, %v1037_v27 }
 0x2dc   :  { %v1079_v24 = vmul.f32 1.442695, %v1055_v41 }
 0x2dd   :  { %v1040_v21 = vpop.xlane.xlu0 %1039  ;;  %v1087_v10 = vmul.f32 1.442695, %v1059_v19 }
 0x2de   :  { %8866 = vpow2.f32 %v1079_v24  ;;  %v1060_v45 = vsub.f32 %v9500_v50, %v1040_v21 }
 0x2e0   :  { %v9564_v28 = vpop.eup %8860  ;;  %v1089_v53 = vmul.f32 1.442695, %v1060_v45 }
 0x2e1   :  { %v1007_v47 = vpop.xlane.xlu0 %1006  ;;  %v1122_v61 = vsel %vm998_vm3, %v9564_v28, 0.0 }
 0x2e2   :  { %8868 = vpow2.f32 %v1089_v53  ;;  %v1049_v57 = vsub.f32 %v9506_v1, %v1007_v47  ;;  %1123 = vadd.xlane.f32.xlu0 %v1122_v61 }
 0x2e4   :  { %v9570_v30 = vpop.eup %8862  ;;  %v1067_v11 = vmul.f32 1.442695, %v1049_v57  ;;  %v1022_v57 = vpop.xlane.xlu1 %1021 }
 0x2e5   :  { %v1016_v14 = vpop.xlane.xlu0 %1015  ;;  %v1095_v50 = vsel %vm998_vm3, %v9570_v30, 0.0  ;;  %v9574_v16 = vpop.eup %8864 }
 0x2e6   :  { %8870 = vpow2.f32 %v1067_v11  ;;  %v1052_v48 = vsub.f32 %v9516_v9, %v1016_v14  ;;  %1096 = vadd.xlane.f32.xlu1 %v1095_v50  ;;  %v1104_v26 = vsel %vm998_vm3, %v9574_v16, 0.0 }
 0x2e7   :  { %8872 = vpow2.f32 %v1087_v10  ;;  %v1054_v10 = vsub.f32 %v9510_v49, %v1022_v57 }
 0x2e8   :  { %v9577_v59 = vpop.eup %8866  ;;  %v1073_v25 = vmul.f32 1.442695, %v1052_v48  ;;  %v1019_v11 = vpop.xlane.xlu1 %1018 }
 0x2e9   :  { %v1013_v1 = vpop.xlane.xlu0 %1012  ;;  %v1119_v15 = vsel %vm998_vm3, %v9577_v59, 0.0  ;;  %v1053_v50 = vsub.f32 %v9512_v7, %v1019_v11  ;;  %v1077_v48 = vmul.f32 1.442695, %v1054_v10 }
 0x2ea   :  { %8874 = vpow2.f32 %v1073_v25  ;;  %v1051_v29 = vsub.f32 %v9522_v12, %v1013_v1  ;;  %1105 = vadd.xlane.f32.xlu1 %v1104_v26  ;;  %1120 = vadd.xlane.f32.xlu0 %v1119_v15 }
 0x2eb   :  { %v1075_v1 = vmul.f32 1.442695, %v1053_v50 }
 0x2ec   :  { %v9584_v41 = vpop.eup %8868  ;;  %v1071_v9 = vmul.f32 1.442695, %v1051_v29 }
 0x2ed   :  { %v1134_v24 = vsel %vm998_vm3, %v9584_v41, 0.0  ;;  %v1034_v14 = vpop.xlane.xlu0 %1033 }
 0x2ee   :  { %8876 = vpow2.f32 %v1071_v9  ;;  %1135 = vadd.xlane.f32.xlu0 %v1134_v24  ;;  %v1058_v25 = vsub.f32 %v9528_v22, %v1034_v14  ;;  %v1031_v24 = vpop.xlane.xlu1 %1030 }
 0x2ef   :  { %8878 = vpow2.f32 %v1077_v48 }
 0x2f0   :  { %v9588_v27 = vpop.eup %8870  ;;  %v1085_v26 = vmul.f32 1.442695, %v1058_v25  ;;  %8880 = vpow2.f32 %v1075_v1 }
 0x2f1   :  { %v1101_v21 = vsel %vm998_vm3, %v9588_v27, 0.0  ;;  %v9592_v45 = vpop.eup %8872 }
 0x2f2   :  { %1102 = vadd.xlane.f32.xlu1 %v1101_v21  ;;  %v1131_v12 = vsel %vm998_vm3, %v9592_v45, 0.0  ;;  %8882 = vpow2.f32 %v1085_v26  ;;  %v1057_v21 = vsub.f32 %v9526_v17, %v1031_v24 }
 0x2f4   :  { %v9594_v19 = vpop.eup %8874 }
 0x2f5   :  { %v1110_v53 = vsel %vm998_vm3, %v9594_v19, 0.0 }
 0x2f6   :  { %1132 = vadd.xlane.f32.xlu1 %v1131_v12  ;;  %1111 = vadd.xlane.f32.xlu0 %v1110_v53  ;;  %v9640_v12 = vpop.permute.xlu1 %8624  ;;  %v1046_v53 = vpop.xlane.xlu0 %1045 }
 0x2f7   :  { %v1062_v57 = vsub.f32 %v9536_v38, %v1046_v53 }
 0x2f8   :  { %v9600_v47 = vpop.eup %8876 }
 0x2f9   :  { %v1107_v61 = vsel %vm998_vm3, %v9600_v47, 0.0  ;;  %v9611_v15 = vpop.eup %8878  ;;  %v1093_v11 = vmul.f32 1.442695, %v1062_v57  ;;  %v8597_v57 = vunpack.i.h.bf16 %v9550_v51 }
 0x2fa   :  { %1108 = vadd.xlane.f32.xlu0 %v1107_v61  ;;  %v9613_v29 = vpop.eup %8880  ;;  %v1116_v9 = vsel %vm998_vm3, %v9611_v15, 0.0  ;;  %v1083_v61 = vmul.f32 1.442695, %v1057_v21 }
 0x2fb   :  { %v1113_v7 = vsel %vm998_vm3, %v9613_v29, 0.0 }
 0x2fc   :  { %v9617_v49 = vpop.eup %8882  ;;  %8884 = vpow2.f32 %v1083_v61 }
 0x2fd   :  { %v1128_v22 = vsel %vm998_vm3, %v9617_v49, 0.0  ;;  %8886 = vpow2.f32 %v1093_v11 }
 0x306   :  { %v9652_v50 = vpop.eup %8884 }
 0x307   :  { %1871 = vrot.lane.b32.xlu1 %v9275_v33, %s9141_s18  ;;  %v1125_v38 = vsel %vm998_vm3, %v9652_v50, 0.0  ;;  %v9658_v48 = vpop.eup %8886 }
 0x308   :  { %v1140_v25 = vsel %vm998_vm3, %v9658_v48, 0.0 }
 0x310   :  { %8629 = vrot.lane.b32.xlu0 %v9316_v54, %s9140_s17 }
 0x31e   :  { %v1043_v10 = vpop.xlane.xlu1 %1042 }
 0x31f   :  { %v1061_v14 = vsub.f32 %v9538_v43, %v1043_v10  ;;  %v9660_v43 = vpop.permute.xlu0 %8619  ;;  %v8596_v10 = vunpack.i.l.bf16 %v9550_v51 }
 0x321   :  { %v1091_v17 = vmul.f32 1.442695, %v1061_v14 }
 0x323   :  { %8888 = vpow2.f32 %v1091_v17 }
 0x32b   :  { %1117 = vadd.xlane.f32.xlu1 %v1116_v9 }
 0x32d   :  { %v9666_v1 = vpop.eup %8888 }
 0x32f   :  { %1114 = vadd.xlane.f32.xlu1 %v1113_v7  ;;  %1129 = vadd.xlane.f32.xlu0 %v1128_v22  ;;  %v1137_v7 = vsel %vm998_vm3, %v9666_v1, 0.0 }
 0x340   :  { %8634 = vrot.lane.b32.xlu1 %v9336_v63, %s9140_s17 }
 0x344   :  { %1964 = vrot.lane.b32.xlu1 %v9391_v31, %s9141_s18 }
 0x345   :  { %1873 = vrot.lane.b32.xlu0 %v9371_v18, %s9141_s18 }
 0x348   :  { %2053 = vrot.lane.b32.xlu1 %v9399_v40, %s9141_s18 }
 0x349   :  { %1962 = vrot.lane.b32.xlu0 %v9374_v20, %s9141_s18 }
 0x34d   :  { %8639 = vrot.lane.b32.xlu0 %v9280_v36, %s9140_s17 }
 0x351   :  { %2055 = vrot.lane.b32.xlu0 %v9417_v52, %s9141_s18 }
 0x355   :  { %2144 = vrot.lane.b32.xlu0 %v9427_v60, %s9141_s18 }
 0x359   :  { %2235 = vrot.lane.b32.xlu0 %v9277_v35, %s9141_s18 }
 0x35d   :  { %2237 = vrot.lane.b32.xlu0 %v9394_v34, %s9141_s18 }
 0x361   :  { %8654 = vrot.lane.b32.xlu0 %v9340_v0, %s9140_s17 }
 0x365   :  { %2417 = vrot.lane.b32.xlu0 %v9406_v37, %s9141_s18 }
 0x366   :  { %v1100_v26 = vpop.xlane.xlu0 %1099 }
 0x367   :  { %8890 = vrcp.f32 %v1100_v26 }
 0x369   :  { %2508 = vrot.lane.b32.xlu0 %v9458_v42, %s9141_s18 }
 0x36c   :  { %1126 = vadd.xlane.f32.xlu1 %v1125_v38 }
 0x36d   :  { %8659 = vrot.lane.b32.xlu0 %v9273_v32, %s9142_s19 }
 0x36f   :  { %v1124_v22 = vpop.xlane.xlu0 %1123 }
 0x370   :  { %1141 = vadd.xlane.f32.xlu1 %v1140_v25  ;;  %v8254_v25 = vpack.c.bf16 %v8597_v57, %v8596_v10 }
 0x371   :  { %8669 = vrot.lane.b32.xlu0 %v9316_v54, %s9142_s19  ;;  %v8891_v53 = vpop.eup %8890 }
 0x372   :  { %v1146_v38 = vmul.f32 %v8891_v53, %v9558_v23 }
 0x373   :  { %v1097_v9 = vpop.xlane.xlu1 %1096 }
 0x374   :  { %8892 = vrcp.f32 %v1097_v9  ;;  %1138 = vadd.xlane.f32.xlu1 %v1137_v7  ;;  %v8602_v7 = vunpack.i.h.bf16 %v9452_v6 }
 0x375   :  { %8679 = vrot.lane.b32.xlu0 %v9280_v36, %s9142_s19 }
 0x377   :  { %v1121_v24 = vpop.xlane.xlu0 %1120  ;;  %v1106_v21 = vpop.xlane.xlu1 %1105 }
 0x378   :  { %8894 = vrcp.f32 %v1106_v21  ;;  %v8601_v21 = vunpack.i.l.bf16 %v9452_v6 }
 0x37b   :  { %v1136_v11 = vpop.xlane.xlu0 %1135 }
 0x37e   :  { %v8893_v61 = vpop.eup %8892 }
 0x37f   :  { %v1103_v14 = vpop.xlane.xlu1 %1102  ;;  %v1144_v17 = vmul.f32 %v8893_v61, %v9570_v30 }
 0x380   :  { %8896 = vrcp.f32 %v1103_v14 }
 0x381   :  { %7762 = vmatprep.mubr.msk.f32.mxu0 %vm998_vm3, %v1144_v17  ;;  %8898 = vrcp.f32 %v1121_v24  ;;  %v9693_v24 = vpack.c.bf16 %v8602_v7, %v8601_v21  ;;  %v8622_v17 = vunpack.i.h.bf16 %v9660_v43 }
 0x382   :  { %7763 = vmatmul.mubr.msk.f32.vlgmr.msra.gmra.mrb[12].mxu0 %vm998_vm3, %v1146_v38  ;;  %v8895_v30 = vpop.eup %8894  ;;  %v8621_v38 = vunpack.i.l.bf16 %v9660_v43 }
 0x383   :  { %8249 = vmatpush3.bf16.msra.mxu0 %v9422_v58  ;;  %v1112_v26 = vpop.xlane.xlu0 %1111  ;;  %v1133_v9 = vpop.xlane.xlu1 %1132  ;;  %v1150_v53 = vmul.f32 %v8895_v30, %v9574_v16 }
 0x384   :  { %8255 = vmatprep.subr.bf16.mxu0 %v8254_v25  ;;  %8900 = vrcp.f32 %v1112_v26  ;;  %v8270_v26 = vpack.c.bf16 %v8622_v17, %v8621_v38 }
 0x385   :  { %8644 = vrot.lane.b32.xlu1 %v9302_v46, %s9140_s17 }
 0x387   :  { %v1109_v51 = vpop.xlane.xlu0 %1108 }
 0x388   :  { %8902 = vrcp.f32 %v1109_v51 }
 0x389   :  { %2146 = vrot.lane.b32.xlu1 %v9439_v3, %s9141_s18  ;;  %8904 = vrcp.f32 %v1124_v22  ;;  %v8606_v22 = vunpack.i.l.bf16 %v9553_v2 }
 0x38a   :  { %v8897_v23 = vpop.eup %8896  ;;  %8906 = vrcp.f32 %v1133_v9 }
 0x38b   :  { %v1148_v58 = vmul.f32 %v8897_v23, %v9588_v27  ;;  %8908 = vrcp.f32 %v1136_v11  ;;  %v8899_v61 = vpop.eup %8898  ;;  %v8607_v27 = vunpack.i.h.bf16 %v9553_v2  ;;  %v8630_v43 = vpop.permute.xlu0 %8629 }
 0x38c   :  { %v8632_v51 = vunpack.i.h.bf16 %v8630_v43 }
 0x38d   :  { %7769 = vmatprep.mubr.msk.f32.mxu1 %vm998_vm3, %v1148_v58  ;;  %8649 = vrot.lane.b32.xlu1 %v9320_v55, %s9140_s17  ;;  %v8262_v2 = vpack.c.bf16 %v8607_v27, %v8606_v22  ;;  %v8616_v27 = vunpack.i.l.bf16 %v9548_v62 }
 0x38e   :  { %7770 = vmatmul.mubr.msk.f32.vlgmr.msra.gmra.mrb[20].mxu1 %vm998_vm3, %v1150_v53  ;;  %v8901_v6 = vpop.eup %8900 }
 0x38f   :  { %8253 = vmatpush3.bf16.msra.mxu1 %v9469_v13  ;;  %v1154_v10 = vmul.f32 %v8901_v6, %v9594_v19  ;;  %v1160_v13 = vmul.f32 %v8899_v61, %v9577_v59 }
 0x390   :  { %8259 = vmatprep.subr.bf16.mxu1 %v9693_v24 }
 0x391   :  { %2326 = vrot.lane.b32.xlu1 %v9442_v5, %s9141_s18 }
 0x392   :  { %v8903_v16 = vpop.eup %8902 }
 0x393   :  { %v1152_v57 = vmul.f32 %v8903_v16, %v9600_v47  ;;  %v8905_v14 = vpop.eup %8904  ;;  %v8617_v16 = vunpack.i.h.bf16 %v9548_v62 }
 0x394   :  { %v8907_v11 = vpop.eup %8906  ;;  %v1162_v19 = vmul.f32 %v8905_v14, %v9564_v28  ;;  %v1872_v28 = vpop.permute.xlu1 %1871 }
 0x395   :  { %2328 = vrot.lane.b32.xlu1 %v9455_v8, %s9141_s18  ;;  %7776 = vmatprep.mubr.msk.f32.mxu0 %vm998_vm3, %v1152_v57  ;;  %v8909_v47 = vpop.eup %8908  ;;  %v1168_v59 = vmul.f32 %v8907_v11, %v9592_v45  ;;  %v8631_v45 = vunpack.i.l.bf16 %v8630_v43  ;;  %v8266_v38 = vpack.c.bf16 %v8617_v16, %v8616_v27 }
 0x396   :  { %7777 = vmatmul.mubr.msk.f32.vlgmr.msra.gmra.mrb[14].mxu0 %vm998_vm3, %v1154_v10 }
 0x397   :  { %8257 = vmatpush3.bf16.msra.mxu0 %v8254_v25  ;;  %7790 = vmatprep.mubr.msk.f32.mxu0 %vm998_vm3, %v1160_v13  ;;  %v1170_v25 = vmul.f32 %v8909_v47, %v9584_v41  ;;  %v8282_v30 = vpack.c.bf16 %v8632_v51, %v8631_v45  ;;  %v8626_v51 = vunpack.i.l.bf16 %v9640_v12 }
 0x398   :  { %8263 = vmatprep.subr.bf16.mxu0 %v8262_v2 }
 0x399   :  { %2419 = vrot.lane.b32.xlu1 %v9420_v56, %s9141_s18 }
 0x39a   :  { %7791 = vmatmul.mubr.msk.f32.vlgmr.msra.gmra.mrb[16].mxu0 %vm998_vm3, %v1162_v19 }
 0x39b   :  { %8265 = vmatpush3.bf16.msra.mxu0 %v8262_v2  ;;  %7804 = vmatprep.mubr.msk.f32.mxu0 %vm998_vm3, %v1168_v59 }
 0x39c   :  { %8272 = vmatprep.subr.msk.bf16.mxu0 %vm9360_vm2, %v8270_v26 }
 0x39d   :  { %2510 = vrot.lane.b32.xlu1 %v9467_v39, %s9141_s18 }
 0x39e   :  { %7805 = vmatmul.mubr.msk.f32.vlgmr.msra.gmra.mrb[18].mxu0 %vm998_vm3, %v1170_v25 }
 0x39f   :  { %7818 = vmatprep.mubr.msk.f32.mxu0 %vm275_vm1, %v1872_v28  ;;  %v8627_v28 = vunpack.i.h.bf16 %v9640_v12 }
 0x3a1   :  { %8664 = vrot.lane.b32.xlu1 %v9298_v44, %s9142_s19 }
 0x3a4   :  { %8275 = vmatpush3.bf16.xpose.msk.msra.mxu0 %vm9360_vm2, %v8270_v26 }
 0x3a5   :  { %8284 = vmatprep.subr.msk.bf16.mxu0 %vm9360_vm2, %v8282_v30  ;;  %8674 = vrot.lane.b32.xlu1 %v9336_v63, %s9142_s19 }
 0x3a9   :  { %8684 = vrot.lane.b32.xlu1 %v9302_v46, %s9142_s19 }
 0x3b8   :  { %v1118_v41 = vpop.xlane.xlu1 %1117 }
 0x3b9   :  { %8910 = vrcp.f32 %v1118_v41 }
 0x3bc   :  { %v1115_v9 = vpop.xlane.xlu1 %1114  ;;  %v1130_v23 = vpop.xlane.xlu0 %1129 }
 0x3bd   :  { %8912 = vrcp.f32 %v1115_v9 }
 0x3be   :  { %8914 = vrcp.f32 %v1130_v23  ;;  %v8276_v23 = vpack.c.bf16 %v8627_v28, %v8626_v51 }
 0x3c0   :  { %v9734_v7 = vpop.permute.xlu1 %8634  ;;  %v1874_v21 = vpop.permute.xlu0 %1873 }
 0x3c1   :  { %7819 = vmatmul.mubr.msk.f32.vlgmr.msra.gmra.mrb[20].mxu0 %vm275_vm1, %v1874_v21  ;;  %v8637_v16 = vunpack.i.h.bf16 %v9734_v7  ;;  %v8636_v27 = vunpack.i.l.bf16 %v9734_v7 }
 0x3c2   :  { %8287 = vmatpush3.bf16.xpose.msk.msra.mxu0 %vm9360_vm2, %v8282_v30 }
 0x3c3   :  { %v8911_v61 = vpop.eup %8910 }
 0x3c4   :  { %v9739_v58 = vpop.permute.xlu1 %1964  ;;  %v9741_v53 = vpop.permute.xlu0 %1962  ;;  %v1158_v11 = vmul.f32 %v8911_v61, %v9611_v15 }
 0x3c7   :  { %v8913_v6 = vpop.eup %8912 }
 0x3c8   :  { %v2054_v22 = vpop.permute.xlu1 %2053  ;;  %v8640_v57 = vpop.permute.xlu0 %8639  ;;  %v1156_v10 = vmul.f32 %v8913_v6, %v9613_v29 }
 0x3c9   :  { %v8642_v14 = vunpack.i.h.bf16 %v8640_v57  ;;  %v8641_v13 = vunpack.i.l.bf16 %v8640_v57  ;;  %7832 = vmatprep.mubr.msk.f32.mxu0 %vm275_vm1, %v2054_v22  ;;  %v8915_v43 = vpop.eup %8914 }
 0x3ca   :  { %7783 = vmatprep.mubr.msk.f32.mxu1 %vm998_vm3, %v1156_v10  ;;  %v1166_v9 = vmul.f32 %v8915_v43, %v9617_v49 }
 0x3cb   :  { %v8294_v17 = vpack.c.bf16 %v8642_v14, %v8641_v13  ;;  %7784 = vmatmul.mubr.msk.f32.vlgmr.msra.gmra.mrb[22].mxu1 %vm998_vm3, %v1158_v11 }
 0x3cc   :  { %8261 = vmatpush3.bf16.msra.mxu1 %v9693_v24  ;;  %v2056_v2 = vpop.permute.xlu0 %2055 }
 0x3cd   :  { %8267 = vmatprep.subr.bf16.mxu1 %v8266_v38  ;;  %7833 = vmatmul.mubr.msk.f32.vlgmr.msra.gmra.mrb[22].mxu0 %vm275_vm1, %v2056_v2 }
 0x3ce   :  { %8296 = vmatprep.subr.msk.bf16.mxu0 %vm9360_vm2, %v8294_v17 }
 0x3cf   :  { %8299 = vmatpush3.bf16.xpose.msk.msra.mxu0 %vm9360_vm2, %v8294_v17  ;;  %v8288_v17 = vpack.c.bf16 %v8637_v16, %v8636_v27 }
 0x3d0   :  { %v9756_v62 = vpop.permute.xlu0 %2144 }
 0x3d4   :  { %v2236_v15 = vpop.permute.xlu0 %2235 }
 0x3d5   :  { %7846 = vmatprep.mubr.msk.f32.mxu0 %vm275_vm1, %v2236_v15 }
 0x3d8   :  { %v2238_v29 = vpop.permute.xlu0 %2237 }
 0x3d9   :  { %7847 = vmatmul.mubr.msk.f32.vlgmr.msra.gmra.mrb[24].mxu0 %vm275_vm1, %v2238_v29 }
 0x3dc   :  { %v9760_v19 = vpop.permute.xlu0 %8654 }
 0x3dd   :  { %v8656_v43 = vunpack.i.l.bf16 %v9760_v19 }
 0x3e0   :  { %v2418_v24 = vpop.permute.xlu0 %2417 }
 0x3e1   :  { %7860 = vmatprep.mubr.msk.f32.mxu0 %vm275_vm1, %v2418_v24 }
 0x3e4   :  { %v9765_v45 = vpop.permute.xlu0 %2508 }
 0x3e8   :  { %v8660_v61 = vpop.permute.xlu0 %8659 }
 0x3e9   :  { %v8661_v57 = vunpack.i.l.bf16 %v8660_v61 }
 0x3f9   :  { %v1127_v47 = vpop.xlane.xlu1 %1126 }
 0x3fa   :  { %8916 = vrcp.f32 %v1127_v47 }
 0x3fd   :  { %v1142_v59 = vpop.xlane.xlu1 %1141 }
 0x3fe   :  { %8918 = vrcp.f32 %v1142_v59 }
 0x401   :  { %v1139_v26 = vpop.xlane.xlu1 %1138 }
 0x402   :  { %8920 = vrcp.f32 %v1139_v26  ;;  %v8657_v26 = vunpack.i.h.bf16 %v9760_v19 }
 0x404   :  { %v8917_v25 = vpop.eup %8916 }
 0x405   :  { %v8645_v30 = vpop.permute.xlu1 %8644  ;;  %v1164_v41 = vmul.f32 %v8917_v25, %v9652_v50  ;;  %v8662_v50 = vunpack.i.h.bf16 %v8660_v61  ;;  %v8312_v25 = vpack.c.bf16 %v8657_v26, %v8656_v43 }
 0x406   :  { %v8647_v7 = vunpack.i.h.bf16 %v8645_v30  ;;  %v8646_v2 = vunpack.i.l.bf16 %v8645_v30 }
 0x407   :  { %7797 = vmatprep.mubr.msk.f32.mxu1 %vm998_vm3, %v1164_v41 }
 0x408   :  { %7798 = vmatmul.mubr.msk.f32.vlgmr.msra.gmra.mrb[24].mxu1 %vm998_vm3, %v1166_v9  ;;  %v8919_v6 = vpop.eup %8918  ;;  %v8300_v24 = vpack.c.bf16 %v8647_v7, %v8646_v2 }
 0x409   :  { %8269 = vmatpush3.bf16.msra.mxu1 %v8266_v38  ;;  %v2147_v21 = vpop.permute.xlu1 %2146  ;;  %v1174_v13 = vmul.f32 %v8919_v6, %v9658_v48  ;;  %v8670_v48 = vpop.permute.xlu0 %8669 }
 0x40a   :  { %8278 = vmatprep.subr.msk.bf16.mxu1 %vm9360_vm2, %v8276_v23  ;;  %v8672_v29 = vunpack.i.h.bf16 %v8670_v48 }
 0x40c   :  { %v8921_v12 = vpop.eup %8920 }
 0x40d   :  { %v8650_v22 = vpop.permute.xlu1 %8649  ;;  %v1172_v49 = vmul.f32 %v8921_v12, %v9666_v1  ;;  %v8318_v1 = vpack.c.bf16 %v8662_v50, %v8661_v57  ;;  %v9841_v57 = vld [vmem:[%s11114_s3 + $0x18] sm:$0xff] }
 0x40e   :  { %v8652_v10 = vunpack.i.h.bf16 %v8650_v22  ;;  %v8651_v14 = vunpack.i.l.bf16 %v8650_v22 }
 0x40f   :  { %7811 = vmatprep.mubr.msk.f32.mxu1 %vm998_vm3, %v1172_v49 }
 0x410   :  { %v8306_v11 = vpack.c.bf16 %v8652_v10, %v8651_v14  ;;  %7812 = vmatmul.mubr.msk.f32.vlgmr.msra.gmra.mrb[26].mxu1 %vm998_vm3, %v1174_v13  ;;  %v9846_v10 = vld [vmem:[%s11114_s3 + $0x10] sm:$0xff] }
 0x411   :  { %v2327_v38 = vpop.permute.xlu1 %2326  ;;  %7825 = vmatprep.mubr.msk.f32.mxu1 %vm275_vm1, %v9741_v53  ;;  %v8671_v53 = vunpack.i.l.bf16 %v8670_v48 }
 0x412   :  { %8281 = vmatpush3.bf16.xpose.msk.msra.mxu1 %vm9360_vm2, %v8276_v23  ;;  %8308 = vmatprep.subr.msk.bf16.mxu0 %vm9360_vm2, %v8306_v11 }
 0x413   :  { %8290 = vmatprep.subr.msk.bf16.mxu1 %vm9360_vm2, %v8288_v17  ;;  %8311 = vmatpush3.bf16.xpose.msk.msra.mxu0 %vm9360_vm2, %v8306_v11  ;;  %v9798_v59 = vpack.c.bf16 %v8672_v29, %v8671_v53 }
 0x414   :  { %8319 = vmatprep.subr.bf16.mxu0 %v8318_v1 }
 0x415   :  { %v2329_v15 = vpop.permute.xlu1 %2328 }
 0x419   :  { %7826 = vmatmul.mubr.msk.f32.vlgmr.msra.gmra.mrb[28].mxu1 %vm275_vm1, %v9739_v58  ;;  %v2420_v47 = vpop.permute.xlu1 %2419 }
 0x41a   :  { %8293 = vmatpush3.bf16.xpose.msk.msra.mxu1 %vm9360_vm2, %v8288_v17  ;;  %7839 = vmatprep.mubr.msk.f32.mxu1 %vm275_vm1, %v9756_v62 }
 0x41b   :  { %8302 = vmatprep.subr.msk.bf16.mxu1 %vm9360_vm2, %v8300_v24  ;;  %7861 = vmatmul.mubr.msk.f32.vlgmr.msra.gmra.mrb[26].mxu0 %vm275_vm1, %v2420_v47 }
 0x41c   :  { %8321 = vmatpush3.bf16.msra.mxu0 %v8318_v1 }
 0x41d   :  { %8327 = vmatprep.subr.bf16.mxu0 %v9798_v59  ;;  %v2511_v58 = vpop.permute.xlu1 %2510 }
 0x421   :  { %7840 = vmatmul.mubr.msk.f32.vlgmr.msra.gmra.mrb[30].mxu1 %vm275_vm1, %v2147_v21  ;;  %v8665_v28 = vpop.permute.xlu1 %8664 }
 0x422   :  { %8305 = vmatpush3.bf16.xpose.msk.msra.mxu1 %vm9360_vm2, %v8300_v24  ;;  %7853 = vmatprep.mubr.msk.f32.mxu1 %vm275_vm1, %v2327_v38  ;;  %v8667_v62 = vunpack.i.h.bf16 %v8665_v28  ;;  %v8666_v51 = vunpack.i.l.bf16 %v8665_v28 }
 0x423   :  { %8314 = vmatprep.subr.msk.bf16.mxu1 %vm9360_vm2, %v8312_v25 }
 0x424   :  { %v8322_v19 = vpack.c.bf16 %v8667_v62, %v8666_v51 }
 0x425   :  { %v8675_v30 = vpop.permute.xlu1 %8674 }
 0x426   :  { %v8677_v41 = vunpack.i.h.bf16 %v8675_v30  ;;  %v8676_v9 = vunpack.i.l.bf16 %v8675_v30 }
 0x428   :  { %v9815_v23 = vpack.c.bf16 %v8677_v41, %v8676_v9 }
 0x429   :  { %7854 = vmatmul.mubr.msk.f32.vlgmr.msra.gmra.mrb[32].mxu1 %vm275_vm1, %v2329_v15 }
 0x42a   :  { %8317 = vmatpush3.bf16.xpose.msk.msra.mxu1 %vm9360_vm2, %v8312_v25  ;;  %7867 = vmatprep.mubr.msk.f32.mxu1 %vm275_vm1, %v9765_v45 }
 0x42b   :  { %8323 = vmatprep.subr.bf16.mxu1 %v8322_v19 }
 0x431   :  { %7868 = vmatmul.mubr.msk.f32.vlgmr.msra.gmra.mrb[34].mxu1 %vm275_vm1, %v2511_v58 }
 0x432   :  { %8325 = vmatpush3.bf16.msra.mxu1 %v8322_v19 }
 0x433   :  { %8331 = vmatprep.subr.bf16.mxu1 %v9815_v23 }
 0x455   :  { %v9818_v21 = vpop.f32.mrb[12].mxu0 }
 0x456   :  { %11120 = vst [vmem:[#allocation5_spill] sm:$0xff] %v9818_v21  ;;  %v9820_v61 = vpop.f32.mrb[13].mxu0 }
 0x457   :  { %11121 = vst [vmem:[#allocation6_spill] sm:$0xff] %v9820_v61 }
 0x461   :  { %v9822_v6 = vpop.f32.mrb[20].mxu1 }
 0x462   :  { %11122 = vst [vmem:[#allocation7_spill] sm:$0xff] %v9822_v6  ;;  %v9824_v12 = vpop.f32.mrb[21].mxu1 }
 0x463   :  { %11123 = vst [vmem:[#allocation8_spill] sm:$0xff] %v9824_v12 }
 0x469   :  { %v9826_v16 = vpop.f32.mrb[14].mxu0 }
 0x46a   :  { %11124 = vst [vmem:[#allocation9_spill] sm:$0xff] %v9826_v16  ;;  %v9828_v45 = vpop.f32.mrb[15].mxu0 }
 0x46b   :  { %11125 = vst [vmem:[#allocation10_spill] sm:$0xff] %v9828_v45 }
 0x46d   :  { %v9830_v27 = vpop.f32.mrb[16].mxu0 }
 0x46e   :  { %11126 = vst [vmem:[#allocation11_spill] sm:$0xff] %v9830_v27  ;;  %v9832_v50 = vpop.f32.mrb[17].mxu0 }
 0x46f   :  { %11127 = vst [vmem:[#allocation12_spill] sm:$0xff] %v9832_v50 }
 0x471   :  { %v9834_v22 = vpop.f32.mrb[18].mxu0 }
 0x472   :  { %11128 = vst [vmem:[#allocation13_spill] sm:$0xff] %v9834_v22  ;;  %v9836_v49 = vpop.f32.mrb[19].mxu0 }
 0x473   :  { %11129 = vst [vmem:[#allocation14_spill] sm:$0xff] %v9836_v49 }
 0x494   :  { %v7820_v14 = vpop.f32.mrb[20].mxu0 }
 0x495   :  { %v9849_v13 = vadd.f32 %v7820_v14, %v9841_v57  ;;  %v1953_v11 = vpop.f32.mrb[21].mxu0 }
 0x496   :  { %v9852_v17 = vadd.f32 %v1953_v11, %v9846_v10 }
 0x497   :  { %v2602_v38 = vsel %vm998_vm3, %v9849_v13, -inf }
 0x498   :  { %2603 = vmax.xlane.f32.xlu1 %v2602_v38  ;;  %v2599_v1 = vsel %vm998_vm3, %v9852_v17, -inf }
 0x499   :  { %2600 = vmax.xlane.f32.xlu0 %v2599_v1 }
 0x49e   :  { %v9858_v48 = vpop.f32.mrb[22].mxu1 }
 0x49f   :  { %11130 = vst [vmem:[#allocation15_spill] sm:$0xff] %v9858_v48  ;;  %v9860_v7 = vpop.f32.mrb[23].mxu1 }
 0x4a0   :  { %11131 = vst [vmem:[#allocation16_spill] sm:$0xff] %v9860_v7  ;;  %v7834_v2 = vpop.f32.mrb[22].mxu0 }
 0x4a1   :  { %v9863_v15 = vadd.f32 %v7834_v2, %v9841_v57  ;;  %v2135_v29 = vpop.f32.mrb[23].mxu0 }
 0x4a2   :  { %v9866_v53 = vadd.f32 %v2135_v29, %v9846_v10 }
 0x4a3   :  { %v2614_v24 = vsel %vm998_vm3, %v9863_v15, -inf }
 0x4a4   :  { %2615 = vmax.xlane.f32.xlu0 %v2614_v24  ;;  %v2611_v47 = vsel %vm998_vm3, %v9866_v53, -inf }
 0x4a8   :  { %2612 = vmax.xlane.f32.xlu0 %v2611_v47 }
 0x4ac   :  { %v7848_v26 = vpop.f32.mrb[24].mxu0 }
 0x4ad   :  { %v2317_v43 = vpop.f32.mrb[25].mxu0  ;;  %v9889_v38 = vadd.f32 %v7848_v26, %v9841_v57 }
 0x4ae   :  { %v9894_v2 = vadd.f32 %v2317_v43, %v9846_v10 }
 0x4af   :  { %v2626_v24 = vsel %vm998_vm3, %v9889_v38, -inf }
 0x4b0   :  { %v2623_v43 = vsel %vm998_vm3, %v9894_v2, -inf }
 0x4db   :  { %v9872_v58 = vpop.f32.mrb[24].mxu1 }
 0x4dc   :  { %11132 = vst [vmem:[#allocation17_spill] sm:$0xff] %v9872_v58  ;;  %v9874_v25 = vpop.f32.mrb[25].mxu1 }
 0x4dd   :  { %11133 = vst [vmem:[#allocation18_spill] sm:$0xff] %v9874_v25 }
 0x4e3   :  { %v9876_v28 = vpop.f32.mrb[26].mxu1 }
 0x4e4   :  { %11134 = vst [vmem:[#allocation19_spill] sm:$0xff] %v9876_v28  ;;  %v9878_v62 = vpop.f32.mrb[27].mxu1 }
 0x4e5   :  { %11135 = vst [vmem:[#allocation20_spill] sm:$0xff] %v9878_v62 }
 0x4ec   :  { %v7827_v51 = vpop.f32.mrb[28].mxu1 }
 0x4ed   :  { %v9881_v19 = vadd.f32 %v7827_v51, %v9841_v57  ;;  %v2044_v30 = vpop.f32.mrb[29].mxu1 }
 0x4ee   :  { %v9884_v41 = vadd.f32 %v2044_v30, %v9846_v10  ;;  %v7862_v9 = vpop.f32.mrb[26].mxu0 }
 0x4ef   :  { %v2499_v14 = vpop.f32.mrb[27].mxu0  ;;  %v2608_v11 = vsel %vm998_vm3, %v9881_v19, -inf }
 0x4f0   :  { %2609 = vmax.xlane.f32.xlu1 %v2608_v11  ;;  %v2605_v1 = vsel %vm998_vm3, %v9884_v41, -inf  ;;  %v9907_v11 = vadd.f32 %v7862_v9, %v9841_v57 }
 0x4f1   :  { %2606 = vmax.xlane.f32.xlu0 %v2605_v1  ;;  %v9912_v1 = vadd.f32 %v2499_v14, %v9846_v10 }
 0x4f4   :  { %v7841_v29 = vpop.f32.mrb[30].mxu1 }
 0x4f5   :  { %v9899_v47 = vadd.f32 %v7841_v29, %v9841_v57  ;;  %v2226_v51 = vpop.f32.mrb[31].mxu1  ;;  %2627 = vmax.xlane.f32.xlu0 %v2626_v24 }
 0x4f6   :  { %v9902_v26 = vadd.f32 %v2226_v51, %v9846_v10  ;;  %v2638_v51 = vsel %vm998_vm3, %v9907_v11, -inf }
 0x4f7   :  { %v2620_v30 = vsel %vm998_vm3, %v9899_v47, -inf }
 0x4f8   :  { %2621 = vmax.xlane.f32.xlu1 %v2620_v30  ;;  %v2617_v29 = vsel %vm998_vm3, %v9902_v26, -inf  ;;  %v2635_v30 = vsel %vm998_vm3, %v9912_v1, -inf }
 0x4f9   :  { %2624 = vmax.xlane.f32.xlu0 %v2623_v43 }
 0x4fc   :  { %v7855_v24 = vpop.f32.mrb[32].mxu1  ;;  %2618 = vmax.xlane.f32.xlu1 %v2617_v29 }
 0x4fd   :  { %v9919_v28 = vadd.f32 %v7855_v24, %v9841_v57  ;;  %v2408_v9 = vpop.f32.mrb[33].mxu1  ;;  %2639 = vmax.xlane.f32.xlu0 %v2638_v51 }
 0x4fe   :  { %v9930_v29 = vadd.f32 %v2408_v9, %v9846_v10  ;;  %v9949_v9 = vpop.permute.xlu1 %8684 }
 0x4ff   :  { %v2632_v14 = vsel %vm998_vm3, %v9919_v28, -inf }
 0x500   :  { %2636 = vmax.xlane.f32.xlu1 %v2635_v30  ;;  %v2629_v51 = vsel %vm998_vm3, %v9930_v29, -inf }
 0x501   :  { %2633 = vmax.xlane.f32.xlu0 %v2632_v14 }
 0x504   :  { %v7869_v43 = vpop.f32.mrb[34].mxu1 }
 0x505   :  { %v2590_v62 = vpop.f32.mrb[35].mxu1  ;;  %v9933_v24 = vadd.f32 %v7869_v43, %v9841_v57  ;;  %v9945_v57 = vpop.permute.xlu0 %8679 }
 0x506   :  { %v9956_v49 = vadd.f32 %v2590_v62, %v9846_v10  ;;  %v8682_v7 = vunpack.i.h.bf16 %v9945_v57  ;;  %v8681_v45 = vunpack.i.l.bf16 %v9945_v57 }
 0x507   :  { %v2644_v30 = vsel %vm998_vm3, %v9933_v24, -inf }
 0x511   :  { %8694 = vrot.lane.b32.xlu1 %v9340_v0, %s9142_s19 }
 0x517   :  { %8689 = vrot.lane.b32.xlu0 %v9320_v55, %s9142_s19 }
 0x525   :  { %v2604_v43 = vpop.xlane.xlu1 %2603 }
 0x526   :  { %v2601_v14 = vpop.xlane.xlu0 %2600 }
 0x527   :  { %v2647_v21 = vsub.f32 %v9852_v17, %v2601_v14 }
 0x529   :  { %v2663_v27 = vmul.f32 1.442695, %v2647_v21 }
 0x535   :  { %2630 = vmax.xlane.f32.xlu1 %v2629_v51  ;;  %v2616_v51 = vpop.xlane.xlu0 %2615 }
 0x536   :  { %2645 = vmax.xlane.f32.xlu0 %v2644_v30  ;;  %v2648_v30 = vsub.f32 %v9849_v13, %v2604_v43  ;;  %v2652_v22 = vsub.f32 %v9863_v15, %v2616_v51  ;;  %v2641_v13 = vsel %vm998_vm3, %v9956_v49, -inf }
 0x538   :  { %v2665_v61 = vmul.f32 1.442695, %v2648_v30  ;;  %v2673_v48 = vmul.f32 1.442695, %v2652_v22 }
 0x539   :  { %v2613_v58 = vpop.xlane.xlu0 %2612 }
 0x53a   :  { %8922 = vpow2.f32 %v2665_v61  ;;  %v2651_v16 = vsub.f32 %v9866_v53, %v2613_v58 }
 0x53b   :  { %8924 = vpow2.f32 %v2663_v27 }
 0x53c   :  { %8926 = vpow2.f32 %v2673_v48  ;;  %v2671_v6 = vmul.f32 1.442695, %v2651_v16 }
 0x53e   :  { %8928 = vpow2.f32 %v2671_v6 }
 0x544   :  { %v9958_v25 = vpop.eup %8922 }
 0x545   :  { %v9962_v17 = vpop.eup %8924  ;;  %v2698_v21 = vsel %vm998_vm3, %v9958_v25, 0.0 }
 0x546   :  { %8704 = vrot.lane.b32.xlu1 %v9298_v44, %s9143_s24  ;;  %v9966_v61 = vpop.eup %8926  ;;  %v2695_v16 = vsel %vm998_vm3, %v9962_v17, 0.0 }
 0x547   :  { %v2710_v6 = vsel %vm998_vm3, %v9966_v61, 0.0 }
 0x548   :  { %v9972_v27 = vpop.eup %8928 }
 0x549   :  { %v2707_v22 = vsel %vm998_vm3, %v9972_v27, 0.0 }
 0x54a   :  { %3471 = vrot.lane.b32.xlu1 %v9275_v33, %s9144_s25 }
 0x54c   :  { %8699 = vrot.lane.b32.xlu0 %v9273_v32, %s9143_s24 }
 0x550   :  { %8709 = vrot.lane.b32.xlu0 %v9316_v54, %s9143_s24 }
 0x56e   :  { %2642 = vmax.xlane.f32.xlu1 %v2641_v13 }
 0x56f   :  { %2699 = vadd.xlane.f32.xlu0 %v2698_v21 }
 0x572   :  { %2696 = vadd.xlane.f32.xlu1 %v2695_v16 }
 0x573   :  { %2711 = vadd.xlane.f32.xlu0 %v2710_v6 }
 0x577   :  { %2708 = vadd.xlane.f32.xlu0 %v2707_v22 }
 0x57d   :  { %v2610_v10 = vpop.xlane.xlu1 %2609 }
 0x57e   :  { %v2650_v48 = vsub.f32 %v9881_v19, %v2610_v10  ;;  %v2607_v15 = vpop.xlane.xlu0 %2606 }
 0x57f   :  { %v2649_v53 = vsub.f32 %v9884_v41, %v2607_v15 }
 0x580   :  { %v2669_v58 = vmul.f32 1.442695, %v2650_v48 }
 0x581   :  { %v2667_v62 = vmul.f32 1.442695, %v2649_v53 }
 0x582   :  { %8930 = vpow2.f32 %v2669_v58  ;;  %v2628_v14 = vpop.xlane.xlu0 %2627 }
 0x583   :  { %v2656_v43 = vsub.f32 %v9889_v38, %v2628_v14  ;;  %8932 = vpow2.f32 %v2667_v62 }
 0x585   :  { %v2681_v51 = vmul.f32 1.442695, %v2656_v43  ;;  %v2622_v30 = vpop.xlane.xlu1 %2621 }
 0x586   :  { %v2654_v13 = vsub.f32 %v9899_v47, %v2622_v30  ;;  %v2625_v21 = vpop.xlane.xlu0 %2624 }
 0x587   :  { %8934 = vpow2.f32 %v2681_v51  ;;  %v2655_v16 = vsub.f32 %v9894_v2, %v2625_v21 }
 0x588   :  { %v2677_v6 = vmul.f32 1.442695, %v2654_v13 }
 0x589   :  { %v2679_v19 = vmul.f32 1.442695, %v2655_v16  ;;  %v2619_v22 = vpop.xlane.xlu1 %2618 }
 0x58a   :  { %8936 = vpow2.f32 %v2677_v6  ;;  %v2653_v41 = vsub.f32 %v9902_v26, %v2619_v22  ;;  %v2640_v10 = vpop.xlane.xlu0 %2639 }
 0x58b   :  { %8938 = vpow2.f32 %v2679_v19  ;;  %v2660_v48 = vsub.f32 %v9907_v11, %v2640_v10 }
 0x58c   :  { %v9983_v38 = vpop.eup %8930  ;;  %v2675_v15 = vmul.f32 1.442695, %v2653_v41 }
 0x58d   :  { %v2689_v53 = vmul.f32 1.442695, %v2660_v48  ;;  %v2637_v58 = vpop.xlane.xlu1 %2636  ;;  %v2704_v47 = vsel %vm998_vm3, %v9983_v38, 0.0  ;;  %v9987_v62 = vpop.eup %8932 }
 0x58e   :  { %8940 = vpow2.f32 %v2675_v15  ;;  %v2659_v2 = vsub.f32 %v9912_v1, %v2637_v58  ;;  %2705 = vadd.xlane.f32.xlu1 %v2704_v47  ;;  %v2634_v14 = vpop.xlane.xlu0 %2633  ;;  %v2701_v30 = vsel %vm998_vm3, %v9987_v62, 0.0 }
 0x58f   :  { %8942 = vpow2.f32 %v2689_v53  ;;  %v2658_v26 = vsub.f32 %v9919_v28, %v2634_v14 }
 0x590   :  { %v2687_v43 = vmul.f32 1.442695, %v2659_v2 }
 0x591   :  { %v9991_v11 = vpop.eup %8934  ;;  %v2685_v51 = vmul.f32 1.442695, %v2658_v26  ;;  %v10033_v58 = vpop.permute.xlu1 %8694 }
 0x592   :  { %8944 = vpow2.f32 %v2687_v43  ;;  %2702 = vadd.xlane.f32.xlu1 %v2701_v30  ;;  %v2722_v13 = vsel %vm998_vm3, %v9991_v11, 0.0  ;;  %v10037_v47 = vpop.permute.xlu0 %8689 }
 0x593   :  { %8946 = vpow2.f32 %v2685_v51  ;;  %2723 = vadd.xlane.f32.xlu0 %v2722_v13 }
 0x594   :  { %v9997_v1 = vpop.eup %8936 }
 0x595   :  { %v9999_v21 = vpop.eup %8938  ;;  %v2716_v28 = vsel %vm998_vm3, %v9997_v1, 0.0 }
 0x596   :  { %2717 = vadd.xlane.f32.xlu1 %v2716_v28  ;;  %v2719_v16 = vsel %vm998_vm3, %v9999_v21, 0.0 }
 0x597   :  { %2720 = vadd.xlane.f32.xlu0 %v2719_v16 }
 0x598   :  { %v10005_v6 = vpop.eup %8940 }
 0x599   :  { %v10007_v19 = vpop.eup %8942  ;;  %v2713_v22 = vsel %vm998_vm3, %v10005_v6, 0.0 }
 0x59a   :  { %2714 = vadd.xlane.f32.xlu1 %v2713_v22  ;;  %v2734_v41 = vsel %vm998_vm3, %v10007_v19, 0.0 }
 0x59b   :  { %2735 = vadd.xlane.f32.xlu0 %v2734_v41 }
 0x59c   :  { %v10013_v10 = vpop.eup %8944 }
 0x59d   :  { %v10015_v48 = vpop.eup %8946  ;;  %v2731_v15 = vsel %vm998_vm3, %v10013_v10, 0.0 }
 0x59e   :  { %2732 = vadd.xlane.f32.xlu1 %v2731_v15  ;;  %v2728_v53 = vsel %vm998_vm3, %v10015_v48, 0.0 }
 0x59f   :  { %2729 = vadd.xlane.f32.xlu0 %v2728_v53 }
 0x5af   :  { %8714 = vrot.lane.b32.xlu1 %v9336_v63, %s9143_s24 }
 0x5b3   :  { %3564 = vrot.lane.b32.xlu1 %v9391_v31, %s9144_s25 }
 0x5b5   :  { %3473 = vrot.lane.b32.xlu0 %v9371_v18, %s9144_s25 }
 0x5b7   :  { %3653 = vrot.lane.b32.xlu1 %v9399_v40, %s9144_s25 }
 0x5b9   :  { %3562 = vrot.lane.b32.xlu0 %v9374_v20, %s9144_s25 }
 0x5bd   :  { %8719 = vrot.lane.b32.xlu0 %v9280_v36, %s9143_s24 }
 0x5c1   :  { %3655 = vrot.lane.b32.xlu0 %v9417_v52, %s9144_s25 }
 0x5c2   :  { %v2631_v2 = vpop.xlane.xlu1 %2630 }
 0x5c3   :  { %v2657_v14 = vsub.f32 %v9930_v29, %v2631_v2  ;;  %v2646_v26 = vpop.xlane.xlu0 %2645 }
 0x5c4   :  { %v2662_v51 = vsub.f32 %v9933_v24, %v2646_v26 }
 0x5c5   :  { %3744 = vrot.lane.b32.xlu0 %v9427_v60, %s9144_s25  ;;  %v2683_v43 = vmul.f32 1.442695, %v2657_v14 }
 0x5c6   :  { %v2693_v30 = vmul.f32 1.442695, %v2662_v51  ;;  %v10067_v16 = vpop.permute.xlu1 %8704 }
 0x5c7   :  { %8948 = vpow2.f32 %v2683_v43  ;;  %v10069_v22 = vpop.permute.xlu0 %8699 }
 0x5c8   :  { %8950 = vpow2.f32 %v2693_v30 }
 0x5c9   :  { %3835 = vrot.lane.b32.xlu0 %v9277_v35, %s9144_s25 }
 0x5ca   :  { %v10071_v41 = vpop.permute.xlu1 %3471 }
 0x5cb   :  { %v10073_v15 = vpop.permute.xlu0 %8709 }
 0x5cd   :  { %3837 = vrot.lane.b32.xlu0 %v9394_v34, %s9144_s25 }
 0x5d1   :  { %8734 = vrot.lane.b32.xlu0 %v9340_v0, %s9143_s24  ;;  %v10051_v29 = vpop.eup %8948 }
 0x5d2   :  { %v2725_v24 = vsel %vm998_vm3, %v10051_v29, 0.0  ;;  %v10057_v13 = vpop.eup %8950 }
 0x5d3   :  { %v2740_v28 = vsel %vm998_vm3, %v10057_v13, 0.0 }
 0x5d5   :  { %4017 = vrot.lane.b32.xlu0 %v9406_v37, %s9144_s25 }
 0x5d9   :  { %4108 = vrot.lane.b32.xlu0 %v9458_v42, %s9144_s25 }
 0x5db   :  { %2726 = vadd.xlane.f32.xlu1 %v2725_v24 }
 0x5dd   :  { %8739 = vrot.lane.b32.xlu0 %v9273_v32, %s9145_s26 }
 0x5df   :  { %2741 = vadd.xlane.f32.xlu1 %v2740_v28 }
 0x5e1   :  { %8749 = vrot.lane.b32.xlu0 %v9316_v54, %s9145_s26 }
 0x5e5   :  { %8759 = vrot.lane.b32.xlu0 %v9280_v36, %s9145_s26 }
 0x5fb   :  { %v2643_v53 = vpop.xlane.xlu1 %2642 }
 0x5fc   :  { %v2661_v2 = vsub.f32 %v9956_v49, %v2643_v53  ;;  %v2700_v14 = vpop.xlane.xlu0 %2699 }
 0x5fd   :  { %8952 = vrcp.f32 %v2700_v14 }
 0x5fe   :  { %v2691_v26 = vmul.f32 1.442695, %v2661_v2 }
 0x5ff   :  { %v2697_v43 = vpop.xlane.xlu1 %2696 }
 0x600   :  { %8954 = vpow2.f32 %v2691_v26  ;;  %v2712_v51 = vpop.xlane.xlu0 %2711 }
 0x601   :  { %8956 = vrcp.f32 %v2697_v43  ;;  %v8692_v43 = vunpack.i.h.bf16 %v10037_v47 }
 0x602   :  { %8958 = vrcp.f32 %v2712_v51  ;;  %v8691_v51 = vunpack.i.l.bf16 %v10037_v47 }
 0x604   :  { %v2709_v30 = vpop.xlane.xlu0 %2708 }
 0x605   :  { %8960 = vrcp.f32 %v2709_v30  ;;  %v8334_v30 = vpack.c.bf16 %v8682_v7, %v8681_v45 }
 0x607   :  { %v8953_v24 = vpop.eup %8952 }
 0x608   :  { %v2746_v2 = vmul.f32 %v8953_v24, %v9958_v25  ;;  %v8342_v25 = vpack.c.bf16 %v8692_v43, %v8691_v51 }
 0x60a   :  { %v10076_v28 = vpop.eup %8954 }
 0x60b   :  { %v8957_v50 = vpop.eup %8956  ;;  %v2737_v49 = vsel %vm998_vm3, %v10076_v28, 0.0 }
 0x60c   :  { %2738 = vadd.xlane.f32.xlu1 %v2737_v49  ;;  %v2744_v53 = vmul.f32 %v8957_v50, %v9962_v17  ;;  %v8959_v14 = vpop.eup %8958 }
 0x60d   :  { %v2754_v50 = vmul.f32 %v8959_v14, %v9966_v61 }
 0x60e   :  { %7874 = vmatprep.mubr.msk.f32.mxu0 %vm998_vm3, %v2744_v53  ;;  %v8687_v53 = vunpack.i.h.bf16 %v9949_v9 }
 0x60f   :  { %v8961_v26 = vpop.eup %8960  ;;  %7875 = vmatmul.mubr.msk.f32.vlgmr.msra.gmra.mrb[28].mxu0 %vm998_vm3, %v2746_v2  ;;  %v8686_v2 = vunpack.i.l.bf16 %v9949_v9  ;;  %v8702_v9 = vunpack.i.h.bf16 %v10069_v22 }
 0x610   :  { %8329 = vmatpush3.bf16.msra.mxu0 %v9798_v59  ;;  %v2752_v57 = vmul.f32 %v8961_v26, %v9972_v27 }
 0x611   :  { %8335 = vmatprep.subr.bf16.mxu0 %v8334_v30 }
 0x612   :  { %7888 = vmatprep.mubr.msk.f32.mxu0 %vm998_vm3, %v2752_v57  ;;  %v8338_v57 = vpack.c.bf16 %v8687_v53, %v8686_v2 }
 0x613   :  { %7889 = vmatmul.mubr.msk.f32.vlgmr.msra.gmra.mrb[30].mxu0 %vm998_vm3, %v2754_v50 }
 0x614   :  { %8337 = vmatpush3.bf16.msra.mxu0 %v8334_v30 }
 0x615   :  { %8343 = vmatprep.subr.bf16.mxu0 %v8342_v25 }
 0x61b   :  { %v2706_v17 = vpop.xlane.xlu1 %2705 }
 0x61c   :  { %8962 = vrcp.f32 %v2706_v17  ;;  %v8701_v17 = vunpack.i.l.bf16 %v10069_v22 }
 0x61d   :  { %8724 = vrot.lane.b32.xlu1 %v9302_v46, %s9143_s24 }
 0x61e   :  { %v8350_v22 = vpack.c.bf16 %v8702_v9, %v8701_v17 }
 0x61f   :  { %v2703_v45 = vpop.xlane.xlu1 %2702 }
 0x620   :  { %8964 = vrcp.f32 %v2703_v45  ;;  %v2724_v59 = vpop.xlane.xlu0 %2723 }
 0x621   :  { %3746 = vrot.lane.b32.xlu1 %v9439_v3, %s9144_s25  ;;  %8966 = vrcp.f32 %v2724_v59 }
 0x623   :  { %v2718_v7 = vpop.xlane.xlu1 %2717 }
 0x624   :  { %v2721_v61 = vpop.xlane.xlu0 %2720 }
 0x625   :  { %8968 = vrcp.f32 %v2721_v61  ;;  %8729 = vrot.lane.b32.xlu1 %v9320_v55, %s9143_s24  ;;  %v8697_v61 = vunpack.i.h.bf16 %v10033_v58 }
 0x626   :  { %8970 = vrcp.f32 %v2718_v7  ;;  %v8963_v24 = vpop.eup %8962 }
 0x627   :  { %v2715_v27 = vpop.xlane.xlu1 %2714  ;;  %v2750_v51 = vmul.f32 %v8963_v24, %v9983_v38 }
 0x628   :  { %8972 = vrcp.f32 %v2715_v27  ;;  %v2736_v47 = vpop.xlane.xlu0 %2735  ;;  %v8696_v27 = vunpack.i.l.bf16 %v10033_v58 }
 0x629   :  { %3926 = vrot.lane.b32.xlu1 %v9442_v5, %s9144_s25  ;;  %8974 = vrcp.f32 %v2736_v47 }
 0x62a   :  { %v8965_v49 = vpop.eup %8964  ;;  %v8346_v58 = vpack.c.bf16 %v8697_v61, %v8696_v27 }
 0x62b   :  { %v2733_v14 = vpop.xlane.xlu1 %2732  ;;  %v2748_v26 = vmul.f32 %v8965_v49, %v9987_v62  ;;  %v8967_v30 = vpop.eup %8966 }
 0x62c   :  { %8976 = vrcp.f32 %v2733_v14  ;;  %v10104_v43 = vpop.xlane.xlu0 %2729  ;;  %v2762_v59 = vmul.f32 %v8967_v30, %v9991_v11 }
 0x62d   :  { %7881 = vmatprep.mubr.msk.f32.mxu1 %vm998_vm3, %v2748_v26  ;;  %3928 = vrot.lane.b32.xlu1 %v9455_v8, %s9144_s25  ;;  %8978 = vrcp.f32 %v10104_v43 }
 0x62e   :  { %7882 = vmatmul.mubr.msk.f32.vlgmr.msra.gmra.mrb[36].mxu1 %vm998_vm3, %v2750_v51 }
 0x62f   :  { %v8969_v50 = vpop.eup %8968  ;;  %8333 = vmatpush3.bf16.msra.mxu1 %v9815_v23  ;;  %v10135_v49 = vpop.permute.xlu1 %8714 }
 0x630   :  { %8339 = vmatprep.subr.bf16.mxu1 %v8338_v57  ;;  %v3474_v62 = vpop.permute.xlu0 %3473  ;;  %v2760_v38 = vmul.f32 %v8969_v50, %v9999_v21  ;;  %v8971_v45 = vpop.eup %8970 }
 0x631   :  { %4019 = vrot.lane.b32.xlu1 %v9420_v56, %s9144_s25  ;;  %v2758_v47 = vmul.f32 %v8971_v45, %v9997_v1  ;;  %v8711_v1 = vunpack.i.l.bf16 %v10073_v15 }
 0x632   :  { %v8973_v7 = vpop.eup %8972  ;;  %7902 = vmatprep.mubr.msk.f32.mxu0 %vm998_vm3, %v2760_v38 }
 0x633   :  { %7903 = vmatmul.mubr.msk.f32.vlgmr.msra.gmra.mrb[32].mxu0 %vm998_vm3, %v2762_v59  ;;  %v2756_v23 = vmul.f32 %v8973_v7, %v10005_v6  ;;  %v8975_v24 = vpop.eup %8974  ;;  %v8707_v59 = vunpack.i.h.bf16 %v10067_v16  ;;  %v8706_v7 = vunpack.i.l.bf16 %v10067_v16 }
 0x634   :  { %8345 = vmatpush3.bf16.msra.mxu0 %v8342_v25  ;;  %v10123_v21 = vpop.permute.xlu0 %3562  ;;  %v8712_v25 = vunpack.i.h.bf16 %v10073_v15  ;;  %v2770_v2 = vmul.f32 %v8975_v24, %v10007_v19  ;;  %v10146_v15 = vpop.permute.xlu1 %3564 }
 0x635   :  { %8352 = vmatprep.subr.msk.bf16.mxu0 %vm9360_vm2, %v8350_v22  ;;  %7895 = vmatprep.mubr.msk.f32.mxu1 %vm998_vm3, %v2756_v23 }
 0x636   :  { %v8977_v11 = vpop.eup %8976  ;;  %4110 = vrot.lane.b32.xlu1 %v9467_v39, %s9144_s25  ;;  %7896 = vmatmul.mubr.msk.f32.vlgmr.msra.gmra.mrb[38].mxu1 %vm998_vm3, %v2758_v47 }
 0x637   :  { %8341 = vmatpush3.bf16.msra.mxu1 %v8338_v57  ;;  %v2768_v6 = vmul.f32 %v8977_v11, %v10013_v10  ;;  %v8362_v10 = vpack.c.bf16 %v8712_v25, %v8711_v1  ;;  %v8979_v38 = vpop.eup %8978  ;;  %v8716_v25 = vunpack.i.l.bf16 %v10135_v49 }
 0x638   :  { %8347 = vmatprep.subr.bf16.mxu1 %v8346_v58  ;;  %v8720_v53 = vpop.permute.xlu0 %8719  ;;  %v2766_v27 = vmul.f32 %v8979_v38, %v10015_v48  ;;  %v8717_v48 = vunpack.i.h.bf16 %v10135_v49 }
 0x639   :  { %7916 = vmatprep.mubr.msk.f32.mxu0 %vm998_vm3, %v2768_v6  ;;  %v8722_v19 = vunpack.i.h.bf16 %v8720_v53  ;;  %v8721_v26 = vunpack.i.l.bf16 %v8720_v53 }
 0x63a   :  { %8744 = vrot.lane.b32.xlu1 %v9298_v44, %s9145_s26  ;;  %7917 = vmatmul.mubr.msk.f32.vlgmr.msra.gmra.mrb[34].mxu0 %vm998_vm3, %v2770_v2 }
 0x63b   :  { %7930 = vmatprep.mubr.msk.f32.mxu0 %vm275_vm1, %v10071_v41  ;;  %v3654_v41 = vpop.permute.xlu1 %3653  ;;  %v8374_v30 = vpack.c.bf16 %v8722_v19, %v8721_v26  ;;  %v8368_v26 = vpack.c.bf16 %v8717_v48, %v8716_v25 }
 0x63c   :  { %v3656_v14 = vpop.permute.xlu0 %3655 }
 0x63d   :  { %8355 = vmatpush3.bf16.xpose.msk.msra.mxu0 %vm9360_vm2, %v8350_v22  ;;  %v8356_v22 = vpack.c.bf16 %v8707_v59, %v8706_v7 }
 0x63e   :  { %8754 = vrot.lane.b32.xlu1 %v9336_v63, %s9145_s26  ;;  %8364 = vmatprep.subr.msk.bf16.mxu0 %vm9360_vm2, %v8362_v10 }
 0x640   :  { %v10152_v51 = vpop.permute.xlu0 %3744 }
 0x642   :  { %8764 = vrot.lane.b32.xlu1 %v9302_v46, %s9145_s26 }
 0x644   :  { %7931 = vmatmul.mubr.msk.f32.vlgmr.msra.gmra.mrb[36].mxu0 %vm275_vm1, %v3474_v62  ;;  %v3836_v57 = vpop.permute.xlu0 %3835 }
 0x645   :  { %8367 = vmatpush3.bf16.xpose.msk.msra.mxu0 %vm9360_vm2, %v8362_v10  ;;  %7944 = vmatprep.mubr.msk.f32.mxu0 %vm275_vm1, %v3654_v41 }
 0x646   :  { %8376 = vmatprep.subr.msk.bf16.mxu0 %vm9360_vm2, %v8374_v30 }
 0x648   :  { %v3838_v50 = vpop.permute.xlu0 %3837 }
 0x64c   :  { %7945 = vmatmul.mubr.msk.f32.vlgmr.msra.gmra.mrb[38].mxu0 %vm275_vm1, %v3656_v14  ;;  %v10166_v9 = vpop.permute.xlu0 %8734 }
 0x64d   :  { %8379 = vmatpush3.bf16.xpose.msk.msra.mxu0 %vm9360_vm2, %v8374_v30  ;;  %7958 = vmatprep.mubr.msk.f32.mxu0 %vm275_vm1, %v3836_v57  ;;  %v8737_v59 = vunpack.i.h.bf16 %v10166_v9  ;;  %v8736_v7 = vunpack.i.l.bf16 %v10166_v9 }
 0x650   :  { %v4018_v17 = vpop.permute.xlu0 %4017 }
 0x654   :  { %7959 = vmatmul.mubr.msk.f32.vlgmr.msra.gmra.mrb[40].mxu0 %vm275_vm1, %v3838_v50  ;;  %v4109_v47 = vpop.permute.xlu0 %4108 }
 0x655   :  { %7972 = vmatprep.mubr.msk.f32.mxu0 %vm275_vm1, %v4018_v17 }
 0x658   :  { %v8740_v11 = vpop.permute.xlu0 %8739 }
 0x659   :  { %v8742_v1 = vunpack.i.h.bf16 %v8740_v11  ;;  %v8741_v2 = vunpack.i.l.bf16 %v8740_v11 }
 0x668   :  { %v2727_v62 = vpop.xlane.xlu1 %2726 }
 0x669   :  { %8980 = vrcp.f32 %v2727_v62 }
 0x66c   :  { %v2742_v43 = vpop.xlane.xlu1 %2741 }
 0x66d   :  { %8982 = vrcp.f32 %v2742_v43 }
 0x673   :  { %v8981_v45 = vpop.eup %8980 }
 0x674   :  { %v2764_v61 = vmul.f32 %v8981_v45, %v10051_v29 }
 0x676   :  { %7909 = vmatprep.mubr.msk.f32.mxu1 %vm998_vm3, %v2764_v61  ;;  %v8392_v61 = vpack.c.bf16 %v8737_v59, %v8736_v7 }
 0x677   :  { %7910 = vmatmul.mubr.msk.f32.vlgmr.msra.gmra.mrb[40].mxu1 %vm998_vm3, %v2766_v27  ;;  %v8983_v29 = vpop.eup %8982 }
 0x678   :  { %8349 = vmatpush3.bf16.msra.mxu1 %v8346_v58  ;;  %v2774_v19 = vmul.f32 %v8983_v29, %v10057_v13  ;;  %v8398_v13 = vpack.c.bf16 %v8742_v1, %v8741_v2 }
 0x679   :  { %8358 = vmatprep.subr.msk.bf16.mxu1 %vm9360_vm2, %v8356_v22 }
 0x699   :  { %v2739_v23 = vpop.xlane.xlu1 %2738 }
 0x69a   :  { %8984 = vrcp.f32 %v2739_v23 }
 0x69d   :  { %v8725_v24 = vpop.permute.xlu1 %8724 }
 0x69e   :  { %v8727_v49 = vunpack.i.h.bf16 %v8725_v24  ;;  %v8726_v57 = vunpack.i.l.bf16 %v8725_v24 }
 0x6a0   :  { %v8380_v38 = vpack.c.bf16 %v8727_v49, %v8726_v57 }
 0x6a1   :  { %v3747_v16 = vpop.permute.xlu1 %3746 }
 0x6a4   :  { %v8985_v6 = vpop.eup %8984 }
 0x6a5   :  { %v8730_v53 = vpop.permute.xlu1 %8729  ;;  %v2772_v58 = vmul.f32 %v8985_v6, %v10076_v28  ;;  %v8750_v28 = vpop.permute.xlu0 %8749 }
 0x6a6   :  { %v8732_v10 = vunpack.i.h.bf16 %v8730_v53  ;;  %v8731_v14 = vunpack.i.l.bf16 %v8730_v53  ;;  %v8752_v17 = vunpack.i.h.bf16 %v8750_v28  ;;  %v8751_v62 = vunpack.i.l.bf16 %v8750_v28 }
 0x6a7   :  { %7923 = vmatprep.mubr.msk.f32.mxu1 %vm998_vm3, %v2772_v58 }
 0x6a8   :  { %v8386_v41 = vpack.c.bf16 %v8732_v10, %v8731_v14  ;;  %7924 = vmatmul.mubr.msk.f32.vlgmr.msra.gmra.mrb[42].mxu1 %vm998_vm3, %v2774_v19  ;;  %v10204_v45 = vpack.c.bf16 %v8752_v17, %v8751_v62  ;;  %v10250_v19 = vld [vmem:[%s11114_s3 + $0x28] sm:$0xff] }
 0x6a9   :  { %8361 = vmatpush3.bf16.xpose.msk.msra.mxu1 %vm9360_vm2, %v8356_v22  ;;  %v3927_v30 = vpop.permute.xlu1 %3926  ;;  %7937 = vmatprep.mubr.msk.f32.mxu1 %vm275_vm1, %v10123_v21 }
 0x6aa   :  { %8370 = vmatprep.subr.msk.bf16.mxu1 %vm9360_vm2, %v8368_v26  ;;  %8388 = vmatprep.subr.msk.bf16.mxu0 %vm9360_vm2, %v8386_v41 }
 0x6ab   :  { %8391 = vmatpush3.bf16.xpose.msk.msra.mxu0 %vm9360_vm2, %v8386_v41 }
 0x6ac   :  { %8399 = vmatprep.subr.bf16.mxu0 %v8398_v13 }
 0x6ad   :  { %v3929_v50 = vpop.permute.xlu1 %3928 }
 0x6b0   :  { %7938 = vmatmul.mubr.msk.f32.vlgmr.msra.gmra.mrb[44].mxu1 %vm275_vm1, %v10146_v15 }
 0x6b1   :  { %8373 = vmatpush3.bf16.xpose.msk.msra.mxu1 %vm9360_vm2, %v8368_v26  ;;  %7951 = vmatprep.mubr.msk.f32.mxu1 %vm275_vm1, %v10152_v51  ;;  %v4020_v21 = vpop.permute.xlu1 %4019  ;;  %v10255_v26 = vld [vmem:[%s11114_s3 + $0x20] sm:$0xff] }
 0x6b2   :  { %8382 = vmatprep.subr.msk.bf16.mxu1 %vm9360_vm2, %v8380_v38  ;;  %7973 = vmatmul.mubr.msk.f32.vlgmr.msra.gmra.mrb[42].mxu0 %vm275_vm1, %v4020_v21 }
 0x6b3   :  { %8401 = vmatpush3.bf16.msra.mxu0 %v8398_v13 }
 0x6b4   :  { %8407 = vmatprep.subr.bf16.mxu0 %v10204_v45 }
 0x6b5   :  { %v4111_v15 = vpop.permute.xlu1 %4110 }
 0x6b8   :  { %7952 = vmatmul.mubr.msk.f32.vlgmr.msra.gmra.mrb[46].mxu1 %vm275_vm1, %v3747_v16 }
 0x6b9   :  { %8385 = vmatpush3.bf16.xpose.msk.msra.mxu1 %vm9360_vm2, %v8380_v38  ;;  %7965 = vmatprep.mubr.msk.f32.mxu1 %vm275_vm1, %v3927_v30  ;;  %v8745_v51 = vpop.permute.xlu1 %8744 }
 0x6ba   :  { %8394 = vmatprep.subr.msk.bf16.mxu1 %vm9360_vm2, %v8392_v61  ;;  %v8747_v27 = vunpack.i.h.bf16 %v8745_v51  ;;  %v8746_v22 = vunpack.i.l.bf16 %v8745_v51 }
 0x6bc   :  { %v8402_v9 = vpack.c.bf16 %v8747_v27, %v8746_v22 }
 0x6bd   :  { %v8755_v43 = vpop.permute.xlu1 %8754 }
 0x6be   :  { %v8757_v23 = vunpack.i.h.bf16 %v8755_v43  ;;  %v8756_v24 = vunpack.i.l.bf16 %v8755_v43 }
 0x6c0   :  { %7966 = vmatmul.mubr.msk.f32.vlgmr.msra.gmra.mrb[48].mxu1 %vm275_vm1, %v3929_v50  ;;  %v10220_v16 = vpack.c.bf16 %v8757_v23, %v8756_v24 }
 0x6c1   :  { %8397 = vmatpush3.bf16.xpose.msk.msra.mxu1 %vm9360_vm2, %v8392_v61  ;;  %7979 = vmatprep.mubr.msk.f32.mxu1 %vm275_vm1, %v4109_v47 }
 0x6c2   :  { %8403 = vmatprep.subr.bf16.mxu1 %v8402_v9 }
 0x6c8   :  { %7980 = vmatmul.mubr.msk.f32.vlgmr.msra.gmra.mrb[50].mxu1 %vm275_vm1, %v4111_v15 }
 0x6c9   :  { %8405 = vmatpush3.bf16.msra.mxu1 %v8402_v9 }
 0x6ca   :  { %8411 = vmatprep.subr.bf16.mxu1 %v10220_v16 }
 0x6e2   :  { %v10223_v11 = vpop.f32.mrb[28].mxu0 }
 0x6e3   :  { %11136 = vst [vmem:[#allocation21_spill] sm:$0xff] %v10223_v11  ;;  %v10225_v29 = vpop.f32.mrb[29].mxu0 }
 0x6e6   :  { %v10227_v6 = vpop.f32.mrb[30].mxu0 }
 0x6e7   :  { %11137 = vst [vmem:[#allocation22_spill] sm:$0xff] %v10227_v6  ;;  %v10229_v48 = vpop.f32.mrb[31].mxu0 }
 0x701   :  { %v10231_v25 = vpop.f32.mrb[36].mxu1 }
 0x702   :  { %11138 = vst [vmem:[#allocation23_spill] sm:$0xff] %v10231_v25  ;;  %v10233_v47 = vpop.f32.mrb[37].mxu1 }
 0x706   :  { %v10235_v1 = vpop.f32.mrb[32].mxu0 }
 0x707   :  { %11139 = vst [vmem:[#allocation24_spill] sm:$0xff] %v10235_v1  ;;  %v10237_v53 = vpop.f32.mrb[33].mxu0 }
 0x709   :  { %v10239_v58 = vpop.f32.mrb[38].mxu1 }
 0x70a   :  { %11140 = vst [vmem:[#allocation25_spill] sm:$0xff] %v10239_v58  ;;  %v10241_v2 = vpop.f32.mrb[39].mxu1 }
 0x70d   :  { %v10243_v10 = vpop.f32.mrb[34].mxu0 }
 0x70e   :  { %11141 = vst [vmem:[#allocation26_spill] sm:$0xff] %v10243_v10  ;;  %v10245_v14 = vpop.f32.mrb[35].mxu0 }
 0x70f   :  { %11142 = vst [vmem:[#allocation27_spill] sm:$0xff] %v10245_v14 }
 0x717   :  { %v7932_v41 = vpop.f32.mrb[36].mxu0 }
 0x718   :  { %v10258_v30 = vadd.f32 %v7932_v41, %v10250_v19  ;;  %v3553_v13 = vpop.f32.mrb[37].mxu0 }
 0x719   :  { %v10261_v28 = vadd.f32 %v3553_v13, %v10255_v26 }
 0x71a   :  { %v4202_v49 = vsel %vm998_vm3, %v10258_v30, -inf }
 0x71b   :  { %4203 = vmax.xlane.f32.xlu1 %v4202_v49  ;;  %v4199_v57 = vsel %vm998_vm3, %v10261_v28, -inf }
 0x71c   :  { %4200 = vmax.xlane.f32.xlu0 %v4199_v57 }
 0x71f   :  { %v7946_v50 = vpop.f32.mrb[38].mxu0 }
 0x720   :  { %v10268_v17 = vadd.f32 %v7946_v50, %v10250_v19  ;;  %v3735_v62 = vpop.f32.mrb[39].mxu0 }
 0x721   :  { %v10271_v38 = vadd.f32 %v3735_v62, %v10255_v26 }
 0x722   :  { %v4214_v21 = vsel %vm998_vm3, %v10268_v17, -inf }
 0x723   :  { %4215 = vmax.xlane.f32.xlu0 %v4214_v21  ;;  %v4211_v59 = vsel %vm998_vm3, %v10271_v38, -inf }
 0x727   :  { %v7960_v7 = vpop.f32.mrb[40].mxu0  ;;  %4212 = vmax.xlane.f32.xlu0 %v4211_v59 }
 0x728   :  { %v3917_v15 = vpop.f32.mrb[41].mxu0  ;;  %v10294_v57 = vadd.f32 %v7960_v7, %v10250_v19 }
 0x729   :  { %v10299_v62 = vadd.f32 %v3917_v15, %v10255_v26 }
 0x72a   :  { %v4226_v59 = vsel %vm998_vm3, %v10294_v57, -inf }
 0x72b   :  { %v4223_v15 = vsel %vm998_vm3, %v10299_v62, -inf }
 0x74a   :  { %v10277_v61 = vpop.f32.mrb[40].mxu1 }
 0x74b   :  { %11143 = vst [vmem:[#allocation28_spill] sm:$0xff] %v10277_v61  ;;  %v10279_v51 = vpop.f32.mrb[41].mxu1 }
 0x74c   :  { %11144 = vst [vmem:[#allocation29_spill] sm:$0xff] %v10279_v51 }
 0x77b   :  { %v10281_v27 = vpop.f32.mrb[42].mxu1 }
 0x77c   :  { %11145 = vst [vmem:[#allocation30_spill] sm:$0xff] %v10281_v27  ;;  %v10283_v22 = vpop.f32.mrb[43].mxu1 }
 0x77d   :  { %11146 = vst [vmem:[#allocation31_spill] sm:$0xff] %v10283_v22 }
 0x783   :  { %v7939_v9 = vpop.f32.mrb[44].mxu1 }
 0x784   :  { %v10286_v43 = vadd.f32 %v7939_v9, %v10250_v19  ;;  %v3644_v23 = vpop.f32.mrb[45].mxu1 }
 0x785   :  { %v10289_v24 = vadd.f32 %v3644_v23, %v10255_v26  ;;  %v7974_v41 = vpop.f32.mrb[42].mxu0 }
 0x786   :  { %v4208_v13 = vsel %vm998_vm3, %v10286_v43, -inf  ;;  %v4099_v49 = vpop.f32.mrb[43].mxu0 }
 0x787   :  { %4209 = vmax.xlane.f32.xlu1 %v4208_v13  ;;  %v4205_v50 = vsel %vm998_vm3, %v10289_v24, -inf  ;;  %v10317_v12 = vadd.f32 %v4099_v49, %v10255_v26 }
 0x788   :  { %4206 = vmax.xlane.f32.xlu0 %v4205_v50  ;;  %v10312_v50 = vadd.f32 %v7974_v41, %v10250_v19 }
 0x78b   :  { %v7953_v21 = vpop.f32.mrb[46].mxu1 }
 0x78c   :  { %v10304_v9 = vadd.f32 %v7953_v21, %v10250_v19  ;;  %v3826_v23 = vpop.f32.mrb[47].mxu1  ;;  %4227 = vmax.xlane.f32.xlu0 %v4226_v59 }
 0x78d   :  { %v10307_v7 = vadd.f32 %v3826_v23, %v10255_v26  ;;  %v4238_v23 = vsel %vm998_vm3, %v10312_v50, -inf }
 0x78e   :  { %v4220_v13 = vsel %vm998_vm3, %v10304_v9, -inf }
 0x78f   :  { %4221 = vmax.xlane.f32.xlu1 %v4220_v13  ;;  %v4217_v21 = vsel %vm998_vm3, %v10307_v7, -inf  ;;  %v4235_v13 = vsel %vm998_vm3, %v10317_v12, -inf }
 0x790   :  { %4224 = vmax.xlane.f32.xlu0 %v4223_v15 }
 0x793   :  { %v7967_v59 = vpop.f32.mrb[48].mxu1  ;;  %4218 = vmax.xlane.f32.xlu1 %v4217_v21 }
 0x794   :  { %v10324_v27 = vadd.f32 %v7967_v59, %v10250_v19  ;;  %v4008_v41 = vpop.f32.mrb[49].mxu1  ;;  %4239 = vmax.xlane.f32.xlu0 %v4238_v23 }
 0x795   :  { %v10335_v21 = vadd.f32 %v4008_v41, %v10255_v26  ;;  %v10354_v41 = vpop.permute.xlu1 %8764 }
 0x796   :  { %v4232_v49 = vsel %vm998_vm3, %v10324_v27, -inf }
 0x797   :  { %4236 = vmax.xlane.f32.xlu1 %v4235_v13  ;;  %v4229_v23 = vsel %vm998_vm3, %v10335_v21, -inf }
 0x798   :  { %4233 = vmax.xlane.f32.xlu0 %v4232_v49 }
 0x79b   :  { %v7981_v15 = vpop.f32.mrb[50].mxu1 }
 0x79c   :  { %v4190_v10 = vpop.f32.mrb[51].mxu1  ;;  %v10338_v59 = vadd.f32 %v7981_v15, %v10250_v19  ;;  %v10350_v19 = vpop.permute.xlu0 %8759 }
 0x79d   :  { %v10361_v11 = vadd.f32 %v4190_v10, %v10255_v26 }
 0x79e   :  { %v4244_v13 = vsel %vm998_vm3, %v10338_v59, -inf }
 0x7a8   :  { %8774 = vrot.lane.b32.xlu1 %v9340_v0, %s9145_s26  ;;  %v4204_v15 = vpop.xlane.xlu1 %4203 }
 0x7a9   :  { %v4201_v49 = vpop.xlane.xlu0 %4200 }
 0x7aa   :  { %v4247_v61 = vsub.f32 %v10261_v28, %v4201_v49 }
 0x7ac   :  { %v4263_v6 = vmul.f32 1.442695, %v4247_v61 }
 0x7ae   :  { %8769 = vrot.lane.b32.xlu0 %v9320_v55, %s9145_s26 }
 0x7cc   :  { %4230 = vmax.xlane.f32.xlu1 %v4229_v23  ;;  %v4216_v23 = vpop.xlane.xlu0 %4215 }
 0x7cd   :  { %4245 = vmax.xlane.f32.xlu0 %v4244_v13  ;;  %v4248_v13 = vsub.f32 %v10258_v30, %v4204_v15  ;;  %v4241_v30 = vsel %vm998_vm3, %v10361_v11, -inf }
 0x7cf   :  { %v4265_v1 = vmul.f32 1.442695, %v4248_v13 }
 0x7d0   :  { %v4213_v58 = vpop.xlane.xlu0 %4212 }
 0x7d1   :  { %8986 = vpow2.f32 %v4265_v1  ;;  %v4251_v25 = vsub.f32 %v10271_v38, %v4213_v58 }
 0x7d2   :  { %8988 = vpow2.f32 %v4263_v6 }
 0x7d3   :  { %v4271_v14 = vmul.f32 1.442695, %v4251_v25 }
 0x7db   :  { %v10363_v51 = vpop.eup %8986 }
 0x7dc   :  { %v10367_v28 = vpop.eup %8988  ;;  %v4298_v1 = vsel %vm998_vm3, %v10363_v51, 0.0 }
 0x7dd   :  { %8784 = vrot.lane.b32.xlu1 %v9298_v44, %s9146_s7  ;;  %v4295_v6 = vsel %vm998_vm3, %v10367_v28, 0.0 }
 0x7e1   :  { %5071 = vrot.lane.b32.xlu1 %v9275_v33, %s9147_s8  ;;  %v4252_v33 = vsub.f32 %v10268_v17, %v4216_v23 }
 0x7e3   :  { %8779 = vrot.lane.b32.xlu0 %v9273_v32, %s9146_s7  ;;  %v4273_v22 = vmul.f32 1.442695, %v4252_v33 }
 0x7e5   :  { %8990 = vpow2.f32 %v4273_v22 }
 0x7e6   :  { %8992 = vpow2.f32 %v4271_v14 }
 0x7e7   :  { %8789 = vrot.lane.b32.xlu0 %v9316_v54, %s9146_s7 }
 0x7ef   :  { %v10371_v17 = vpop.eup %8990 }
 0x7f0   :  { %v4310_v25 = vsel %vm998_vm3, %v10371_v17, 0.0  ;;  %v10377_v58 = vpop.eup %8992 }
 0x7f1   :  { %v4307_v10 = vsel %vm998_vm3, %v10377_v58, 0.0 }
 0x805   :  { %4242 = vmax.xlane.f32.xlu1 %v4241_v30 }
 0x806   :  { %4299 = vadd.xlane.f32.xlu0 %v4298_v1 }
 0x809   :  { %4296 = vadd.xlane.f32.xlu1 %v4295_v6 }
 0x80a   :  { %4311 = vadd.xlane.f32.xlu0 %v4310_v25 }
 0x80e   :  { %4308 = vadd.xlane.f32.xlu0 %v4307_v10 }
 0x814   :  { %v4210_v14 = vpop.xlane.xlu1 %4209 }
 0x815   :  { %v4250_v26 = vsub.f32 %v10286_v43, %v4210_v14  ;;  %v4207_v38 = vpop.xlane.xlu0 %4206 }
 0x816   :  { %v4249_v61 = vsub.f32 %v10289_v24, %v4207_v38 }
 0x817   :  { %v4269_v22 = vmul.f32 1.442695, %v4250_v26 }
 0x818   :  { %v4267_v49 = vmul.f32 1.442695, %v4249_v61 }
 0x819   :  { %8994 = vpow2.f32 %v4269_v22  ;;  %v4228_v15 = vpop.xlane.xlu0 %4227 }
 0x81a   :  { %v4256_v23 = vsub.f32 %v10294_v57, %v4228_v15  ;;  %8996 = vpow2.f32 %v4267_v49 }
 0x81c   :  { %v4281_v13 = vmul.f32 1.442695, %v4256_v23  ;;  %v4222_v33 = vpop.xlane.xlu1 %4221 }
 0x81d   :  { %v4254_v30 = vsub.f32 %v10304_v9, %v4222_v33  ;;  %v4225_v1 = vpop.xlane.xlu0 %4224 }
 0x81e   :  { %8998 = vpow2.f32 %v4281_v13  ;;  %v4255_v6 = vsub.f32 %v10299_v62, %v4225_v1 }
 0x81f   :  { %v4277_v25 = vmul.f32 1.442695, %v4254_v30 }
 0x820   :  { %v4279_v43 = vmul.f32 1.442695, %v4255_v6  ;;  %v4219_v10 = vpop.xlane.xlu1 %4218 }
 0x821   :  { %9000 = vpow2.f32 %v4277_v25  ;;  %v4253_v24 = vsub.f32 %v10307_v7, %v4219_v10  ;;  %v4240_v14 = vpop.xlane.xlu0 %4239 }
 0x822   :  { %9002 = vpow2.f32 %v4279_v43  ;;  %v4260_v26 = vsub.f32 %v10312_v50, %v4240_v14 }
 0x823   :  { %v10388_v57 = vpop.eup %8994  ;;  %v4275_v38 = vmul.f32 1.442695, %v4253_v24 }
 0x824   :  { %v4289_v61 = vmul.f32 1.442695, %v4260_v26  ;;  %v4237_v22 = vpop.xlane.xlu1 %4236  ;;  %v4304_v9 = vsel %vm998_vm3, %v10388_v57, 0.0  ;;  %v10392_v49 = vpop.eup %8996 }
 0x825   :  { %9004 = vpow2.f32 %v4275_v38  ;;  %v4259_v62 = vsub.f32 %v10317_v12, %v4237_v22  ;;  %4305 = vadd.xlane.f32.xlu1 %v4304_v9  ;;  %v4234_v15 = vpop.xlane.xlu0 %4233  ;;  %v4301_v33 = vsel %vm998_vm3, %v10392_v49, 0.0 }
 0x826   :  { %9006 = vpow2.f32 %v4289_v61  ;;  %v4258_v7 = vsub.f32 %v10324_v27, %v4234_v15 }
 0x827   :  { %v4287_v23 = vmul.f32 1.442695, %v4259_v62 }
 0x828   :  { %v10396_v50 = vpop.eup %8998  ;;  %v4285_v13 = vmul.f32 1.442695, %v4258_v7  ;;  %v10438_v22 = vpop.permute.xlu1 %8774 }
 0x829   :  { %9008 = vpow2.f32 %v4287_v23  ;;  %4302 = vadd.xlane.f32.xlu1 %v4301_v33  ;;  %v4322_v30 = vsel %vm998_vm3, %v10396_v50, 0.0  ;;  %v8770_v9 = vpop.permute.xlu0 %8769 }
 0x82a   :  { %9010 = vpow2.f32 %v4285_v13  ;;  %4323 = vadd.xlane.f32.xlu0 %v4322_v30 }
 0x82b   :  { %v10402_v12 = vpop.eup %9000 }
 0x82c   :  { %v10404_v1 = vpop.eup %9002  ;;  %v4316_v27 = vsel %vm998_vm3, %v10402_v12, 0.0 }
 0x82d   :  { %4317 = vadd.xlane.f32.xlu1 %v4316_v27  ;;  %v4319_v6 = vsel %vm998_vm3, %v10404_v1, 0.0 }
 0x82e   :  { %4320 = vadd.xlane.f32.xlu0 %v4319_v6 }
 0x82f   :  { %v10410_v25 = vpop.eup %9004 }
 0x830   :  { %v10412_v43 = vpop.eup %9006  ;;  %v4313_v10 = vsel %vm998_vm3, %v10410_v25, 0.0 }
 0x831   :  { %4314 = vadd.xlane.f32.xlu1 %v4313_v10  ;;  %v4334_v24 = vsel %vm998_vm3, %v10412_v43, 0.0 }
 0x832   :  { %4335 = vadd.xlane.f32.xlu0 %v4334_v24 }
 0x833   :  { %v10418_v14 = vpop.eup %9008 }
 0x834   :  { %v10420_v26 = vpop.eup %9010  ;;  %v4331_v38 = vsel %vm998_vm3, %v10418_v14, 0.0 }
 0x835   :  { %4332 = vadd.xlane.f32.xlu1 %v4331_v38  ;;  %v4328_v61 = vsel %vm998_vm3, %v10420_v26, 0.0 }
 0x836   :  { %4329 = vadd.xlane.f32.xlu0 %v4328_v61  ;;  %v8762_v61 = vunpack.i.h.bf16 %v10350_v19 }
 0x846   :  { %8794 = vrot.lane.b32.xlu1 %v9336_v63, %s9146_s7 }
 0x84a   :  { %5164 = vrot.lane.b32.xlu1 %v9391_v31, %s9147_s8 }
 0x84c   :  { %5073 = vrot.lane.b32.xlu0 %v9371_v18, %s9147_s8 }
 0x84e   :  { %5253 = vrot.lane.b32.xlu1 %v9399_v40, %s9147_s8 }
 0x850   :  { %5162 = vrot.lane.b32.xlu0 %v9374_v20, %s9147_s8 }
 0x854   :  { %8799 = vrot.lane.b32.xlu0 %v9280_v36, %s9146_s7 }
 0x858   :  { %5255 = vrot.lane.b32.xlu0 %v9417_v52, %s9147_s8 }
 0x859   :  { %v4231_v62 = vpop.xlane.xlu1 %4230 }
 0x85a   :  { %v4257_v31 = vsub.f32 %v10335_v21, %v4231_v62  ;;  %v4246_v18 = vpop.xlane.xlu0 %4245  ;;  %v8761_v62 = vunpack.i.l.bf16 %v10350_v19 }
 0x85b   :  { %v4262_v15 = vsub.f32 %v10338_v59, %v4246_v18 }
 0x85c   :  { %5344 = vrot.lane.b32.xlu0 %v9427_v60, %s9147_s8  ;;  %v4283_v40 = vmul.f32 1.442695, %v4257_v31 }
 0x85d   :  { %v4293_v20 = vmul.f32 1.442695, %v4262_v15  ;;  %v10464_v59 = vpop.permute.xlu1 %8784 }
 0x85e   :  { %9012 = vpow2.f32 %v4283_v40 }
 0x85f   :  { %9014 = vpow2.f32 %v4293_v20  ;;  %v8772_v20 = vunpack.i.h.bf16 %v8770_v9 }
 0x860   :  { %8809 = vrot.lane.b32.xlu0 %v9320_v55, %s9146_s7 }
 0x864   :  { %5437 = vrot.lane.b32.xlu0 %v9394_v34, %s9147_s8 }
 0x868   :  { %5526 = vrot.lane.b32.xlu0 %v9442_v5, %s9147_s8  ;;  %v10454_v52 = vpop.eup %9012  ;;  %v10466_v5 = vpop.permute.xlu0 %8779 }
 0x869   :  { %v4325_v60 = vsel %vm998_vm3, %v10454_v52, 0.0  ;;  %v10460_v21 = vpop.eup %9014 }
 0x86a   :  { %v4340_v34 = vsel %vm998_vm3, %v10460_v21, 0.0 }
 0x86c   :  { %5617 = vrot.lane.b32.xlu0 %v9406_v37, %s9147_s8  ;;  %v10468_v37 = vpop.permute.xlu1 %5071  ;;  %v10470_v7 = vpop.permute.xlu0 %8789 }
 0x870   :  { %5708 = vrot.lane.b32.xlu0 %v9458_v42, %s9147_s8 }
 0x872   :  { %4326 = vadd.xlane.f32.xlu1 %v4325_v60  ;;  %v8771_v60 = vunpack.i.l.bf16 %v8770_v9 }
 0x876   :  { %4341 = vadd.xlane.f32.xlu1 %v4340_v34  ;;  %v8414_v34 = vpack.c.bf16 %v8762_v61, %v8761_v62 }
 0x892   :  { %v4243_v23 = vpop.xlane.xlu1 %4242 }
 0x893   :  { %v4261_v42 = vsub.f32 %v10361_v11, %v4243_v23  ;;  %v4300_v13 = vpop.xlane.xlu0 %4299 }
 0x894   :  { %9016 = vrcp.f32 %v4300_v13 }
 0x895   :  { %v4291_v33 = vmul.f32 1.442695, %v4261_v42 }
 0x896   :  { %v4297_v30 = vpop.xlane.xlu1 %4296 }
 0x897   :  { %9018 = vpow2.f32 %v4291_v33  ;;  %v4312_v27 = vpop.xlane.xlu0 %4311 }
 0x898   :  { %9020 = vrcp.f32 %v4297_v30 }
 0x899   :  { %9022 = vrcp.f32 %v4312_v27  ;;  %v8767_v27 = vunpack.i.h.bf16 %v10354_v41 }
 0x89b   :  { %v4309_v6 = vpop.xlane.xlu0 %4308 }
 0x89c   :  { %9024 = vrcp.f32 %v4309_v6 }
 0x89e   :  { %v9017_v10 = vpop.eup %9016 }
 0x89f   :  { %v4346_v18 = vmul.f32 %v9017_v10, %v10363_v51  ;;  %v8422_v51 = vpack.c.bf16 %v8772_v20, %v8771_v60  ;;  %v8776_v20 = vunpack.i.l.bf16 %v10438_v22 }
 0x8a1   :  { %v10473_v24 = vpop.eup %9018 }
 0x8a2   :  { %v9021_v38 = vpop.eup %9020  ;;  %v4337_v11 = vsel %vm998_vm3, %v10473_v24, 0.0 }
 0x8a3   :  { %4338 = vadd.xlane.f32.xlu1 %v4337_v11  ;;  %v4344_v31 = vmul.f32 %v9021_v38, %v10367_v28  ;;  %v9023_v40 = vpop.eup %9022 }
 0x8a4   :  { %v4354_v23 = vmul.f32 %v9023_v40, %v10371_v17 }
 0x8a5   :  { %7986 = vmatprep.mubr.msk.f32.mxu0 %vm998_vm3, %v4344_v31  ;;  %v8781_v31 = vunpack.i.l.bf16 %v10466_v5 }
 0x8a6   :  { %v9025_v15 = vpop.eup %9024  ;;  %7987 = vmatmul.mubr.msk.f32.vlgmr.msra.gmra.mrb[44].mxu0 %vm998_vm3, %v4346_v18 }
 0x8a7   :  { %8409 = vmatpush3.bf16.msra.mxu0 %v10204_v45  ;;  %v4352_v19 = vmul.f32 %v9025_v15, %v10377_v58  ;;  %v8777_v15 = vunpack.i.h.bf16 %v10438_v22 }
 0x8a8   :  { %8415 = vmatprep.subr.bf16.mxu0 %v8414_v34 }
 0x8a9   :  { %8000 = vmatprep.mubr.msk.f32.mxu0 %vm998_vm3, %v4352_v19  ;;  %v8426_v22 = vpack.c.bf16 %v8777_v15, %v8776_v20 }
 0x8aa   :  { %8001 = vmatmul.mubr.msk.f32.vlgmr.msra.gmra.mrb[46].mxu0 %vm998_vm3, %v4354_v23 }
 0x8ab   :  { %8417 = vmatpush3.bf16.msra.mxu0 %v8414_v34  ;;  %v8792_v34 = vunpack.i.h.bf16 %v10470_v7 }
 0x8ac   :  { %8423 = vmatprep.subr.bf16.mxu0 %v8422_v51 }
 0x8b2   :  { %v4306_v28 = vpop.xlane.xlu1 %4305 }
 0x8b3   :  { %9026 = vrcp.f32 %v4306_v28 }
 0x8b4   :  { %8804 = vrot.lane.b32.xlu1 %v9302_v46, %s9146_s7 }
 0x8b6   :  { %v4303_v9 = vpop.xlane.xlu1 %4302 }
 0x8b7   :  { %9028 = vrcp.f32 %v4303_v9  ;;  %v4324_v45 = vpop.xlane.xlu0 %4323 }
 0x8b8   :  { %5346 = vrot.lane.b32.xlu1 %v9439_v3, %s9147_s8  ;;  %9030 = vrcp.f32 %v4324_v45  ;;  %v8766_v3 = vunpack.i.l.bf16 %v10354_v41  ;;  %v8782_v41 = vunpack.i.h.bf16 %v10466_v5 }
 0x8ba   :  { %v4318_v58 = vpop.xlane.xlu1 %4317  ;;  %v8418_v62 = vpack.c.bf16 %v8767_v27, %v8766_v3  ;;  %v8430_v5 = vpack.c.bf16 %v8782_v41, %v8781_v31  ;;  %v8787_v27 = vunpack.i.h.bf16 %v10464_v59  ;;  %v8786_v3 = vunpack.i.l.bf16 %v10464_v59 }
 0x8bb   :  { %v4321_v17 = vpop.xlane.xlu0 %4320 }
 0x8bc   :  { %9032 = vrcp.f32 %v4321_v17  ;;  %5435 = vrot.lane.b32.xlu1 %v9277_v35, %s9147_s8 }
 0x8bd   :  { %9034 = vrcp.f32 %v4318_v58  ;;  %v9027_v33 = vpop.eup %9026 }
 0x8be   :  { %v4315_v42 = vpop.xlane.xlu1 %4314  ;;  %v4350_v35 = vmul.f32 %v9027_v33, %v10388_v57 }
 0x8bf   :  { %9036 = vrcp.f32 %v4315_v42  ;;  %v4336_v13 = vpop.xlane.xlu0 %4335 }
 0x8c0   :  { %8814 = vrot.lane.b32.xlu1 %v9340_v0, %s9146_s7  ;;  %9038 = vrcp.f32 %v4336_v13 }
 0x8c1   :  { %v9029_v30 = vpop.eup %9028 }
 0x8c2   :  { %v4333_v6 = vpop.xlane.xlu1 %4332  ;;  %v4348_v10 = vmul.f32 %v9029_v30, %v10392_v49  ;;  %v9031_v61 = vpop.eup %9030 }
 0x8c3   :  { %9040 = vrcp.f32 %v4333_v6  ;;  %v10499_v38 = vpop.xlane.xlu0 %4329 }
 0x8c4   :  { %7993 = vmatprep.mubr.msk.f32.mxu1 %vm998_vm3, %v4348_v10  ;;  %5528 = vrot.lane.b32.xlu1 %v9455_v8, %s9147_s8  ;;  %v4362_v8 = vmul.f32 %v9031_v61, %v10396_v50  ;;  %9042 = vrcp.f32 %v10499_v38 }
 0x8c5   :  { %7994 = vmatmul.mubr.msk.f32.vlgmr.msra.gmra.mrb[52].mxu1 %vm998_vm3, %v4350_v35  ;;  %v8436_v35 = vpack.c.bf16 %v8787_v27, %v8786_v3 }
 0x8c6   :  { %v9033_v11 = vpop.eup %9032  ;;  %8413 = vmatpush3.bf16.msra.mxu1 %v10220_v16  ;;  %v10530_v19 = vpop.permute.xlu1 %8794 }
 0x8c7   :  { %8419 = vmatprep.subr.bf16.mxu1 %v8418_v62  ;;  %v5074_v49 = vpop.permute.xlu0 %5073  ;;  %v4360_v57 = vmul.f32 %v9033_v11, %v10404_v1  ;;  %v9035_v18 = vpop.eup %9034 }
 0x8c8   :  { %5619 = vrot.lane.b32.xlu1 %v9420_v56, %s9147_s8  ;;  %v4358_v60 = vmul.f32 %v9035_v18, %v10402_v12  ;;  %v8791_v12 = vunpack.i.l.bf16 %v10470_v7 }
 0x8c9   :  { %v9037_v40 = vpop.eup %9036  ;;  %8014 = vmatprep.mubr.msk.f32.mxu0 %vm998_vm3, %v4360_v57 }
 0x8ca   :  { %8015 = vmatmul.mubr.msk.f32.vlgmr.msra.gmra.mrb[48].mxu0 %vm998_vm3, %v4362_v8  ;;  %v4356_v16 = vmul.f32 %v9037_v40, %v10410_v25  ;;  %v9039_v56 = vpop.eup %9038  ;;  %v10541_v7 = vpop.permute.xlu1 %5164 }
 0x8cb   :  { %8425 = vmatpush3.bf16.msra.mxu0 %v8422_v51  ;;  %v10518_v1 = vpop.permute.xlu0 %5162  ;;  %v4370_v51 = vmul.f32 %v9039_v56, %v10412_v43 }
 0x8cc   :  { %8432 = vmatprep.subr.msk.bf16.mxu0 %vm9360_vm2, %v8430_v5  ;;  %8007 = vmatprep.mubr.msk.f32.mxu1 %vm998_vm3, %v4356_v16 }
 0x8cd   :  { %v9041_v50 = vpop.eup %9040  ;;  %5710 = vrot.lane.b32.xlu1 %v9467_v39, %s9147_s8  ;;  %8008 = vmatmul.mubr.msk.f32.vlgmr.msra.gmra.mrb[54].mxu1 %vm998_vm3, %v4358_v60  ;;  %v8442_v39 = vpack.c.bf16 %v8792_v34, %v8791_v12 }
 0x8ce   :  { %8421 = vmatpush3.bf16.msra.mxu1 %v8418_v62  ;;  %v4368_v25 = vmul.f32 %v9041_v50, %v10418_v14  ;;  %v5254_v45 = vpop.permute.xlu1 %5253  ;;  %v9043_v33 = vpop.eup %9042 }
 0x8cf   :  { %8427 = vmatprep.subr.bf16.mxu1 %v8426_v22  ;;  %v8800_v23 = vpop.permute.xlu0 %8799  ;;  %v4366_v10 = vmul.f32 %v9043_v33, %v10420_v26  ;;  %v8797_v26 = vunpack.i.h.bf16 %v10530_v19 }
 0x8d0   :  { %8028 = vmatprep.mubr.msk.f32.mxu0 %vm998_vm3, %v4368_v25  ;;  %v8802_v43 = vunpack.i.h.bf16 %v8800_v23  ;;  %v8801_v28 = vunpack.i.l.bf16 %v8800_v23 }
 0x8d1   :  { %8819 = vrot.lane.b32.xlu1 %v9273_v32, %s9148_s1  ;;  %8029 = vmatmul.mubr.msk.f32.vlgmr.msra.gmra.mrb[50].mxu0 %vm998_vm3, %v4370_v51 }
 0x8d2   :  { %8042 = vmatprep.mubr.msk.f32.mxu0 %vm275_vm1, %v10468_v37  ;;  %v8454_v32 = vpack.c.bf16 %v8802_v43, %v8801_v28 }
 0x8d3   :  { %v5256_v14 = vpop.permute.xlu0 %5255 }
 0x8d4   :  { %8435 = vmatpush3.bf16.xpose.msk.msra.mxu0 %vm9360_vm2, %v8430_v5 }
 0x8d5   :  { %8444 = vmatprep.subr.msk.bf16.mxu0 %vm9360_vm2, %v8442_v39 }
 0x8d7   :  { %v5345_v9 = vpop.permute.xlu0 %5344 }
 0x8db   :  { %8043 = vmatmul.mubr.msk.f32.vlgmr.msra.gmra.mrb[52].mxu0 %vm275_vm1, %v5074_v49  ;;  %v8810_v58 = vpop.permute.xlu0 %8809  ;;  %v8796_v49 = vunpack.i.l.bf16 %v10530_v19 }
 0x8dc   :  { %8447 = vmatpush3.bf16.xpose.msk.msra.mxu0 %vm9360_vm2, %v8442_v39  ;;  %8056 = vmatprep.mubr.msk.f32.mxu0 %vm275_vm1, %v5254_v45  ;;  %v8812_v37 = vunpack.i.h.bf16 %v8810_v58  ;;  %v8811_v17 = vunpack.i.l.bf16 %v8810_v58 }
 0x8dd   :  { %8456 = vmatprep.subr.msk.bf16.mxu0 %vm9360_vm2, %v8454_v32  ;;  %v8448_v40 = vpack.c.bf16 %v8797_v26, %v8796_v49 }
 0x8de   :  { %v8466_v42 = vpack.c.bf16 %v8812_v37, %v8811_v17  ;;  %v10628_v17 = vld [vmem:[%s11114_s3 + $0x38] sm:$0xff] }
 0x8df   :  { %v5438_v62 = vpop.permute.xlu0 %5437 }
 0x8e3   :  { %8057 = vmatmul.mubr.msk.f32.vlgmr.msra.gmra.mrb[54].mxu0 %vm275_vm1, %v5256_v14  ;;  %v5527_v41 = vpop.permute.xlu0 %5526 }
 0x8e4   :  { %8459 = vmatpush3.bf16.xpose.msk.msra.mxu0 %vm9360_vm2, %v8454_v32 }
 0x8e5   :  { %8468 = vmatprep.subr.msk.bf16.mxu0 %vm9360_vm2, %v8466_v42 }
 0x8e7   :  { %v5618_v15 = vpop.permute.xlu0 %5617 }
 0x8eb   :  { %v5709_v23 = vpop.permute.xlu0 %5708 }
 0x8ff   :  { %v4327_v13 = vpop.xlane.xlu1 %4326 }
 0x900   :  { %9044 = vrcp.f32 %v4327_v13 }
 0x903   :  { %v4342_v38 = vpop.xlane.xlu1 %4341 }
 0x904   :  { %9046 = vrcp.f32 %v4342_v38 }
 0x90a   :  { %v9045_v30 = vpop.eup %9044 }
 0x90b   :  { %v4364_v6 = vmul.f32 %v9045_v30, %v10454_v52 }
 0x90d   :  { %8021 = vmatprep.mubr.msk.f32.mxu1 %vm998_vm3, %v4364_v6 }
 0x90e   :  { %8022 = vmatmul.mubr.msk.f32.vlgmr.msra.gmra.mrb[56].mxu1 %vm998_vm3, %v4366_v10  ;;  %v9047_v52 = vpop.eup %9046 }
 0x90f   :  { %8429 = vmatpush3.bf16.msra.mxu1 %v8426_v22  ;;  %v4374_v8 = vmul.f32 %v9047_v52, %v10460_v21 }
 0x910   :  { %8438 = vmatprep.subr.msk.bf16.mxu1 %vm9360_vm2, %v8436_v35 }
 0x930   :  { %v4339_v61 = vpop.xlane.xlu1 %4338 }
 0x931   :  { %9048 = vrcp.f32 %v4339_v61 }
 0x934   :  { %v8805_v11 = vpop.permute.xlu1 %8804 }
 0x935   :  { %v8807_v21 = vunpack.i.h.bf16 %v8805_v11  ;;  %v8806_v20 = vunpack.i.l.bf16 %v8805_v11 }
 0x937   :  { %v8460_v16 = vpack.c.bf16 %v8807_v21, %v8806_v20 }
 0x938   :  { %v5347_v59 = vpop.permute.xlu1 %5346 }
 0x93b   :  { %v9049_v31 = vpop.eup %9048 }
 0x93c   :  { %v5436_v57 = vpop.permute.xlu1 %5435  ;;  %v4372_v18 = vmul.f32 %v9049_v31, %v10473_v24 }
 0x93d   :  { %8070 = vmatprep.mubr.msk.f32.mxu0 %vm275_vm1, %v5436_v57 }
 0x93e   :  { %8035 = vmatprep.mubr.msk.f32.mxu1 %vm998_vm3, %v4372_v18  ;;  %8071 = vmatmul.mubr.msk.f32.vlgmr.msra.gmra.mrb[56].mxu0 %vm275_vm1, %v5438_v62 }
 0x93f   :  { %8471 = vmatpush3.bf16.xpose.msk.msra.mxu0 %vm9360_vm2, %v8466_v42  ;;  %8036 = vmatmul.mubr.msk.f32.vlgmr.msra.gmra.mrb[58].mxu1 %vm998_vm3, %v4374_v8  ;;  %v10633_v42 = vld [vmem:[%s11114_s3 + $0x30] sm:$0xff]  ;;  %s9149_s3 = smov 8  }
 0x940   :  { %8441 = vmatpush3.bf16.xpose.msk.msra.mxu1 %vm9360_vm2, %v8436_v35  ;;  %8084 = vmatprep.mubr.msk.f32.mxu0 %vm275_vm1, %v5618_v15  ;;  %v8815_v24 = vpop.permute.xlu1 %8814 }
 0x941   :  { %8049 = vmatprep.mubr.msk.f32.mxu1 %vm275_vm1, %v10518_v1  ;;  %8450 = vmatprep.subr.msk.bf16.mxu1 %vm9360_vm2, %v8448_v40  ;;  %v8817_v1 = vunpack.i.h.bf16 %v8815_v24  ;;  %v8816_v56 = vunpack.i.l.bf16 %v8815_v24 }
 0x943   :  { %v8472_v22 = vpack.c.bf16 %v8817_v1, %v8816_v56 }
 0x944   :  { %v5529_v5 = vpop.permute.xlu1 %5528 }
 0x947   :  { %8050 = vmatmul.mubr.msk.f32.vlgmr.msra.gmra.mrb[60].mxu1 %vm275_vm1, %v10541_v7 }
 0x948   :  { %8453 = vmatpush3.bf16.xpose.msk.msra.mxu1 %vm9360_vm2, %v8448_v40  ;;  %8063 = vmatprep.mubr.msk.f32.mxu1 %vm275_vm1, %v5345_v9  ;;  %v5620_v60 = vpop.permute.xlu1 %5619 }
 0x949   :  { %8462 = vmatprep.subr.msk.bf16.mxu1 %vm9360_vm2, %v8460_v16  ;;  %8085 = vmatmul.mubr.msk.f32.vlgmr.msra.gmra.mrb[58].mxu0 %vm275_vm1, %v5620_v60 }
 0x94c   :  { %v5711_v50 = vpop.permute.xlu1 %5710 }
 0x94f   :  { %8064 = vmatmul.mubr.msk.f32.vlgmr.msra.gmra.mrb[62].mxu1 %vm275_vm1, %v5347_v59 }
 0x950   :  { %8465 = vmatpush3.bf16.xpose.msk.msra.mxu1 %vm9360_vm2, %v8460_v16  ;;  %8077 = vmatprep.mubr.msk.f32.mxu1 %vm275_vm1, %v5527_v41  ;;  %v8820_v25 = vpop.permute.xlu1 %8819 }
 0x951   :  { %v8822_v34 = vunpack.i.h.bf16 %v8820_v25  ;;  %v8821_v12 = vunpack.i.l.bf16 %v8820_v25  ;;  %8474 = vmatprep.subr.msk.bf16.mxu1 %vm9360_vm2, %v8472_v22 }
 0x953   :  { %v8478_v19 = vpack.c.bf16 %v8822_v34, %v8821_v12 }
 0x955   :  { %8479 = vmatprep.subr.bf16.mxu0 %v8478_v19 }
 0x956   :  { %8481 = vmatpush3.bf16.msra.mxu0 %v8478_v19 }
 0x957   :  { %8078 = vmatmul.mubr.msk.f32.vlgmr.msra.gmra.mrb[64].mxu1 %vm275_vm1, %v5529_v5 }
 0x958   :  { %8477 = vmatpush3.bf16.xpose.msk.msra.mxu1 %vm9360_vm2, %v8472_v22  ;;  %8091 = vmatprep.mubr.msk.f32.mxu1 %vm275_vm1, %v5709_v23 }
 0x95f   :  { %8092 = vmatmul.mubr.msk.f32.vlgmr.msra.gmra.mrb[66].mxu1 %vm275_vm1, %v5711_v50 }
 0x979   :  { %v10601_v51 = vpop.f32.mrb[44].mxu0 }
 0x97a   :  { %v10603_v39 = vpop.f32.mrb[45].mxu0 }
 0x97d   :  { %v10605_v14 = vpop.f32.mrb[46].mxu0 }
 0x97e   :  { %v10607_v7 = vpop.f32.mrb[47].mxu0 }
 0x998   :  { %v10609_v43 = vpop.f32.mrb[52].mxu1 }
 0x999   :  { %v10611_v28 = vpop.f32.mrb[53].mxu1 }
 0x99d   :  { %v10613_v9 = vpop.f32.mrb[48].mxu0 }
 0x99e   :  { %v10615_v4 = vpop.f32.mrb[49].mxu0 }
 0x9a0   :  { %v10617_v45 = vpop.f32.mrb[54].mxu1 }
 0x9a1   :  { %v10619_v32 = vpop.f32.mrb[55].mxu1 }
 0x9a4   :  { %v10621_v58 = vpop.f32.mrb[50].mxu0 }
 0x9a5   :  { %v10623_v37 = vpop.f32.mrb[51].mxu0 }
 0x9ae   :  { %v8044_v13 = vpop.f32.mrb[52].mxu0 }
 0x9af   :  { %v10636_v33 = vadd.f32 %v8044_v13, %v10628_v17  ;;  %v5153_v30 = vpop.f32.mrb[53].mxu0 }
 0x9b0   :  { %v10639_v27 = vadd.f32 %v5153_v30, %v10633_v42 }
 0x9b1   :  { %v5802_v3 = vsel %vm998_vm3, %v10636_v33, -inf }
 0x9b2   :  { %5803 = vmax.xlane.f32.xlu1 %v5802_v3  ;;  %v5799_v6 = vsel %vm998_vm3, %v10639_v27, -inf }
 0x9b3   :  { %5800 = vmax.xlane.f32.xlu0 %v5799_v6 }
 0x9b6   :  { %v8058_v10 = vpop.f32.mrb[54].mxu0 }
 0x9b7   :  { %v10646_v35 = vadd.f32 %v8058_v10, %v10628_v17  ;;  %v5335_v38 = vpop.f32.mrb[55].mxu0 }
 0x9b8   :  { %v10649_v61 = vadd.f32 %v5335_v38, %v10633_v42 }
 0x9b9   :  { %v5814_v62 = vsel %vm998_vm3, %v10646_v35, -inf }
 0x9ba   :  { %5815 = vmax.xlane.f32.xlu0 %v5814_v62  ;;  %v5811_v11 = vsel %vm998_vm3, %v10649_v61, -inf }
 0x9bb   :  { %5812 = vmax.xlane.f32.xlu1 %v5811_v11 }
 0x9e1   :  { %v10655_v59 = vpop.f32.mrb[56].mxu1 }
 0x9e2   :  { %v10657_v41 = vpop.f32.mrb[57].mxu1 }
 0xa11   :  { %v8072_v52 = vpop.f32.mrb[56].mxu0 }
 0xa12   :  { %v10659_v31 = vpop.f32.mrb[58].mxu1  ;;  %v5517_v26 = vpop.f32.mrb[57].mxu0  ;;  %v10677_v16 = vadd.f32 %v8072_v52, %v10628_v17 }
 0xa13   :  { %v10662_v49 = vadd.f32 %v5517_v26, %v10633_v42  ;;  %v10664_v57 = vpop.f32.mrb[59].mxu1 }
 0xa14   :  { %v5826_v25 = vsel %vm998_vm3, %v10677_v16, -inf }
 0xa15   :  { %v5823_v18 = vsel %vm998_vm3, %v10662_v49, -inf }
 0xa16   :  { %5824 = vmax.xlane.f32.xlu1 %v5823_v18 }
 0xa1a   :  { %v8051_v8 = vpop.f32.mrb[60].mxu1 }
 0xa1b   :  { %v10669_v40 = vadd.f32 %v8051_v8, %v10628_v17  ;;  %v5244_v15 = vpop.f32.mrb[61].mxu1 }
 0xa1c   :  { %v8086_v24 = vpop.f32.mrb[58].mxu0  ;;  %v10672_v21 = vadd.f32 %v5244_v15, %v10633_v42 }
 0xa1d   :  { %v5699_v20 = vpop.f32.mrb[59].mxu0  ;;  %v5808_v5 = vsel %vm998_vm3, %v10669_v40, -inf  ;;  %v10695_v19 = vadd.f32 %v8086_v24, %v10628_v17 }
 0xa1e   :  { %5809 = vmax.xlane.f32.xlu0 %v5808_v5  ;;  %v5805_v60 = vsel %vm998_vm3, %v10672_v21, -inf  ;;  %v10690_v34 = vadd.f32 %v5699_v20, %v10633_v42 }
 0xa1f   :  { %v5838_v38 = vsel %vm998_vm3, %v10695_v19, -inf }
 0xa20   :  { %v5835_v30 = vsel %vm998_vm3, %v10690_v34, -inf }
 0xa22   :  { %v8065_v1 = vpop.f32.mrb[62].mxu1  ;;  %5806 = vmax.xlane.f32.xlu0 %v5805_v60 }
 0xa23   :  { %v5426_v56 = vpop.f32.mrb[63].mxu1  ;;  %v10685_v22 = vadd.f32 %v8065_v1, %v10628_v17 }
 0xa24   :  { %v10682_v50 = vadd.f32 %v5426_v56, %v10633_v42 }
 0xa25   :  { %v5820_v23 = vsel %vm998_vm3, %v10685_v22, -inf }
 0xa26   :  { %5827 = vmax.xlane.f32.xlu0 %v5826_v25  ;;  %v5817_v12 = vsel %vm998_vm3, %v10682_v50, -inf }
 0xa27   :  { %5818 = vmax.xlane.f32.xlu1 %v5817_v12 }
 0xa2a   :  { %v8079_v13 = vpop.f32.mrb[64].mxu1  ;;  %5821 = vmax.xlane.f32.xlu0 %v5820_v23 }
 0xa2b   :  { %v5608_v3 = vpop.f32.mrb[65].mxu1  ;;  %5836 = vmax.xlane.f32.xlu1 %v5835_v30  ;;  %v10705_v10 = vadd.f32 %v8079_v13, %v10628_v17 }
 0xa2c   :  { %v10702_v6 = vadd.f32 %v5608_v3, %v10633_v42 }
 0xa2d   :  { %v5832_v11 = vsel %vm998_vm3, %v10705_v10, -inf }
 0xa2e   :  { %5839 = vmax.xlane.f32.xlu0 %v5838_v38  ;;  %v5829_v62 = vsel %vm998_vm3, %v10702_v6, -inf }
 0xa2f   :  { %5830 = vmax.xlane.f32.xlu1 %v5829_v62 }
 0xa32   :  { %v8093_v52 = vpop.f32.mrb[66].mxu1  ;;  %5833 = vmax.xlane.f32.xlu0 %v5832_v11 }
 0xa33   :  { %v10714_v26 = vadd.f32 %v8093_v52, %v10628_v17  ;;  %v5790_v18 = vpop.f32.mrb[67].mxu1 }
 0xa35   :  { %v5844_v8 = vsel %vm998_vm3, %v10714_v26, -inf }
 0xa36   :  { %5845 = vmax.xlane.f32.xlu0 %v5844_v8 }
 0xa3f   :  { %v5804_v15 = vpop.xlane.xlu1 %5803 }
 0xa40   :  { %8829 = vrot.lane.b32.xlu1 %v9316_v54, %s9148_s1  ;;  %v5801_v24 = vpop.xlane.xlu0 %5800  ;;  %v5848_v60 = vsub.f32 %v10636_v33, %v5804_v15 }
 0xa41   :  { %v5847_v20 = vsub.f32 %v10639_v27, %v5801_v24 }
 0xa42   :  { %v5865_v25 = vmul.f32 1.442695, %v5848_v60 }
 0xa43   :  { %v5863_v17 = vmul.f32 1.442695, %v5847_v20 }
 0xa45   :  { %9050 = vpow2.f32 %v5863_v17 }
 0xa46   :  { %9052 = vpow2.f32 %v5865_v25 }
 0xa47   :  { %v5816_v1 = vpop.xlane.xlu0 %5815 }
 0xa48   :  { %v5813_v5 = vpop.xlane.xlu1 %5812  ;;  %v5852_v12 = vsub.f32 %v10646_v35, %v5816_v1 }
 0xa49   :  { %v5851_v56 = vsub.f32 %v10649_v61, %v5813_v5 }
 0xa4a   :  { %v5873_v54 = vmul.f32 1.442695, %v5852_v12 }
 0xa4b   :  { %v5871_v23 = vmul.f32 1.442695, %v5851_v56 }
 0xa4c   :  { %8824 = vrot.lane.b32.xlu0 %v9298_v44, %s9148_s1  ;;  %v10727_v44 = vadd.f32 %v5790_v18, %v10633_v42 }
 0xa4d   :  { %9054 = vpow2.f32 %v5871_v23 }
 0xa4e   :  { %9056 = vpow2.f32 %v5873_v54  ;;  %v5841_v27 = vsel %vm998_vm3, %v10727_v44, -inf }
 0xa4f   :  { %v10731_v33 = vpop.eup %9050 }
 0xa50   :  { %v10733_v13 = vpop.eup %9052  ;;  %v5895_v35 = vsel %vm998_vm3, %v10731_v33, 0.0 }
 0xa51   :  { %v5898_v30 = vsel %vm998_vm3, %v10733_v13, 0.0 }
 0xa57   :  { %v10737_v61 = vpop.eup %9054 }
 0xa58   :  { %v10741_v42 = vpop.eup %9056  ;;  %v5907_v3 = vsel %vm998_vm3, %v10737_v61, 0.0 }
 0xa59   :  { %v5910_v38 = vsel %vm998_vm3, %v10741_v42, 0.0 }
 0xa64   :  { %5842 = vmax.xlane.f32.xlu1 %v5841_v27 }
 0xa68   :  { %5896 = vadd.xlane.f32.xlu1 %v5895_v35 }
 0xa6b   :  { %5899 = vadd.xlane.f32.xlu0 %v5898_v30 }
 0xa6c   :  { %5908 = vadd.xlane.f32.xlu1 %v5907_v3 }
 0xa6f   :  { %5911 = vadd.xlane.f32.xlu0 %v5910_v38 }
 0xaa3   :  { %v5825_v62 = vpop.xlane.xlu1 %5824 }
 0xaa4   :  { %v5855_v18 = vsub.f32 %v10662_v49, %v5825_v62 }
 0xaa6   :  { %v5879_v20 = vmul.f32 1.442695, %v5855_v18 }
 0xaab   :  { %v5810_v11 = vpop.xlane.xlu0 %5809 }
 0xaac   :  { %v5850_v52 = vsub.f32 %v10669_v40, %v5810_v11 }
 0xaae   :  { %v5869_v8 = vmul.f32 1.442695, %v5850_v52 }
 0xaaf   :  { %v5807_v15 = vpop.xlane.xlu0 %5806 }
 0xab0   :  { %9058 = vpow2.f32 %v5869_v8  ;;  %v5849_v24 = vsub.f32 %v10672_v21, %v5807_v15 }
 0xab2   :  { %v5867_v5 = vmul.f32 1.442695, %v5849_v24 }
 0xab3   :  { %v5828_v60 = vpop.xlane.xlu0 %5827 }
 0xab4   :  { %9060 = vpow2.f32 %v5867_v5  ;;  %v5856_v17 = vsub.f32 %v10677_v16, %v5828_v60  ;;  %v5819_v1 = vpop.xlane.xlu1 %5818 }
 0xab5   :  { %v5853_v56 = vsub.f32 %v10682_v50, %v5819_v1  ;;  %9062 = vpow2.f32 %v5879_v20 }
 0xab6   :  { %v5881_v25 = vmul.f32 1.442695, %v5856_v17 }
 0xab7   :  { %v5875_v12 = vmul.f32 1.442695, %v5853_v56  ;;  %v5822_v40 = vpop.xlane.xlu0 %5821 }
 0xab8   :  { %9064 = vpow2.f32 %v5881_v25  ;;  %v5854_v49 = vsub.f32 %v10685_v22, %v5822_v40  ;;  %v5837_v23 = vpop.xlane.xlu1 %5836 }
 0xab9   :  { %9066 = vpow2.f32 %v5875_v12  ;;  %v5859_v27 = vsub.f32 %v10690_v34, %v5837_v23 }
 0xaba   :  { %v10753_v54 = vpop.eup %9058  ;;  %v5877_v21 = vmul.f32 1.442695, %v5854_v49 }
 0xabb   :  { %v5840_v35 = vpop.xlane.xlu0 %5839  ;;  %v5904_v16 = vsel %vm998_vm3, %v10753_v54, 0.0  ;;  %v5887_v22 = vmul.f32 1.442695, %v5859_v27 }
 0xabc   :  { %9068 = vpow2.f32 %v5877_v21  ;;  %v5860_v50 = vsub.f32 %v10695_v19, %v5840_v35  ;;  %v5831_v30 = vpop.xlane.xlu1 %5830  ;;  %5905 = vadd.xlane.f32.xlu0 %v5904_v16 }
 0xabd   :  { %v5857_v3 = vsub.f32 %v10702_v6, %v5831_v30 }
 0xabe   :  { %v10760_v38 = vpop.eup %9060  ;;  %v5889_v62 = vmul.f32 1.442695, %v5860_v50 }
 0xabf   :  { %v5883_v11 = vmul.f32 1.442695, %v5857_v3  ;;  %v5834_v52 = vpop.xlane.xlu0 %5833  ;;  %v5901_v34 = vsel %vm998_vm3, %v10760_v38, 0.0  ;;  %v10764_v18 = vpop.eup %9062 }
 0xac0   :  { %9070 = vpow2.f32 %v5889_v62  ;;  %v5858_v8 = vsub.f32 %v10705_v10, %v5834_v52  ;;  %v8830_v15 = vpop.permute.xlu1 %8829  ;;  %5902 = vadd.xlane.f32.xlu1 %v5901_v34  ;;  %v5919_v17 = vsel %vm998_vm3, %v10764_v18, 0.0 }
 0xac1   :  { %9072 = vpow2.f32 %v5883_v11  ;;  %v8832_v19 = vunpack.i.h.bf16 %v8830_v15  ;;  %v8831_v24 = vunpack.i.l.bf16 %v8830_v15 }
 0xac2   :  { %v10767_v6 = vpop.eup %9064  ;;  %9074 = vpow2.f32 %v5887_v22  ;;  %v5885_v20 = vmul.f32 1.442695, %v5858_v8 }
 0xac3   :  { %v10769_v5 = vpack.c.bf16 %v8832_v19, %v8831_v24  ;;  %v5846_v60 = vpop.xlane.xlu0 %5845  ;;  %v5922_v1 = vsel %vm998_vm3, %v10767_v6, 0.0  ;;  %v10775_v56 = vpop.eup %9066 }
 0xac4   :  { %v5862_v10 = vsub.f32 %v10714_v26, %v5846_v60  ;;  %5920 = vadd.xlane.f32.xlu1 %v5919_v17  ;;  %5923 = vadd.xlane.f32.xlu0 %v5922_v1  ;;  %9076 = vpow2.f32 %v5885_v20  ;;  %v5913_v49 = vsel %vm998_vm3, %v10775_v56, 0.0  ;;  %v11157_v17 = vld [vmem:[#allocation30_spill] sm:$0xff] }
 0xac5   :  { %8487 = vmatprep.subr.bf16.mxu0 %v10769_v5 }
 0xac6   :  { %v10779_v25 = vpop.eup %9068  ;;  %v5893_v12 = vmul.f32 1.442695, %v5862_v10 }
 0xac7   :  { %v8825_v40 = vpop.permute.xlu0 %8824  ;;  %v5916_v23 = vsel %vm998_vm3, %v10779_v25, 0.0 }
 0xac8   :  { %v8827_v21 = vunpack.i.h.bf16 %v8825_v40  ;;  %v8826_v27 = vunpack.i.l.bf16 %v8825_v40  ;;  %5914 = vadd.xlane.f32.xlu1 %v5913_v49  ;;  %5917 = vadd.xlane.f32.xlu0 %v5916_v23  ;;  %9078 = vpow2.f32 %v5893_v12 }
 0xaca   :  { %v10785_v26 = vpop.eup %9070  ;;  %v8482_v35 = vpack.c.bf16 %v8827_v21, %v8826_v27 }
 0xacb   :  { %v10787_v16 = vpop.eup %9072  ;;  %v5934_v50 = vsel %vm998_vm3, %v10785_v26, 0.0 }
 0xacc   :  { %v10791_v30 = vpop.eup %9074  ;;  %5935 = vadd.xlane.f32.xlu0 %v5934_v50  ;;  %8483 = vmatprep.subr.bf16.mxu1 %v8482_v35  ;;  %v5925_v3 = vsel %vm998_vm3, %v10787_v16, 0.0 }
 0xacd   :  { %5926 = vadd.xlane.f32.xlu1 %v5925_v3  ;;  %8485 = vmatpush3.bf16.msra.mxu1 %v8482_v35  ;;  %v5931_v22 = vsel %vm998_vm3, %v10791_v30, 0.0 }
 0xace   :  { %v10797_v62 = vpop.eup %9076 }
 0xacf   :  { %v5928_v11 = vsel %vm998_vm3, %v10797_v62, 0.0 }
 0xad0   :  { %5932 = vadd.xlane.f32.xlu0 %v5931_v22 }
 0xad2   :  { %v10801_v52 = vpop.eup %9078 }
 0xad3   :  { %v5940_v34 = vsel %vm998_vm3, %v10801_v52, 0.0 }
 0xad4   :  { %5929 = vadd.xlane.f32.xlu0 %v5928_v11 }
 0xad8   :  { %5941 = vadd.xlane.f32.xlu0 %v5940_v34 }
 0xade   :  { %8839 = vrot.lane.b32.xlu1 %v9280_v36, %s9148_s1 }
 0xae2   :  { %8844 = vrot.lane.b32.xlu1 %v9302_v46, %s9148_s1 }
 0xae6   :  { %8849 = vrot.lane.b32.xlu1 %v9320_v55, %s9148_s1 }
 0xaee   :  { %8834 = vrot.lane.b32.xlu0 %v9336_v63, %s9148_s1 }
 0xaf1   :  { %v5843_v8 = vpop.xlane.xlu1 %5842 }
 0xaf2   :  { %6687 = vrot.lane.b32.xlu0 %v10225_v29, %s9149_s3  ;;  %v5861_v15 = vsub.f32 %v10727_v44, %v5843_v8 }
 0xaf4   :  { %v5891_v36 = vmul.f32 1.442695, %v5861_v15 }
 0xaf5   :  { %v5897_v19 = vpop.xlane.xlu1 %5896 }
 0xaf6   :  { %6751 = vrot.lane.b32.xlu0 %v10603_v39, %s9150_s0  ;;  %9080 = vrcp.f32 %v5897_v19 }
 0xaf8   :  { %v5900_v46 = vpop.xlane.xlu0 %5899 }
 0xaf9   :  { %9082 = vrcp.f32 %v5900_v46  ;;  %v5909_v55 = vpop.xlane.xlu1 %5908 }
 0xafa   :  { %9084 = vrcp.f32 %v5909_v55  ;;  %6691 = vrot.lane.b32.xlu0 %v10233_v47, %s9149_s3 }
 0xafb   :  { %9086 = vpow2.f32 %v5891_v36 }
 0xafc   :  { %v5912_v63 = vpop.xlane.xlu0 %5911 }
 0xafd   :  { %9088 = vrcp.f32 %v5912_v63 }
 0xafe   :  { %6755 = vrot.lane.b32.xlu0 %v10611_v28, %s9150_s0 }
 0xb00   :  { %v9081_v29 = vpop.eup %9080 }
 0xb01   :  { %v5944_v39 = vmul.f32 %v9081_v29, %v10731_v33 }
 0xb02   :  { %6695 = vrot.lane.b32.xlu0 %v10229_v48, %s9149_s3 }
 0xb03   :  { %v9083_v44 = vpop.eup %9082  ;;  %8098 = vmatprep.mubr.msk.f32.mxu0 %vm998_vm3, %v5944_v39 }
 0xb04   :  { %v9085_v24 = vpop.eup %9084  ;;  %v5946_v20 = vmul.f32 %v9083_v44, %v10733_v13  ;;  %v11156_v13 = vld [vmem:[#allocation26_spill] sm:$0xff] }
 0xb05   :  { %v5952_v47 = vmul.f32 %v9085_v24, %v10737_v61  ;;  %v10828_v60 = vpop.eup %9086 }
 0xb06   :  { %6759 = vrot.lane.b32.xlu0 %v10607_v7, %s9150_s0  ;;  %8099 = vmatmul.mubr.msk.f32.vlgmr.msra.gmra.mrb[60].mxu0 %vm998_vm3, %v5946_v20  ;;  %v5937_v33 = vsel %vm998_vm3, %v10828_v60, 0.0  ;;  %v11147_v7 = vld [vmem:[#allocation29_spill] sm:$0xff] }
 0xb07   :  { %v9089_v28 = vpop.eup %9088  ;;  %8489 = vmatpush3.bf16.msra.mxu0 %v10769_v5  ;;  %8112 = vmatprep.mubr.msk.f32.mxu0 %vm998_vm3, %v5952_v47 }
 0xb08   :  { %v5954_v48 = vmul.f32 %v9089_v28, %v10741_v42 }
 0xb0a   :  { %5938 = vadd.xlane.f32.xlu1 %v5937_v33  ;;  %6699 = vrot.lane.b32.xlu0 %v10241_v2, %s9149_s3  ;;  %v11148_v2 = vld [vmem:[#allocation21_spill] sm:$0xff] }
 0xb0b   :  { %8113 = vmatmul.mubr.msk.f32.vlgmr.msra.gmra.mrb[62].mxu0 %vm998_vm3, %v5954_v48 }
 0xb0e   :  { %6763 = vrot.lane.b32.xlu0 %v10619_v32, %s9150_s0  ;;  %v11149_v32 = vld [vmem:[#allocation27_spill] sm:$0xff] }
 0xb12   :  { %6703 = vrot.lane.b32.xlu0 %v10237_v53, %s9149_s3  ;;  %v11150_v53 = vld [vmem:[#allocation23_spill] sm:$0xff] }
 0xb16   :  { %6767 = vrot.lane.b32.xlu0 %v10615_v4, %s9150_s0  ;;  %v11152_v4 = vld [vmem:[#allocation22_spill] sm:$0xff] }
 0xb1a   :  { %6707 = vrot.lane.b32.xlu0 %v11147_v7, %s9149_s3 }
 0xb1b   :  { %8854 = vrot.lane.b32.xlu1 %v9340_v0, %s9148_s1  ;;  %v11151_v0 = vld [vmem:[#allocation31_spill] sm:$0xff] }
 0xb1e   :  { %6771 = vrot.lane.b32.xlu0 %v10657_v41, %s9150_s0 }
 0xb1f   :  { %6689 = vrot.lane.b32.xlu1 %v11148_v2, %s9149_s3 }
 0xb22   :  { %6711 = vrot.lane.b32.xlu0 %v11149_v32, %s9149_s3 }
 0xb23   :  { %6753 = vrot.lane.b32.xlu1 %v10601_v51, %s9150_s0  ;;  %v11153_v51 = vld [vmem:[#allocation25_spill] sm:$0xff] }
 0xb26   :  { %6775 = vrot.lane.b32.xlu0 %v10623_v37, %s9150_s0  ;;  %v11154_v37 = vld [vmem:[#allocation24_spill] sm:$0xff] }
 0xb27   :  { %6693 = vrot.lane.b32.xlu1 %v11150_v53, %s9149_s3 }
 0xb2a   :  { %6715 = vrot.lane.b32.xlu0 %v11151_v0, %s9149_s3  ;;  %v11158_v0 = vld [vmem:[#allocation8_spill] sm:$0xff] }
 0xb2b   :  { %6757 = vrot.lane.b32.xlu1 %v10609_v43, %s9150_s0  ;;  %v11155_v43 = vld [vmem:[#allocation28_spill] sm:$0xff] }
 0xb2f   :  { %6697 = vrot.lane.b32.xlu1 %v11152_v4, %s9149_s3 }
 0xb33   :  { %6761 = vrot.lane.b32.xlu1 %v10605_v14, %s9150_s0 }
 0xb37   :  { %6701 = vrot.lane.b32.xlu1 %v11153_v51, %s9149_s3 }
 0xb3b   :  { %6765 = vrot.lane.b32.xlu1 %v10617_v45, %s9150_s0 }
 0xb3f   :  { %6705 = vrot.lane.b32.xlu1 %v11154_v37, %s9149_s3 }
 0xb43   :  { %6769 = vrot.lane.b32.xlu1 %v10613_v9, %s9150_s0 }
 0xb47   :  { %6709 = vrot.lane.b32.xlu1 %v11155_v43, %s9149_s3  ;;  %v11159_v43 = vld [vmem:[#allocation10_spill] sm:$0xff] }
 0xb49   :  { %v5906_v41 = vpop.xlane.xlu0 %5905 }
 0xb4a   :  { %9090 = vrcp.f32 %v5906_v41 }
 0xb4b   :  { %6773 = vrot.lane.b32.xlu1 %v10655_v59, %s9150_s0 }
 0xb4d   :  { %v5903_v14 = vpop.xlane.xlu1 %5902 }
 0xb4e   :  { %9092 = vrcp.f32 %v5903_v14 }
 0xb4f   :  { %6713 = vrot.lane.b32.xlu1 %v11156_v13, %s9149_s3 }
 0xb51   :  { %v5921_v45 = vpop.xlane.xlu1 %5920  ;;  %v5924_v61 = vpop.xlane.xlu0 %5923 }
 0xb52   :  { %9094 = vrcp.f32 %v5921_v45 }
 0xb53   :  { %6777 = vrot.lane.b32.xlu1 %v10621_v58, %s9150_s0 }
 0xb54   :  { %v9091_v5 = vpop.eup %9090 }
 0xb55   :  { %v5915_v9 = vpop.xlane.xlu1 %5914  ;;  %v5918_v42 = vpop.xlane.xlu0 %5917  ;;  %v5950_v12 = vmul.f32 %v9091_v5, %v10753_v54  ;;  %v11161_v5 = vld [vmem:[#allocation12_spill] sm:$0xff] }
 0xb56   :  { %9096 = vrcp.f32 %v5915_v9 }
 0xb57   :  { %6717 = vrot.lane.b32.xlu1 %v11157_v17, %s9149_s3  ;;  %9098 = vrcp.f32 %v5924_v61 }
 0xb58   :  { %v9093_v59 = vpop.eup %9092 }
 0xb59   :  { %v5936_v1 = vpop.xlane.xlu0 %5935  ;;  %v5948_v10 = vmul.f32 %v9093_v59, %v10760_v38 }
 0xb5a   :  { %v5927_v40 = vpop.xlane.xlu1 %5926 }
 0xb5b   :  { %8105 = vmatprep.mubr.msk.f32.mxu1 %vm998_vm3, %v5948_v10 }
 0xb5c   :  { %v9095_v49 = vpop.eup %9094  ;;  %8106 = vmatmul.mubr.msk.f32.vlgmr.msra.gmra.mrb[68].mxu1 %vm998_vm3, %v5950_v12  ;;  %v11162_v12 = vld [vmem:[#allocation18_spill] sm:$0xff] }
 0xb5d   :  { %v5933_v58 = vpop.xlane.xlu0 %5932  ;;  %v5960_v23 = vmul.f32 %v9095_v49, %v10764_v18 }
 0xb5e   :  { %9100 = vrcp.f32 %v5933_v58  ;;  %v8840_v21 = vpop.permute.xlu1 %8839 }
 0xb5f   :  { %v8842_v27 = vunpack.i.h.bf16 %v8840_v21  ;;  %v8841_v35 = vunpack.i.l.bf16 %v8840_v21  ;;  %8126 = vmatprep.mubr.msk.f32.mxu0 %vm998_vm3, %v5960_v23  ;;  %9102 = vrcp.f32 %v5936_v1 }
 0xb60   :  { %v9097_v50 = vpop.eup %9096  ;;  %9104 = vrcp.f32 %v5918_v42 }
 0xb61   :  { %v8494_v38 = vpack.c.bf16 %v8842_v27, %v8841_v35  ;;  %v5930_v3 = vpop.xlane.xlu0 %5929  ;;  %v5956_v54 = vmul.f32 %v9097_v50, %v10775_v56  ;;  %v9099_v22 = vpop.eup %9098  ;;  %9106 = vrcp.f32 %v5927_v40 }
 0xb62   :  { %v8845_v11 = vpop.permute.xlu1 %8844  ;;  %v5962_v18 = vmul.f32 %v9099_v22, %v10767_v6  ;;  %9108 = vrcp.f32 %v5930_v3  ;;  %v11163_v3 = vld [vmem:[#allocation14_spill] sm:$0xff] }
 0xb63   :  { %8119 = vmatprep.mubr.msk.f32.mxu1 %vm998_vm3, %v5956_v54  ;;  %8495 = vmatprep.subr.bf16.mxu0 %v8494_v38  ;;  %v8847_v29 = vunpack.i.h.bf16 %v8845_v11  ;;  %v8846_v39 = vunpack.i.l.bf16 %v8845_v11 }
 0xb64   :  { %8497 = vmatpush3.bf16.msra.mxu0 %v8494_v38 }
 0xb65   :  { %v5942_v34 = vpop.xlane.xlu0 %5941  ;;  %v8498_v33 = vpack.c.bf16 %v8847_v29, %v8846_v39 }
 0xb66   :  { %v8850_v8 = vpop.permute.xlu1 %8849  ;;  %9110 = vrcp.f32 %v5942_v34 }
 0xb67   :  { %v8852_v15 = vunpack.i.h.bf16 %v8850_v8  ;;  %v8851_v19 = vunpack.i.l.bf16 %v8850_v8  ;;  %8127 = vmatmul.mubr.msk.f32.vlgmr.msra.gmra.mrb[64].mxu0 %vm998_vm3, %v5962_v18 }
 0xb68   :  { %v9101_v36 = vpop.eup %9100 }
 0xb69   :  { %v8502_v46 = vpack.c.bf16 %v8852_v15, %v8851_v19  ;;  %v8835_v56 = vpop.permute.xlu0 %8834  ;;  %v5968_v55 = vmul.f32 %v9101_v36, %v10791_v30  ;;  %v9103_v63 = vpop.eup %9102 }
 0xb6a   :  { %v8837_v44 = vunpack.i.h.bf16 %v8835_v56  ;;  %v8836_v24 = vunpack.i.l.bf16 %v8835_v56  ;;  %v9105_v20 = vpop.eup %9104  ;;  %v5970_v47 = vmul.f32 %v9103_v63, %v10785_v26  ;;  %v11164_v56 = vld [vmem:[#allocation7_spill] sm:$0xff] }
 0xb6b   :  { %8503 = vmatprep.subr.bf16.mxu0 %v8502_v46  ;;  %8140 = vmatprep.mubr.msk.f32.mxu0 %vm998_vm3, %v5968_v55  ;;  %v9107_v48 = vpop.eup %9106  ;;  %v5958_v30 = vmul.f32 %v9105_v20, %v10779_v25  ;;  %v11166_v20 = vld [vmem:[#allocation15_spill] sm:$0xff] }
 0xb6c   :  { %v8490_v6 = vpack.c.bf16 %v8837_v44, %v8836_v24  ;;  %8505 = vmatpush3.bf16.msra.mxu0 %v8502_v46  ;;  %v9109_v7 = vpop.eup %9108  ;;  %v5964_v32 = vmul.f32 %v9107_v48, %v10787_v16  ;;  %v11165_v44 = vld [vmem:[#allocation9_spill] sm:$0xff] }
 0xb6d   :  { %v10902_v28 = vpop.permute.xlu0 %6687  ;;  %v5966_v26 = vmul.f32 %v9109_v7, %v10797_v62  ;;  %v11160_v62 = vld [vmem:[#allocation16_spill] sm:$0xff]  ;;  %v11167_v7 = vld [vmem:[#allocation11_spill] sm:$0xff] }
 0xb6e   :  { %8491 = vmatprep.subr.bf16.mxu1 %v8490_v6 }
 0xb6f   :  { %8493 = vmatpush3.bf16.msra.mxu1 %v8490_v6  ;;  %8141 = vmatmul.mubr.msk.f32.vlgmr.msra.gmra.mrb[66].mxu0 %vm998_vm3, %v5970_v47 }
 0xb70   :  { %8499 = vmatprep.subr.bf16.mxu1 %v8498_v33  ;;  %v9111_v11 = vpop.eup %9110 }
 0xb71   :  { %v10906_v2 = vpop.permute.xlu0 %6751  ;;  %v5974_v36 = vmul.f32 %v9111_v11, %v10801_v52 }
 0xb72   :  { %8120 = vmatmul.mubr.msk.f32.vlgmr.msra.gmra.mrb[70].mxu1 %vm998_vm3, %v5958_v30 }
 0xb73   :  { %8501 = vmatpush3.bf16.msra.mxu1 %v8498_v33  ;;  %8133 = vmatprep.mubr.msk.f32.mxu1 %vm998_vm3, %v5964_v32 }
 0xb75   :  { %v6692_v53 = vpop.permute.xlu0 %6691 }
 0xb76   :  { %v6865_v4 = vsel %vm275_vm1, %v11158_v0, %v6692_v53  ;;  %8134 = vmatmul.mubr.msk.f32.vlgmr.msra.gmra.mrb[72].mxu1 %vm998_vm3, %v5966_v26 }
 0xb79   :  { %v6756_v25 = vpop.permute.xlu0 %6755 }
 0xb7a   :  { %v10916_v51 = vsel %vm998_vm3, %v6865_v4, %v6756_v25  ;;  %v6912_v4 = vld [vmem:[%s11115_s4] sm:$0xff]  ;;  %v6913_v25 = vld [vmem:[%s11115_s4 + $0x8] sm:$0xff] }
 0xb7d   :  { %v6696_v37 = vpop.permute.xlu0 %6695 }
 0xb7e   :  { %v6867_v16 = vsel %vm275_vm1, %v11159_v43, %v6696_v37  ;;  %v11168_v37 = vld [vmem:[#allocation17_spill] sm:$0xff] }
 0xb81   :  { %v6760_v41 = vpop.permute.xlu0 %6759 }
 0xb82   :  { %v10921_v14 = vsel %vm998_vm3, %v6867_v16, %v6760_v41  ;;  %v8510_v16 = vpack.c.bf16 %v6913_v25, %v6912_v4 }
 0xb84   :  { %8511 = vmatprep.subr.bf16.mxu0 %v8510_v16 }
 0xb85   :  { %v6700_v13 = vpop.permute.xlu0 %6699  ;;  %8513 = vmatpush3.bf16.msra.mxu0 %v8510_v16 }
 0xb86   :  { %v6869_v45 = vsel %vm275_vm1, %v11160_v62, %v6700_v13  ;;  %v6914_v62 = vld [vmem:[%s11115_s4 + $0x10] sm:$0xff] }
 0xb89   :  { %v6764_v61 = vpop.permute.xlu0 %6763 }
 0xb8a   :  { %v10926_v9 = vsel %vm998_vm3, %v6869_v45, %v6764_v61  ;;  %v6915_v45 = vld [vmem:[%s11115_s4 + $0x18] sm:$0xff] }
 0xb8b   :  { %v8514_v61 = vpack.c.bf16 %v6915_v45, %v6914_v62 }
 0xb8d   :  { %v6704_v42 = vpop.permute.xlu0 %6703  ;;  %8515 = vmatprep.subr.bf16.mxu0 %v8514_v61 }
 0xb8e   :  { %v6871_v17 = vsel %vm275_vm1, %v11161_v5, %v6704_v42  ;;  %v11169_v5 = vld [vmem:[#allocation13_spill] sm:$0xff]  ;;  %8517 = vmatpush3.bf16.msra.mxu0 %v8514_v61  ;;  %v11173_v61 = vld [vmem:[#allocation19_spill] sm:$0xff] }
 0xb91   :  { %v6768_v59 = vpop.permute.xlu0 %6767 }
 0xb92   :  { %v10931_v1 = vsel %vm998_vm3, %v6871_v17, %v6768_v59 }
 0xb95   :  { %v6708_v10 = vpop.permute.xlu0 %6707 }
 0xb96   :  { %v6873_v40 = vsel %vm275_vm1, %v11162_v12, %v6708_v10 }
 0xb97   :  { %v5939_v49 = vpop.xlane.xlu1 %5938 }
 0xb98   :  { %9112 = vrcp.f32 %v5939_v49 }
 0xb99   :  { %v6772_v58 = vpop.permute.xlu0 %6771 }
 0xb9a   :  { %v10936_v23 = vsel %vm998_vm3, %v6873_v40, %v6772_v58 }
 0xb9b   :  { %v8855_v21 = vpop.permute.xlu1 %8854 }
 0xb9c   :  { %v8857_v27 = vunpack.i.h.bf16 %v8855_v21  ;;  %v8856_v35 = vunpack.i.l.bf16 %v8855_v21 }
 0xb9d   :  { %v6712_v50 = vpop.permute.xlu0 %6711 }
 0xb9e   :  { %v8506_v38 = vpack.c.bf16 %v8857_v27, %v8856_v35  ;;  %v6875_v54 = vsel %vm275_vm1, %v11163_v3, %v6712_v50 }
 0xb9f   :  { %v10940_v22 = vpop.permute.xlu1 %6689 }
 0xba0   :  { %8507 = vmatprep.subr.bf16.mxu1 %v8506_v38 }
 0xba1   :  { %v6776_v18 = vpop.permute.xlu0 %6775  ;;  %8509 = vmatpush3.bf16.msra.mxu1 %v8506_v38 }
 0xba2   :  { %v9113_v34 = vpop.eup %9112  ;;  %v10943_v8 = vsel %vm998_vm3, %v6875_v54, %v6776_v18 }
 0xba3   :  { %v10945_v15 = vpop.permute.xlu1 %6753  ;;  %v5972_v19 = vmul.f32 %v9113_v34, %v10828_v60 }
 0xba5   :  { %8147 = vmatprep.mubr.msk.f32.mxu1 %vm998_vm3, %v5972_v19  ;;  %v11005_v34 = vpop.permute.xlu0 %6715 }
 0xba6   :  { %8148 = vmatmul.mubr.msk.f32.vlgmr.msra.gmra.mrb[74].mxu1 %vm998_vm3, %v5974_v36 }
 0xba7   :  { %v6694_v46 = vpop.permute.xlu1 %6693 }
 0xba8   :  { %v6866_v55 = vsel %vm275_vm1, %v11164_v56, %v6694_v46  ;;  %v11170_v46 = vld [vmem:[#allocation6_spill] sm:$0xff] }
 0xba9   :  { %v6863_v56 = vsel %vm275_vm1, %v11170_v46, %v10902_v28 }
 0xbab   :  { %v6758_v63 = vpop.permute.xlu1 %6757 }
 0xbac   :  { %v10954_v29 = vsel %vm998_vm3, %v6866_v55, %v6758_v63  ;;  %v6879_v63 = vsel %vm998_vm3, %v6863_v56, %v10906_v2 }
 0xbaf   :  { %v6698_v39 = vpop.permute.xlu1 %6697 }
 0xbb0   :  { %v6868_v24 = vsel %vm275_vm1, %v11165_v44, %v6698_v39  ;;  %v11171_v39 = vld [vmem:[#allocation5_spill] sm:$0xff] }
 0xbb1   :  { %v6864_v44 = vsel %vm275_vm1, %v11171_v39, %v10940_v22 }
 0xbb3   :  { %v6762_v6 = vpop.permute.xlu1 %6761 }
 0xbb4   :  { %v10959_v60 = vsel %vm998_vm3, %v6868_v24, %v6762_v6  ;;  %v6880_v6 = vsel %vm998_vm3, %v6864_v44, %v10945_v15 }
 0xbb7   :  { %v6702_v52 = vpop.permute.xlu1 %6701 }
 0xbb8   :  { %v6870_v47 = vsel %vm275_vm1, %v11166_v20, %v6702_v52 }
 0xbbb   :  { %v6766_v48 = vpop.permute.xlu1 %6765 }
 0xbbc   :  { %v10964_v33 = vsel %vm998_vm3, %v6870_v47, %v6766_v48 }
 0xbbf   :  { %v6706_v30 = vpop.permute.xlu1 %6705 }
 0xbc0   :  { %v6872_v32 = vsel %vm275_vm1, %v11167_v7, %v6706_v30 }
 0xbc3   :  { %v6770_v26 = vpop.permute.xlu1 %6769 }
 0xbc4   :  { %v10969_v53 = vsel %vm998_vm3, %v6872_v32, %v6770_v26 }
 0xbc7   :  { %v6710_v0 = vpop.permute.xlu1 %6709 }
 0xbc8   :  { %v6874_v43 = vsel %vm275_vm1, %v11168_v37, %v6710_v0 }
 0xbcb   :  { %v6774_v41 = vpop.permute.xlu1 %6773 }
 0xbcc   :  { %v10980_v13 = vsel %vm998_vm3, %v6874_v43, %v6774_v41 }
 0xbcf   :  { %v6714_v42 = vpop.permute.xlu1 %6713 }
 0xbd0   :  { %v6876_v17 = vsel %vm275_vm1, %v11169_v5, %v6714_v42 }
 0xbd3   :  { %v6778_v59 = vpop.permute.xlu1 %6777 }
 0xbd4   :  { %v10991_v10 = vsel %vm998_vm3, %v6876_v17, %v6778_v59 }
 0xbd7   :  { %v11003_v18 = vpop.permute.xlu1 %6717 }
 0xbd9   :  { %v8100_v12 = vpop.f32.mrb[60].mxu0 }
 0xbda   :  { %6817 = vrot.lane.b32.xlu1 %v8100_v12, %s9151_s20  ;;  %v6053_v40 = vpop.f32.mrb[61].mxu0  ;;  %v7357_v12 = vld [vmem:[%s11116_s5] ss:$0 sm:$0xff]  ;;  %s9152_s5 = smov [#allocation2]  }
 0xbdb   :  { %6815 = vrot.lane.b32.xlu0 %v6053_v40, %s9151_s20  ;;  %s7137_s22 = sshll.u32 %s9152_s5, 4  ;;  %s7138_s22 = int_to_ptr.vmem [resolvable:$true] %s7137_s22 }
 0xbdc   :  { %s9114_s23 = scalar_lea.vmem %s7138_s22, 2048  ;;  %p9119_p1 = scmp.lt.s32.totalorder %s7138_s22, %s7138_s22 }
 0xbdd   :  { %p9115_p0 = scmp.ne.s32.totalorder %s7138_s22, %s9114_s23  ;;  %p9120_p2 = scmp.lt.s32.totalorder %s9114_s23, %s9114_s23 }
 0xbde   :  { %v8114_v49 = vpop.f32.mrb[62].mxu0 }
 0xbdf   :  { %6825 = vrot.lane.b32.xlu1 %v8114_v49, %s9151_s20  ;;  %v6227_v58 = vpop.f32.mrb[63].mxu0  ;;  %p9121_p3 = por %p9120_p2, %p9119_p1 }
 0xbe0   :  { %6823 = vrot.lane.b32.xlu0 %v6227_v58, %s9151_s20 }
 0xbe1   :  { %p9122_p4 = pnand %p9121_p3, %p9115_p0 }
 0xc2f   :  { %v8107_v21 = vpop.f32.mrb[68].mxu1 }
 0xc30   :  { %6821 = vrot.lane.b32.xlu1 %v8107_v21, %s9151_s20  ;;  %v6140_v27 = vpop.f32.mrb[69].mxu1 }
 0xc31   :  { %6819 = vrot.lane.b32.xlu0 %v6140_v27, %s9151_s20 }
 0xc3a   :  { %v8128_v35 = vpop.f32.mrb[64].mxu0 }
 0xc3b   :  { %v6401_v50 = vpop.f32.mrb[65].mxu0  ;;  %6833 = vrot.lane.b32.xlu1 %v8128_v35, %s9151_s20 }
 0xc3c   :  { %6831 = vrot.lane.b32.xlu0 %v6401_v50, %s9151_s20 }
 0xc42   :  { %v8142_v38 = vpop.f32.mrb[66].mxu0 }
 0xc43   :  { %v6575_v3 = vpop.f32.mrb[67].mxu0 }
 0xc45   :  { %v8121_v54 = vpop.f32.mrb[70].mxu1 }
 0xc46   :  { %6829 = vrot.lane.b32.xlu1 %v8121_v54, %s9151_s20  ;;  %v6314_v11 = vpop.f32.mrb[71].mxu1 }
 0xc47   :  { %6827 = vrot.lane.b32.xlu0 %v6314_v11, %s9151_s20 }
 0xc49   :  { %v8135_v19 = vpop.f32.mrb[72].mxu1 }
 0xc4a   :  { %6841 = vrot.lane.b32.xlu1 %v8142_v38, %s9151_s20  ;;  %v6488_v36 = vpop.f32.mrb[73].mxu1 }
 0xc4b   :  { %6839 = vrot.lane.b32.xlu0 %v6575_v3, %s9151_s20 }
 0xc4c   :  { %v6818_v55 = vpop.permute.xlu1 %6817 }
 0xc4d   :  { %v6816_v24 = vpop.permute.xlu0 %6815  ;;  %v6897_v20 = vsel %vm6895_vm4, %v6880_v6, %v6818_v55 }
 0xc4e   :  { %v6896_v52 = vsel %vm6895_vm4, %v6879_v63, %v6816_v24  ;;  %6837 = vrot.lane.b32.xlu1 %v8135_v19, %s9151_s20 }
 0xc4f   :  { %8158 = vmatprep.mubr.msk.f32.mxu0 %vm51_vm0, %v6896_v52  ;;  %6835 = vrot.lane.b32.xlu0 %v6488_v36, %s9151_s20 }
 0xc50   :  { %8159 = vmatmul.mubr.msk.f32.vlgmr.msra.gmra.mrb[68].mxu0 %vm51_vm0, %v6897_v20 }
 0xc51   :  { %v6826_v22 = vpop.permute.xlu1 %6825 }
 0xc52   :  { %6781 = vrot.lane.b32.xlu1 %v10659_v31, %s9150_s0  ;;  %v6824_v15 = vpop.permute.xlu0 %6823 }
 0xc53   :  { %6779 = vrot.lane.b32.xlu0 %v10664_v57, %s9150_s0  ;;  %v6900_v31 = vsel %vm6895_vm4, %v10921_v14, %v6824_v15  ;;  %v6901_v57 = vsel %vm6895_vm4, %v10959_v60, %v6826_v22 }
 0xc79   :  { %v8149_v28 = vpop.f32.mrb[74].mxu1 }
 0xc7a   :  { %6845 = vrot.lane.b32.xlu1 %v8149_v28, %s9151_s20  ;;  %v6662_v2 = vpop.f32.mrb[75].mxu1 }
 0xc7b   :  { %6843 = vrot.lane.b32.xlu0 %v6662_v2, %s9151_s20 }
 0xca2   :  { %v6822_v47 = vpop.permute.xlu1 %6821 }
 0xca3   :  { %v6820_v48 = vpop.permute.xlu0 %6819  ;;  %v6899_v7 = vsel %vm6895_vm4, %v10954_v29, %v6822_v47 }
 0xca4   :  { %v6898_v30 = vsel %vm6895_vm4, %v10916_v51, %v6820_v48 }
 0xca5   :  { %8161 = vmatprep.mubr.msk.f32.mxu0 %vm51_vm0, %v6898_v30 }
 0xca6   :  { %8162 = vmatmul.mubr.msk.f32.gmra.mrb[70].mxu0 %vm51_vm0, %v6899_v7 }
 0xca7   :  { %8164 = vmatprep.mubr.msk.f32.mxu0 %vm51_vm0, %v6900_v31 }
 0xcaa   :  { %8165 = vmatmul.mubr.msk.f32.gmra.mrb[72].mxu0 %vm51_vm0, %v6901_v57 }
 0xcad   :  { %v6834_v32 = vpop.permute.xlu1 %6833 }
 0xcae   :  { %v6832_v26 = vpop.permute.xlu0 %6831  ;;  %v6905_v37 = vsel %vm6895_vm4, %v10969_v53, %v6834_v32 }
 0xcaf   :  { %v6904_v14 = vsel %vm6895_vm4, %v10931_v1, %v6832_v26 }
 0xcb8   :  { %v6830_v51 = vpop.permute.xlu1 %6829 }
 0xcb9   :  { %v6828_v0 = vpop.permute.xlu0 %6827  ;;  %v6903_v4 = vsel %vm6895_vm4, %v10964_v33, %v6830_v51 }
 0xcba   :  { %v6902_v29 = vsel %vm6895_vm4, %v10926_v9, %v6828_v0 }
 0xcbb   :  { %8167 = vmatprep.mubr.msk.f32.mxu0 %vm51_vm0, %v6902_v29 }
 0xcbc   :  { %v6842_v25 = vpop.permute.xlu1 %6841  ;;  %8168 = vmatmul.mubr.msk.f32.gmra.mrb[74].mxu0 %vm51_vm0, %v6903_v4 }
 0xcbd   :  { %8170 = vmatprep.mubr.msk.f32.mxu0 %vm51_vm0, %v6904_v14  ;;  %v6840_v60 = vpop.permute.xlu0 %6839  ;;  %v6909_v53 = vsel %vm6895_vm4, %v10991_v10, %v6842_v25 }
 0xcbe   :  { %v6908_v1 = vsel %vm6895_vm4, %v10943_v8, %v6840_v60  ;;  %v6878_v8 = vsel %vm275_vm1, %v11173_v61, %v11003_v18 }
 0xcc0   :  { %8171 = vmatmul.mubr.msk.f32.gmra.mrb[76].mxu0 %vm51_vm0, %v6905_v37  ;;  %v6838_v9 = vpop.permute.xlu1 %6837 }
 0xcc1   :  { %v6836_v43 = vpop.permute.xlu0 %6835  ;;  %v6907_v16 = vsel %vm6895_vm4, %v10980_v13, %v6838_v9 }
 0xcc2   :  { %v6906_v33 = vsel %vm6895_vm4, %v10936_v23, %v6836_v43  ;;  %v11172_v23 = vld [vmem:[#allocation20_spill] sm:$0xff] }
 0xcc3   :  { %8173 = vmatprep.mubr.msk.f32.mxu0 %vm51_vm0, %v6906_v33  ;;  %v6877_v13 = vsel %vm275_vm1, %v11172_v23, %v11005_v34 }
 0xcc4   :  { %8174 = vmatmul.mubr.msk.f32.gmra.mrb[78].mxu0 %vm51_vm0, %v6907_v16  ;;  %v6782_v41 = vpop.permute.xlu1 %6781 }
 0xcc5   :  { %8176 = vmatprep.mubr.msk.f32.mxu0 %vm51_vm0, %v6908_v1  ;;  %v6780_v62 = vpop.permute.xlu0 %6779  ;;  %v6894_v17 = vsel %vm998_vm3, %v6878_v8, %v6782_v41 }
 0xcc6   :  { %v6893_v42 = vsel %vm998_vm3, %v6877_v13, %v6780_v62 }
 0xcc8   :  { %8177 = vmatmul.mubr.msk.f32.gmra.mrb[80].mxu0 %vm51_vm0, %v6909_v53 }
 0xcec   :  { %v6846_v45 = vpop.permute.xlu1 %6845 }
 0xced   :  { %v6844_v5 = vpop.permute.xlu0 %6843  ;;  %v6911_v10 = vsel %vm6895_vm4, %v6894_v17, %v6846_v45 }
 0xcee   :  { %v6910_v59 = vsel %vm6895_vm4, %v6893_v42, %v6844_v5 }
 0xcef   :  { %8179 = vmatprep.mubr.msk.f32.mxu0 %vm51_vm0, %v6910_v59 }
 0xcf0   :  { %8180 = vmatmul.mubr.msk.f32.gmra.mrb[82].mxu0 %vm51_vm0, %v6911_v10 }
 0xd23   :  { %v8160_v40 = vpop.f32.mrb[68].mxu0 }
 0xd24   :  { %v7043_v49 = vadd.f32 %v8160_v40, %v7357_v12  ;;  %v7037_v58 = vpop.f32.mrb[69].mxu0 }
 0xd25   :  { %v7038_v21 = vadd.f32 %v7357_v12, %v7037_v58 }
 0xd26   :  { %7117 = vst.msk [vmem:[#allocation2 + $0x8] sm:$0xff] %vm51_vm0, %v7043_v49 }
 0xd27   :  { %7116 = vst.msk [vmem:[#allocation2] sm:$0xff] %vm51_vm0, %v7038_v21 }
 0xd79   :  { %v8163_v27 = vpop.f32.mrb[70].mxu0 }
 0xd7a   :  { %v7053_v35 = vadd.f32 %v8163_v27, %v7357_v12  ;;  %v7047_v50 = vpop.f32.mrb[71].mxu0 }
 0xd7b   :  { %v7048_v38 = vadd.f32 %v7357_v12, %v7047_v50 }
 0xd7c   :  { %7119 = vst.msk [vmem:[#allocation2 + $0x18] sm:$0xff] %vm51_vm0, %v7053_v35 }
 0xd7d   :  { %7118 = vst.msk [vmem:[#allocation2 + $0x10] sm:$0xff] %vm51_vm0, %v7048_v38  ;;  %v8166_v3 = vpop.f32.mrb[72].mxu0 }
 0xd7e   :  { %v7063_v54 = vadd.f32 %v8166_v3, %v7357_v12  ;;  %v7057_v11 = vpop.f32.mrb[73].mxu0 }
 0xd7f   :  { %v7058_v18 = vadd.f32 %v7357_v12, %v7057_v11 }
 0xd80   :  { %7121 = vst.msk [vmem:[#allocation2 + $0x28] sm:$0xff] %vm51_vm0, %v7063_v54 }
 0xd81   :  { %7120 = vst.msk [vmem:[#allocation2 + $0x20] sm:$0xff] %vm51_vm0, %v7058_v18 }
 0xd8f   :  { %v8169_v34 = vpop.f32.mrb[74].mxu0 }
 0xd90   :  { %v7073_v19 = vadd.f32 %v8169_v34, %v7357_v12  ;;  %v7067_v36 = vpop.f32.mrb[75].mxu0 }
 0xd91   :  { %v7068_v46 = vadd.f32 %v7357_v12, %v7067_v36 }
 0xd92   :  { %7123 = vst.msk [vmem:[#allocation2 + $0x38] sm:$0xff] %vm51_vm0, %v7073_v19 }
 0xd93   :  { %7122 = vst.msk [vmem:[#allocation2 + $0x30] sm:$0xff] %vm51_vm0, %v7068_v46  ;;  %v8172_v56 = vpop.f32.mrb[76].mxu0 }
 0xd94   :  { %v7083_v55 = vadd.f32 %v8172_v56, %v7357_v12  ;;  %v7077_v63 = vpop.f32.mrb[77].mxu0 }
 0xd95   :  { %v7078_v39 = vadd.f32 %v7357_v12, %v7077_v63 }
 0xd96   :  { %7125 = vst.msk [vmem:[#allocation2 + $0x48] sm:$0xff] %vm51_vm0, %v7083_v55 }
 0xd97   :  { %7124 = vst.msk [vmem:[#allocation2 + $0x40] sm:$0xff] %vm51_vm0, %v7078_v39  ;;  %v8175_v44 = vpop.f32.mrb[78].mxu0 }
 0xd98   :  { %v7093_v24 = vadd.f32 %v8175_v44, %v7357_v12  ;;  %v7087_v6 = vpop.f32.mrb[79].mxu0 }
 0xd99   :  { %v7088_v52 = vadd.f32 %v7357_v12, %v7087_v6 }
 0xd9a   :  { %7127 = vst.msk [vmem:[#allocation2 + $0x58] sm:$0xff] %vm51_vm0, %v7093_v24 }
 0xd9b   :  { %7126 = vst.msk [vmem:[#allocation2 + $0x50] sm:$0xff] %vm51_vm0, %v7088_v52  ;;  %v8178_v20 = vpop.f32.mrb[80].mxu0 }
 0xd9c   :  { %v7103_v28 = vadd.f32 %v8178_v20, %v7357_v12  ;;  %v7097_v2 = vpop.f32.mrb[81].mxu0 }
 0xd9d   :  { %v7098_v22 = vadd.f32 %v7357_v12, %v7097_v2 }
 0xd9e   :  { %7129 = vst.msk [vmem:[#allocation2 + $0x68] sm:$0xff] %vm51_vm0, %v7103_v28 }
 0xd9f   :  { %7128 = vst.msk [vmem:[#allocation2 + $0x60] sm:$0xff] %vm51_vm0, %v7098_v22 }
 0xdc3   :  { %v8181_v15 = vpop.f32.mrb[82].mxu0 }
 0xdc4   :  { %v7113_v47 = vadd.f32 %v8181_v15, %v7357_v12  ;;  %v7107_v48 = vpop.f32.mrb[83].mxu0 }
 0xdc5   :  { %v7108_v30 = vadd.f32 %v7357_v12, %v7107_v48 }
 0xdc6   :  { %7131 = vst.msk [vmem:[#allocation2 + $0x78] sm:$0xff] %vm51_vm0, %v7113_v47 }
 0xdc7   :  { %7130 = vst.msk [vmem:[#allocation2 + $0x70] sm:$0xff] %vm51_vm0, %v7108_v30 }
 0xdc8   :  { %9125 = shalt.err (!%p9122_p4)
}
 0xdc9   :  { %s9126_s26 = scalar_lea.hbm %s11117_s6, 2048 }
 0xdca   :  { %p9127_p5 = scmp.ne.s32.totalorder %s11117_s6, %s9126_s26  ;;  %p9130_p6 = scmp.lt.u32.totalorder %s9126_s26, %s11117_s6 }
 0xdcc   :  { %p9132_p7 = pnand %p9130_p6, %p9127_p5 }
 0xdce   :  { %9135 = shalt.err (!%p9132_p7)
}
 0xdcf   :  { %s9153_s7 = smov 128  }
 0xdd0   :  { %7143 = dma.vmem_to_hbm [thread:$0]  %s7138_s22, 2048, %s11117_s6, [#allocation3], %s9153_s7, %s9153_s7, %s9149_s3  }
 0xdd1   :  { %9136 = dma.done.wait [#allocation3], 2048  }
 0xdd2   :  { %9137 = vsyncadd [#allocation3], 4294965248 }
 0xdd3   :  { %7147 = vsyncpa [#allocation3], 1 }

</bundles_post_ra>
